<compile_context>
chip_gen: v5e
topology: v5e:2x2
jax: 0.10.0
libtpu: 0.0.40
codegen_flags: <defaults>
</compile_context>

<pallas_src>
import jax
import jax.numpy as jnp
from jax.experimental import pallas as pl
from jax.experimental.pallas import tpu as pltpu

IN_FEATURES = 28 * 28    # 784
HID_FEATURES = 28 * 28   # 784
OUT_FEATURES = 10

IN_PAD = 896             # 7 * 128 (lane-dense, multiple of MXU tile)
HID_PAD = 896            # 7 * 128
OUT_PAD = 128            # lane-dense output (full unmasked vst)

_VMEM_LIMIT_BYTES = 32 * 1024 * 1024   # explicit headroom (v5e default is 16 MiB)


def _round_up(a, m):
    return (a + m - 1) // m * m


def _choose_tm(n):
    """Batch-tile size: bf16-native (x16), MXU-friendly (x128), grid>=2 for big n."""
    if n < 512:
        # Single tile, minimal batch padding; 16-row granularity keeps packed
        # bf16 sublanes full (no masked/relayout handling on x and h).
        return _round_up(n, 16)
    # Split into >= 2 tiles so both v7x TensorCores get work via the
    # "parallel" batch axis; tiles are multiples of 128, capped at 512 so the
    # f32 `h` intermediate + double-buffered weights fit v5e's scoped VMEM.
    return min(512, _round_up((n + 1) // 2, 128))


def _mlp_kernel(x_ref, w1_ref, b1_ref, w2_ref, b2_ref, o_ref):
    # Two MXU matmuls with bf16 operands and f32 accumulation; f32 bias adds.
    x = x_ref[...]                                           # (TM, 896) bf16
    h = jnp.dot(x, w1_ref[...],
                preferred_element_type=jnp.float32)          # (TM, 896) f32
    h = h + b1_ref[...]                                      # f32 bias add (VPU, hidden under MXU)
    h = h.astype(jnp.bfloat16)                               # bf16 for 2nd MXU pass
    y = jnp.dot(h, w2_ref[...],
                preferred_element_type=jnp.float32)          # (TM, 128) f32
    y = y + b2_ref[...]
    o_ref[...] = y.astype(o_ref.dtype)


def prepare_params(w1, b1, w2, b2):
    """Pad + cast the weights ONCE (hoisted out of the per-call forward).

    Weights stored (in, out); transpose PyTorch's (out, in) before calling.
    """
    w1_p = jnp.pad(w1, ((0, IN_PAD - IN_FEATURES), (0, HID_PAD - HID_FEATURES))
                   ).astype(jnp.bfloat16)                                    # (896, 896)
    b1_p = jnp.pad(b1, (0, HID_PAD - HID_FEATURES)
                   ).reshape(1, HID_PAD).astype(jnp.float32)                 # (1, 896)
    w2_p = jnp.pad(w2, ((0, HID_PAD - HID_FEATURES), (0, OUT_PAD - OUT_FEATURES))
                   ).astype(jnp.bfloat16)                                    # (896, 128)
    b2_p = jnp.pad(b2, (0, OUT_PAD - OUT_FEATURES)
                   ).reshape(1, OUT_PAD).astype(jnp.float32)                 # (1, 128)
    return w1_p, b1_p, w2_p, b2_p


def linear_model_forward(x_nchw, w1_p, b1_p, w2_p, b2_p):
    """x_nchw: (N, 1, 28, 28) f32. Padded params from prepare_params(). Returns (N, 10) f32."""
    n = x_nchw.shape[0]
    x_flat = x_nchw.reshape(n, -1).astype(jnp.float32)       # nn.Flatten (NCHW row-major)
    assert x_flat.shape[1] == IN_FEATURES

    tm = _choose_tm(n)
    n_pad = _round_up(n, tm)
    grid = (n_pad // tm,)

    # Zero-pad activations to lane-dense, (8,128)-aligned shape; bf16 for the MXU.
    # Padded rows/columns are zero and contribute nothing to the matmuls.
    x_p = jnp.pad(x_flat, ((0, n_pad - n), (0, IN_PAD - IN_FEATURES))
                  ).astype(jnp.bfloat16)                                     # (N_pad, 896)

    flops = 2 * n_pad * (IN_PAD * HID_PAD + HID_PAD * OUT_PAD)
    bytes_accessed = (x_p.size * 2 + w1_p.size * 2 + w2_p.size * 2
                      + b1_p.size * 4 + b2_p.size * 4
                      + n_pad * OUT_PAD * 4)

    out_padded = pl.pallas_call(
        _mlp_kernel,
        out_shape=jax.ShapeDtypeStruct((n_pad, OUT_PAD), jnp.float32),
        grid=grid,
        in_specs=[
            pl.BlockSpec((tm, IN_PAD), lambda i: (i, 0)),          # x tile (pipelined)
            pl.BlockSpec((IN_PAD, HID_PAD), lambda i: (0, 0)),     # w1 (VMEM-resident)
            pl.BlockSpec((1, HID_PAD), lambda i: (0, 0)),          # b1 (resident)
            pl.BlockSpec((HID_PAD, OUT_PAD), lambda i: (0, 0)),    # w2 (resident)
            pl.BlockSpec((1, OUT_PAD), lambda i: (0, 0)),          # b2 (resident)
        ],
        out_specs=pl.BlockSpec((tm, OUT_PAD), lambda i: (i, 0)),
        compiler_params=pltpu.CompilerParams(
            dimension_semantics=("parallel",),
            vmem_limit_bytes=_VMEM_LIMIT_BYTES),
        cost_estimate=pl.CostEstimate(
            flops=flops, transcendentals=0, bytes_accessed=bytes_accessed),
    )(x_p, w1_p, b1_p, w2_p, b2_p)

    # Drop batch/lane padding outside the kernel.
    return out_padded[:n, :OUT_FEATURES]


def init_params(key):
    """Deterministic init mimicking PyTorch's default U(-1/sqrt(fan_in), +)."""
    k1, k2, k3, k4 = jax.random.split(key, 4)
    lim1 = 1.0 / jnp.sqrt(jnp.float32(IN_FEATURES))
    lim2 = 1.0 / jnp.sqrt(jnp.float32(HID_FEATURES))
    # Stored as (in, out): transpose of PyTorch's (out, in) weight layout.
    w1 = jax.random.uniform(k1, (IN_FEATURES, HID_FEATURES), jnp.float32,
                            -lim1, lim1)
    b1 = jax.random.uniform(k2, (HID_FEATURES,), jnp.float32, -lim1, lim1)
    w2 = jax.random.uniform(k3, (HID_FEATURES, OUT_FEATURES), jnp.float32,
                            -lim2, lim2)
    b2 = jax.random.uniform(k4, (OUT_FEATURES,), jnp.float32, -lim2, lim2)
    return w1, b1, w2, b2


if __name__ == "__main__":
    key = jax.random.PRNGKey(0)
    k_x, k_p = jax.random.split(key)

    # Small batch of MNIST-shaped inputs (NCHW), matching the PyTorch module.
    x = jax.random.normal(k_x, (2, 1, 28, 28), dtype=jnp.float32)
    w1, b1, w2, b2 = init_params(k_p)

    # Padding/casting of the weights happens ONCE, outside the forward pass.
    padded_params = prepare_params(w1, b1, w2, b2)

    fwd = jax.jit(linear_model_forward)
    y = fwd(x, *padded_params)
    y = jax.block_until_ready(y)
    assert y.shape == (2, OUT_FEATURES)

    # Reference 1: same bf16-operand / f32-accumulate math in pure JAX (tight check).
    x_flat = x.reshape(x.shape[0], -1)
    xb = x_flat.astype(jnp.bfloat16).astype(jnp.float32)
    w1b = w1.astype(jnp.bfloat16).astype(jnp.float32)
    w2b = w2.astype(jnp.bfloat16).astype(jnp.float32)
    h_ref = xb @ w1b + b1
    h_ref = h_ref.astype(jnp.bfloat16).astype(jnp.float32)
    y_ref_bf16 = h_ref @ w2b + b2
    assert jnp.allclose(y, y_ref_bf16, atol=1e-3, rtol=1e-3)

    # Reference 2: full-f32 PyTorch math (loose check covering the bf16 cast error).
    y_ref_f32 = (x_flat @ w1 + b1) @ w2 + b2
    assert jnp.allclose(y, y_ref_f32, atol=5e-2, rtol=5e-2)

    print("KERNEL_OK")
</pallas_src>

<mosaic_0001>
module attributes {stable_mosaic.version = 11 : i64} {
  func.func @_mlp_kernel(%arg0: i32, %arg1: memref<16x896xbf16, #tpu.memory_space<vmem>>, %arg2: memref<896x896xbf16, #tpu.memory_space<vmem>>, %arg3: memref<1x896xf32, #tpu.memory_space<vmem>>, %arg4: memref<896x128xbf16, #tpu.memory_space<vmem>>, %arg5: memref<1x128xf32, #tpu.memory_space<vmem>>, %arg6: memref<16x128xf32, #tpu.memory_space<vmem>>) attributes {dimension_semantics = [#tpu.dimension_semantics<parallel>], iteration_bounds = array<i64: 1>, scalar_prefetch = 0 : i64, scratch_operands = 0 : i64, tpu.core_type = #tpu.core_type<tc>, window_params = [{transform_indices = @transform_0, window_bounds = array<i64: 16, 896>}, {pipeline_mode = #tpu.pipeline_mode<synchronous>, transform_indices = @transform_1, window_bounds = array<i64: 896, 896>}, {pipeline_mode = #tpu.pipeline_mode<synchronous>, transform_indices = @transform_2, window_bounds = array<i64: 1, 896>}, {pipeline_mode = #tpu.pipeline_mode<synchronous>, transform_indices = @transform_3, window_bounds = array<i64: 896, 128>}, {pipeline_mode = #tpu.pipeline_mode<synchronous>, transform_indices = @transform_4, window_bounds = array<i64: 1, 128>}, {transform_indices = @transform_5, window_bounds = array<i64: 16, 128>}]} {
    %c0 = arith.constant 0 : index
    %c0_0 = arith.constant 0 : index
    %0 = vector.load %arg1[%c0, %c0_0] : memref<16x896xbf16, #tpu.memory_space<vmem>>, vector<16x896xbf16>
    %c0_1 = arith.constant 0 : index
    %c0_2 = arith.constant 0 : index
    %1 = vector.load %arg2[%c0_1, %c0_2] : memref<896x896xbf16, #tpu.memory_space<vmem>>, vector<896x896xbf16>
    %cst = arith.constant dense<0.000000e+00> : vector<16x896xf32>
    %2 = tpu.matmul %0, %1, %cst {dimension_numbers = #tpu.dot_dimension_numbers<[1], [0], [0], [1], [0, 0, 1, 1], [], []>} : vector<16x896xbf16>, vector<896x896xbf16>, vector<16x896xf32> -> vector<16x896xf32>
    %c0_3 = arith.constant 0 : index
    %c0_4 = arith.constant 0 : index
    %3 = vector.load %arg3[%c0_3, %c0_4] : memref<1x896xf32, #tpu.memory_space<vmem>>, vector<1x896xf32>
    %4 = vector.broadcast %3 : vector<1x896xf32> to vector<16x896xf32>
    %5 = arith.addf %2, %4 : vector<16x896xf32>
    %6 = arith.truncf %5 : vector<16x896xf32> to vector<16x896xbf16>
    %c0_5 = arith.constant 0 : index
    %c0_6 = arith.constant 0 : index
    %7 = vector.load %arg4[%c0_5, %c0_6] : memref<896x128xbf16, #tpu.memory_space<vmem>>, vector<896x128xbf16>
    %cst_7 = arith.constant dense<0.000000e+00> : vector<16x128xf32>
    %8 = tpu.matmul %6, %7, %cst_7 {dimension_numbers = #tpu.dot_dimension_numbers<[1], [0], [0], [1], [0, 0, 1, 1], [], []>} : vector<16x896xbf16>, vector<896x128xbf16>, vector<16x128xf32> -> vector<16x128xf32>
    %c0_8 = arith.constant 0 : index
    %c0_9 = arith.constant 0 : index
    %9 = vector.load %arg5[%c0_8, %c0_9] : memref<1x128xf32, #tpu.memory_space<vmem>>, vector<1x128xf32>
    %10 = vector.broadcast %9 : vector<1x128xf32> to vector<16x128xf32>
    %11 = arith.addf %8, %10 : vector<16x128xf32>
    %c0_10 = arith.constant 0 : index
    %c0_11 = arith.constant 0 : index
    %12 = vector.load %arg6[%c0_10, %c0_11] : memref<16x128xf32, #tpu.memory_space<vmem>>, vector<16x128xf32>
    tpu.vector_store %arg6[%c0_10, %c0_11], %11 {strides = array<i32>} : memref<16x128xf32, #tpu.memory_space<vmem>>, vector<16x128xf32>,
    return
  }
  func.func @transform_0(%arg0: i32) -> (i32, i32) {
    %c0_i32 = arith.constant 0 : i32
    %c0_i32_0 = arith.constant 0 : i32
    return %arg0, %c0_i32 : i32, i32
  }
  func.func @transform_1(%arg0: i32) -> (i32, i32) {
    %c0_i32 = arith.constant 0 : i32
    %c0_i32_0 = arith.constant 0 : i32
    %c0_i32_1 = arith.constant 0 : i32
    return %c0_i32, %c0_i32_0 : i32, i32
  }
  func.func @transform_2(%arg0: i32) -> (i32, i32) {
    %c0_i32 = arith.constant 0 : i32
    %c0_i32_0 = arith.constant 0 : i32
    %c0_i32_1 = arith.constant 0 : i32
    return %c0_i32, %c0_i32_0 : i32, i32
  }
  func.func @transform_3(%arg0: i32) -> (i32, i32) {
    %c0_i32 = arith.constant 0 : i32
    %c0_i32_0 = arith.constant 0 : i32
    %c0_i32_1 = arith.constant 0 : i32
    return %c0_i32, %c0_i32_0 : i32, i32
  }
  func.func @transform_4(%arg0: i32) -> (i32, i32) {
    %c0_i32 = arith.constant 0 : i32
    %c0_i32_0 = arith.constant 0 : i32
    %c0_i32_1 = arith.constant 0 : i32
    return %c0_i32, %c0_i32_0 : i32, i32
  }
  func.func @transform_5(%arg0: i32) -> (i32, i32) {
    %c0_i32 = arith.constant 0 : i32
    %c0_i32_0 = arith.constant 0 : i32
    return %arg0, %c0_i32 : i32, i32
  }
}

</mosaic_0001>

<bundles_post_ra>
// kernel: linear_model_forward.1
= control target key start
LH: loop header
LB: loop body
LE: loop exit
PB: predicated region body
PF: predicated region fallthrough
CT: control target
= control target key end

     0   :  { %10 = vsyncpa [#allocation3], 0  ;;  %s6569_s0 = inlined_call_operand.vmem [shape: bf16[16,896], index: 0, kind: input, shape index: {}]   ;;  %s6570_s1 = inlined_call_operand.hbm [shape: bf16[896,896], index: 1, kind: input, shape index: {}]   ;;  %s6571_s2 = inlined_call_operand.hbm [shape: f32[1,896], index: 2, kind: input, shape index: {}]   ;;  %s6572_s3 = inlined_call_operand.hbm [shape: bf16[896,128], index: 3, kind: input, shape index: {}]   ;;  %s6573_s4 = inlined_call_operand.hbm [shape: f32[1,128], index: 4, kind: input, shape index: {}]   ;;  %s6574_s5 = inlined_call_operand.vmem [shape: f32[16,128], index: 5, kind: output, shape index: {}]  }
   0x1   :  { %11 = vsyncpa [#allocation5], 0  ;;  %s33_s20 = sshll.u32 %s6571_s2, 4  ;;  %s34_s20 = int_to_ptr.hbm [resolvable:$true] %s33_s20 }
   0x2   :  { %12 = vsyncpa [#allocation8], 0  ;;  %s6242_s21 = smov [#allocation4]   ;;  %s19_s25 = sshll.u32 %s6570_s1, 4  ;;  %s20_s25 = int_to_ptr.hbm [resolvable:$true] %s19_s25 }
   0x3   :  { %s35_s22 = sshll.u32 %s6242_s21, 4  ;;  %s6243_s26 = smov [#allocation2]   ;;  %s36_s22 = int_to_ptr.vmem [resolvable:$true] %s35_s22 }
   0x4   :  { %38 = dma.hbm_to_vmem [thread:$0]  %s34_s20, 112, %s36_s22, [#allocation5]  }
   0x5   :  { %s21_s27 = sshll.u32 %s6243_s26, 4  ;;  %s6244_s28 = smov 448   ;;  %s22_s27 = int_to_ptr.vmem [resolvable:$true] %s21_s27 }
   0x6   :  { %s6245_s29 = smov 28   ;;  %s43_s2 = sshll.u32 %s6572_s3, 4  ;;  %s44_s2 = int_to_ptr.hbm [resolvable:$true] %s43_s2 }
   0x7   :  { %27 = dma.hbm_to_vmem [thread:$0]  %s20_s25, 50176, %s22_s27, [#allocation3], %s6244_s28, %s6244_s28, %s6245_s29  }
   0x8   :  { %s6246_s7 = smov [#allocation6]   ;;  %s57_s1 = sshll.u32 %s6573_s4, 4  ;;  %s58_s1 = int_to_ptr.hbm [resolvable:$true] %s57_s1 }
   0x9   :  { %s45_s8 = sshll.u32 %s6246_s7, 4  ;;  %s6247_s11 = smov 64   ;;  %s46_s8 = int_to_ptr.vmem [resolvable:$true] %s45_s8 }
   0xa   :  { %s6248_s12 = smov 4   ;;  %s6249_s13 = smov [#allocation7]  }
   0xb   :  { %51 = dma.hbm_to_vmem [thread:$0]  %s44_s2, 7168, %s46_s8, [#allocation5], %s6247_s11, %s6247_s11, %s6248_s12  }
   0xc   :  { %s59_s14 = sshll.u32 %s6249_s13, 4  ;;  %s60_s14 = int_to_ptr.vmem [resolvable:$true] %s59_s14 }
   0xd   :  { %62 = dma.hbm_to_vmem [thread:$0]  %s58_s1, 16, %s60_s14, [#allocation8]  }
   0xe   :  { %6236 = dma.done.wait [#allocation3], 50176  }
   0xf   :  { %6237 = vsyncadd [#allocation3], 4294917120 }
  0x10   :  { %6238 = dma.done.wait [#allocation5], 7280  }
  0x11   :  { %6239 = vsyncadd [#allocation5], 4294960016 }
  0x12   :  { %6240 = dma.done.wait [#allocation8], 16  }
  0x13   :  { %6241 = vsyncadd [#allocation8], 4294967280  ;;  %v4081_v0 = vld [vmem:[#allocation2 + $0x188] sm:$0xf]  ;;  %v5734_v1 = vld [vmem:[#allocation2 + $0x1a0] sm:$0xf0] }
  0x14   :  { %v4305_v2 = vld [vmem:[#allocation2 + $0x348] sm:$0xf]  ;;  %v4082_v3 = vor.u32 %v5734_v1, %v4081_v0  ;;  %v5790_v4 = vld [vmem:[#allocation2 + $0x360] sm:$0xf0]  ;;  %v4053_v11 = vld [vmem:[#allocation2 + $0x150] sm:$0xf] }
  0x15   :  { %v4529_v5 = vld [vmem:[#allocation2 + $0x508] sm:$0xf]  ;;  %v5846_v6 = vld [vmem:[#allocation2 + $0x520] sm:$0xf0]  ;;  %v4306_v7 = vor.u32 %v5790_v4, %v4305_v2  ;;  %v5727_v13 = vld [vmem:[#allocation2 + $0x168] sm:$0xf0] }
  0x16   :  { %v4530_v8 = vor.u32 %v5846_v6, %v4529_v5  ;;  %v4753_v9 = vld [vmem:[#allocation2 + $0x6c8] sm:$0xf]  ;;  %v5902_v10 = vld [vmem:[#allocation2 + $0x6e0] sm:$0xf0]  ;;  %2603 = vmatpush.bf16.msra.mxu0 %v4082_v3  ;;  %v4277_v14 = vld [vmem:[#allocation2 + $0x310] sm:$0xf]  ;;  %v4054_v16 = vor.u32 %v5727_v13, %v4053_v11 }
  0x17   :  { %v4754_v12 = vor.u32 %v5902_v10, %v4753_v9  ;;  %v5783_v15 = vld [vmem:[#allocation2 + $0x328] sm:$0xf0]  ;;  %2617 = vmatpush.bf16.msra.mxu1 %v4306_v7  ;;  %v4501_v18 = vld [vmem:[#allocation2 + $0x4d0] sm:$0xf]  ;;  %v4025_v23 = vld [vmem:[#allocation2 + $0x118] sm:$0xf] }
  0x18   :  { %2631 = vmatpush.bf16.msra.mxu2 %v4530_v8  ;;  %v4278_v17 = vor.u32 %v5783_v15, %v4277_v14  ;;  %v5839_v19 = vld [vmem:[#allocation2 + $0x4e8] sm:$0xf0]  ;;  %v4725_v20 = vld [vmem:[#allocation2 + $0x690] sm:$0xf]  ;;  %v5720_v24 = vld [vmem:[#allocation2 + $0x130] sm:$0xf0] }
  0x19   :  { %2645 = vmatpush.bf16.msra.mxu3 %v4754_v12  ;;  %v4502_v21 = vor.u32 %v5839_v19, %v4501_v18  ;;  %v5895_v22 = vld [vmem:[#allocation2 + $0x6a8] sm:$0xf0]  ;;  %v4249_v26 = vld [vmem:[#allocation2 + $0x2d8] sm:$0xf]  ;;  %v5776_v27 = vld [vmem:[#allocation2 + $0x2f0] sm:$0xf0]  ;;  %v4026_v29 = vor.u32 %v5720_v24, %v4025_v23 }
  0x1a   :  { %v4726_v25 = vor.u32 %v5895_v22, %v4725_v20  ;;  %v4473_v28 = vld [vmem:[#allocation2 + $0x498] sm:$0xf]  ;;  %2604 = vmatpush.bf16.msra.mxu0 %v4054_v16  ;;  %v5832_v30 = vld [vmem:[#allocation2 + $0x4b0] sm:$0xf0]  ;;  %v4250_v33 = vor.u32 %v5776_v27, %v4249_v26  ;;  %v3997_v35 = vld [vmem:[#allocation2 + $0xe0] sm:$0xf] }
  0x1b   :  { %v4697_v31 = vld [vmem:[#allocation2 + $0x658] sm:$0xf]  ;;  %v5888_v32 = vld [vmem:[#allocation2 + $0x670] sm:$0xf0]  ;;  %2618 = vmatpush.bf16.msra.mxu1 %v4278_v17  ;;  %v4474_v34 = vor.u32 %v5832_v30, %v4473_v28  ;;  %v5713_v36 = vld [vmem:[#allocation2 + $0xf8] sm:$0xf0] }
  0x1c   :  { %2632 = vmatpush.bf16.msra.mxu2 %v4502_v21  ;;  %v4221_v37 = vld [vmem:[#allocation2 + $0x2a0] sm:$0xf]  ;;  %v4698_v38 = vor.u32 %v5888_v32, %v4697_v31  ;;  %v5769_v39 = vld [vmem:[#allocation2 + $0x2b8] sm:$0xf0]  ;;  %v3998_v44 = vor.u32 %v5713_v36, %v3997_v35  ;;  %v3969_v47 = vld [vmem:[#allocation2 + $0xa8] sm:$0xf] }
  0x1d   :  { %2646 = vmatpush.bf16.msra.mxu3 %v4726_v25  ;;  %v4445_v40 = vld [vmem:[#allocation2 + $0x460] sm:$0xf]  ;;  %v5825_v41 = vld [vmem:[#allocation2 + $0x478] sm:$0xf0]  ;;  %v4222_v45 = vor.u32 %v5769_v39, %v4221_v37  ;;  %v5706_v48 = vld [vmem:[#allocation2 + $0xc0] sm:$0xf0] }
  0x1e   :  { %v4669_v42 = vld [vmem:[#allocation2 + $0x620] sm:$0xf]  ;;  %v5881_v43 = vld [vmem:[#allocation2 + $0x638] sm:$0xf0]  ;;  %2605 = vmatpush.bf16.msra.mxu0 %v4026_v29  ;;  %v4446_v46 = vor.u32 %v5825_v41, %v4445_v40  ;;  %v4193_v49 = vld [vmem:[#allocation2 + $0x268] sm:$0xf]  ;;  %v3970_v56 = vor.u32 %v5706_v48, %v3969_v47 }
  0x1f   :  { %2619 = vmatpush.bf16.msra.mxu1 %v4250_v33  ;;  %v4670_v50 = vor.u32 %v5881_v43, %v4669_v42  ;;  %v5762_v51 = vld [vmem:[#allocation2 + $0x280] sm:$0xf0]  ;;  %v4417_v52 = vld [vmem:[#allocation2 + $0x428] sm:$0xf]  ;;  %v3941_v59 = vld [vmem:[#allocation2 + $0x70] sm:$0xf] }
  0x20   :  { %2633 = vmatpush.bf16.msra.mxu2 %v4474_v34  ;;  %v5818_v53 = vld [vmem:[#allocation2 + $0x440] sm:$0xf0]  ;;  %v4641_v54 = vld [vmem:[#allocation2 + $0x5e8] sm:$0xf]  ;;  %v4194_v57 = vor.u32 %v5762_v51, %v4193_v49  ;;  %v5699_v60 = vld [vmem:[#allocation2 + $0x88] sm:$0xf0] }
  0x21   :  { %2647 = vmatpush.bf16.msra.mxu3 %v4698_v38  ;;  %v5874_v55 = vld [vmem:[#allocation2 + $0x600] sm:$0xf0]  ;;  %v4418_v58 = vor.u32 %v5818_v53, %v4417_v52  ;;  %v4165_v61 = vld [vmem:[#allocation2 + $0x230] sm:$0xf]  ;;  %v5755_v63 = vld [vmem:[#allocation2 + $0x248] sm:$0xf0]  ;;  %v3942_v4 = vor.u32 %v5699_v60, %v3941_v59 }
  0x22   :  { %2606 = vmatpush.bf16.msra.mxu0 %v3998_v44  ;;  %v4642_v62 = vor.u32 %v5874_v55, %v4641_v54  ;;  %v4389_v0 = vld [vmem:[#allocation2 + $0x3f0] sm:$0xf]  ;;  %v5811_v1 = vld [vmem:[#allocation2 + $0x408] sm:$0xf0]  ;;  %v4166_v5 = vor.u32 %v5755_v63, %v4165_v61  ;;  %v3913_v7 = vld [vmem:[#allocation2 + $0x38] sm:$0xf] }
  0x23   :  { %2620 = vmatpush.bf16.msra.mxu1 %v4222_v45  ;;  %v4613_v2 = vld [vmem:[#allocation2 + $0x5b0] sm:$0xf]  ;;  %v5867_v3 = vld [vmem:[#allocation2 + $0x5c8] sm:$0xf0]  ;;  %v4390_v6 = vor.u32 %v5811_v1, %v4389_v0  ;;  %v5692_v8 = vld [vmem:[#allocation2 + $0x50] sm:$0xf0] }
  0x24   :  { %2634 = vmatpush.bf16.msra.mxu2 %v4446_v46  ;;  %v4137_v9 = vld [vmem:[#allocation2 + $0x1f8] sm:$0xf]  ;;  %v4614_v10 = vor.u32 %v5867_v3, %v4613_v2  ;;  %v5748_v11 = vld [vmem:[#allocation2 + $0x210] sm:$0xf0]  ;;  %v3914_v16 = vor.u32 %v5692_v8, %v3913_v7  ;;  %v3885_v17 = vld [vmem:[#allocation2] sm:$0xf] }
  0x25   :  { %2648 = vmatpush.bf16.msra.mxu3 %v4670_v50  ;;  %v4361_v12 = vld [vmem:[#allocation2 + $0x3b8] sm:$0xf]  ;;  %v5804_v13 = vld [vmem:[#allocation2 + $0x3d0] sm:$0xf0]  ;;  %v5685_v18 = vld [vmem:[#allocation2 + $0x18] sm:$0xf0]  ;;  %v4138_v19 = vor.u32 %v5748_v11, %v4137_v9 }
  0x26   :  { %2607 = vmatpush.bf16.msra.mxu0 %v3970_v56  ;;  %v4585_v14 = vld [vmem:[#allocation2 + $0x578] sm:$0xf]  ;;  %v5860_v15 = vld [vmem:[#allocation2 + $0x590] sm:$0xf0]  ;;  %v4362_v20 = vor.u32 %v5804_v13, %v4361_v12  ;;  %v4109_v21 = vld [vmem:[#allocation2 + $0x1c0] sm:$0xf]  ;;  %v3886_v31 = vor.u32 %v5685_v18, %v3885_v17 }
  0x27   :  { %2621 = vmatpush.bf16.msra.mxu1 %v4194_v57  ;;  %v5741_v22 = vld [vmem:[#allocation2 + $0x1d8] sm:$0xf0]  ;;  %v4333_v23 = vld [vmem:[#allocation2 + $0x380] sm:$0xf]  ;;  %v4586_v24 = vor.u32 %v5860_v15, %v4585_v14  ;;  %v4977_v28 = vld [vmem:[#allocation2 + $0x888] sm:$0xf] }
  0x28   :  { %2635 = vmatpush.bf16.msra.mxu2 %v4418_v58  ;;  %v5797_v25 = vld [vmem:[#allocation2 + $0x398] sm:$0xf0]  ;;  %v4557_v26 = vld [vmem:[#allocation2 + $0x540] sm:$0xf]  ;;  %v5958_v29 = vld [vmem:[#allocation2 + $0x8a0] sm:$0xf0]  ;;  %v4110_v35 = vor.u32 %v5741_v22, %v4109_v21 }
  0x29   :  { %2649 = vmatpush.bf16.msra.mxu3 %v4642_v62  ;;  %v5853_v27 = vld [vmem:[#allocation2 + $0x558] sm:$0xf0]  ;;  %v5201_v30 = vld [vmem:[#allocation2 + $0xa48] sm:$0xf]  ;;  %v6014_v32 = vld [vmem:[#allocation2 + $0xa60] sm:$0xf0]  ;;  %v4334_v36 = vor.u32 %v5797_v25, %v4333_v23  ;;  %v4978_v40 = vor.u32 %v5958_v29, %v4977_v28 }
  0x2a   :  { %2608 = vmatpush.bf16.msra.mxu0 %v3942_v4  ;;  %v5425_v33 = vld [vmem:[#allocation2 + $0xc08] sm:$0xf]  ;;  %v6070_v34 = vld [vmem:[#allocation2 + $0xc20] sm:$0xf0]  ;;  %v5731_v37 = vld [vmem:[#allocation2 + $0x18c] sm:$0xf]  ;;  %v4558_v39 = vor.u32 %v5853_v27, %v4557_v26  ;;  %v5202_v43 = vor.u32 %v6014_v32, %v5201_v30 }
  0x2b   :  { %2622 = vmatpush.bf16.msra.mxu1 %v4166_v5  ;;  %v4083_v38 = vld [vmem:[#allocation2 + $0x1a4] sm:$0xf0]  ;;  %v4949_v41 = vld [vmem:[#allocation2 + $0x850] sm:$0xf]  ;;  %v5951_v42 = vld [vmem:[#allocation2 + $0x868] sm:$0xf0]  ;;  %v5426_v44 = vor.u32 %v6070_v34, %v5425_v33 }
  0x2c   :  { %2636 = vmatpush.bf16.msra.mxu2 %v4390_v6  ;;  %v5173_v45 = vld [vmem:[#allocation2 + $0xa10] sm:$0xf]  ;;  %v6007_v46 = vld [vmem:[#allocation2 + $0xa28] sm:$0xf0]  ;;  %v4086_v48 = vor.u32 %v5731_v37, %v4083_v38  ;;  %v5724_v50 = vld [vmem:[#allocation2 + $0x154] sm:$0xf]  ;;  %v4950_v55 = vor.u32 %v5951_v42, %v4949_v41 }
  0x2d   :  { %2650 = vmatpush.bf16.msra.mxu3 %v4614_v10  ;;  %v5397_v47 = vld [vmem:[#allocation2 + $0xbd0] sm:$0xf]  ;;  %v6063_v49 = vld [vmem:[#allocation2 + $0xbe8] sm:$0xf0]  ;;  %v3857_v52 = vld [vmem:[%s6569_s0] sm:$0xf]  ;;  %v5174_v59 = vor.u32 %v6007_v46, %v5173_v45 }
  0x2e   :  { %2609 = vmatpush.bf16.msra.mxu0 %v3914_v16  ;;  %v4055_v51 = vld [vmem:[#allocation2 + $0x16c] sm:$0xf0]  ;;  %v5678_v53 = vld [vmem:[%s6569_s0 + $0x18] sm:$0xf0]  ;;  %v3865_v54 = vld [vmem:[%s6569_s0 + $0x8] sm:$0xf]  ;;  %v5398_v60 = vor.u32 %v6063_v49, %v5397_v47 }
  0x2f   :  { %2623 = vmatpush.bf16.msra.mxu1 %v4138_v19  ;;  %v4921_v56 = vld [vmem:[#allocation2 + $0x818] sm:$0xf]  ;;  %v6301_v57 = vor.u32 %v5678_v53, %v3857_v52  ;;  %v5679_v58 = vld [vmem:[%s6569_s0 + $0x20] sm:$0xf0]  ;;  %v5944_v61 = vld [vmem:[#allocation2 + $0x830] sm:$0xf0]  ;;  %v4058_v1 = vor.u32 %v5724_v50, %v4055_v51 }
  0x30   :  { %2637 = vmatpush.bf16.msra.mxu2 %v4362_v20  ;;  %v5145_v62 = vld [vmem:[#allocation2 + $0x9d8] sm:$0xf]  ;;  %v6000_v63 = vld [vmem:[#allocation2 + $0x9f0] sm:$0xf0]  ;;  %v6306_v0 = vor.u32 %v5679_v58, %v3865_v54  ;;  %v5717_v4 = vld [vmem:[#allocation2 + $0x11c] sm:$0xf]  ;;  %v4922_v8 = vor.u32 %v5944_v61, %v4921_v56 }
  0x31   :  { %2651 = vmatpush.bf16.msra.mxu3 %v4586_v24  ;;  %v5369_v2 = vld [vmem:[#allocation2 + $0xb98] sm:$0xf]  ;;  %v6056_v3 = vld [vmem:[#allocation2 + $0xbb0] sm:$0xf0]  ;;  %v5675_v6 = vld [vmem:[%s6569_s0 + $0x4] sm:$0xf]  ;;  %v5146_v12 = vor.u32 %v6000_v63, %v5145_v62 }
  0x32   :  { %2610 = vmatpush.bf16.msra.mxu0 %v3886_v31  ;;  %v4027_v5 = vld [vmem:[#allocation2 + $0x134] sm:$0xf0]  ;;  %v3859_v7 = vld [vmem:[%s6569_s0 + $0x1c] sm:$0xf0]  ;;  %v5937_v10 = vld [vmem:[#allocation2 + $0x7f8] sm:$0xf0]  ;;  %v5370_v13 = vor.u32 %v6056_v3, %v5369_v2 }
  0x33   :  { %2624 = vmatpush.bf16.msra.mxu1 %v4110_v35  ;;  %v4893_v9 = vld [vmem:[#allocation2 + $0x7e0] sm:$0xf]  ;;  %v6316_v11 = vor.u32 %v5675_v6, %v3859_v7  ;;  %v5993_v15 = vld [vmem:[#allocation2 + $0x9b8] sm:$0xf0]  ;;  %v4030_v17 = vor.u32 %v5717_v4, %v4027_v5  ;;  %v5676_v19 = vld [vmem:[%s6569_s0 + $0xc] sm:$0xf] }
  0x34   :  { %2638 = vmatpush.bf16.msra.mxu2 %v4334_v36  ;;  %v5117_v14 = vld [vmem:[#allocation2 + $0x9a0] sm:$0xf]  ;;  %v6049_v18 = vld [vmem:[#allocation2 + $0xb78] sm:$0xf0]  ;;  %v3867_v20 = vld [vmem:[%s6569_s0 + $0x24] sm:$0xf0]  ;;  %v4894_v24 = vor.u32 %v5937_v10, %v4893_v9 }
  0x35   :  { %2652 = vmatpush.bf16.msra.mxu3 %v4558_v39  ;;  %2611 = vmatmul.bf16.vlgmr.msra.gmra.mxu0 %v6301_v57  ;;  %v5341_v16 = vld [vmem:[#allocation2 + $0xb60] sm:$0xf]  ;;  %v5710_v21 = vld [vmem:[#allocation2 + $0xe4] sm:$0xf]  ;;  %v6325_v23 = vor.u32 %v5676_v19, %v3867_v20  ;;  %v5118_v25 = vor.u32 %v5993_v15, %v5117_v14  ;;  %v4865_v27 = vld [vmem:[#allocation2 + $0x7a8] sm:$0xf] }
  0x36   :  { %2659 = vmatpush.bf16.msrb.mxu0 %v4978_v40  ;;  %2625 = vmatmul.bf16.vlgmr.msra.gmra.mxu1 %v6316_v11  ;;  %v3999_v22 = vld [vmem:[#allocation2 + $0xfc] sm:$0xf0]  ;;  %v5342_v26 = vor.u32 %v6049_v18, %v5341_v16  ;;  %v5930_v28 = vld [vmem:[#allocation2 + $0x7c0] sm:$0xf0]  ;;  %v5089_v29 = vld [vmem:[#allocation2 + $0x968] sm:$0xf] }
  0x37   :  { %2673 = vmatpush.bf16.msrb.mxu1 %v5202_v43  ;;  %2639 = vmatmul.bf16.vlgmr.msra.gmra.mxu2 %v6306_v0  ;;  %v4002_v30 = vor.u32 %v5710_v21, %v3999_v22  ;;  %v5986_v31 = vld [vmem:[#allocation2 + $0x980] sm:$0xf0]  ;;  %v5313_v32 = vld [vmem:[#allocation2 + $0xb28] sm:$0xf]  ;;  %v5703_v34 = vld [vmem:[#allocation2 + $0xac] sm:$0xf]  ;;  %v4866_v36 = vor.u32 %v5930_v28, %v4865_v27 }
  0x38   :  { %2687 = vmatpush.bf16.msrb.mxu2 %v5426_v44  ;;  %v6042_v33 = vld [vmem:[#allocation2 + $0xb40] sm:$0xf0]  ;;  %v3971_v35 = vld [vmem:[#allocation2 + $0xc4] sm:$0xf0]  ;;  %2653 = vmatmul.bf16.vlgmr.msra.gmra.mxu3 %v6325_v23  ;;  %v5090_v37 = vor.u32 %v5986_v31, %v5089_v29  ;;  %v4837_v39 = vld [vmem:[#allocation2 + $0x770] sm:$0xf] }
  0x39   :  { %2701 = vmatpush.bf16.msrb.mxu3 %v4086_v48  ;;  %v5314_v38 = vor.u32 %v6042_v33, %v5313_v32  ;;  %v5923_v40 = vld [vmem:[#allocation2 + $0x788] sm:$0xf0]  ;;  %v5061_v41 = vld [vmem:[#allocation2 + $0x930] sm:$0xf]  ;;  %v3974_v42 = vor.u32 %v5703_v34, %v3971_v35  ;;  %v5696_v46 = vld [vmem:[#allocation2 + $0x74] sm:$0xf] }
  0x3a   :  { %2660 = vmatpush.bf16.msrb.mxu0 %v4950_v55  ;;  %v5979_v43 = vld [vmem:[#allocation2 + $0x948] sm:$0xf0]  ;;  %v5285_v44 = vld [vmem:[#allocation2 + $0xaf0] sm:$0xf]  ;;  %v4838_v48 = vor.u32 %v5923_v40, %v4837_v39  ;;  %v4809_v51 = vld [vmem:[#allocation2 + $0x738] sm:$0xf] }
  0x3b   :  { %2674 = vmatpush.bf16.msrb.mxu1 %v5174_v59  ;;  %v6035_v45 = vld [vmem:[#allocation2 + $0xb08] sm:$0xf0]  ;;  %v3943_v47 = vld [vmem:[#allocation2 + $0x8c] sm:$0xf0]  ;;  %v5062_v49 = vor.u32 %v5979_v43, %v5061_v41  ;;  %v5916_v52 = vld [vmem:[#allocation2 + $0x750] sm:$0xf0] }
  0x3c   :  { %2688 = vmatpush.bf16.msrb.mxu2 %v5398_v60  ;;  %v5286_v50 = vor.u32 %v6035_v45, %v5285_v44  ;;  %v5033_v53 = vld [vmem:[#allocation2 + $0x8f8] sm:$0xf]  ;;  %v3946_v54 = vor.u32 %v5696_v46, %v3943_v47  ;;  %v5972_v55 = vld [vmem:[#allocation2 + $0x910] sm:$0xf0]  ;;  %v5689_v59 = vld [vmem:[#allocation2 + $0x3c] sm:$0xf]  ;;  %v4810_v62 = vor.u32 %v5916_v52, %v4809_v51 }
  0x3d   :  { %2702 = vmatpush.bf16.msrb.mxu3 %v4058_v1  ;;  %v5257_v56 = vld [vmem:[#allocation2 + $0xab8] sm:$0xf]  ;;  %v6028_v58 = vld [vmem:[#allocation2 + $0xad0] sm:$0xf0]  ;;  %v4781_v61 = vld [vmem:[#allocation2 + $0x700] sm:$0xf]  ;;  %v5034_v3 = vor.u32 %v5972_v55, %v5033_v53 }
  0x3e   :  { %2661 = vmatpush.bf16.msrb.mxu0 %v4922_v8  ;;  %v3915_v60 = vld [vmem:[#allocation2 + $0x54] sm:$0xf0]  ;;  %v5909_v63 = vld [vmem:[#allocation2 + $0x718] sm:$0xf0]  ;;  %v5005_v1 = vld [vmem:[#allocation2 + $0x8c0] sm:$0xf]  ;;  %v5258_v4 = vor.u32 %v6028_v58, %v5257_v56 }
  0x3f   :  { %2675 = vmatpush.bf16.msrb.mxu1 %v5146_v12  ;;  %v5965_v2 = vld [vmem:[#allocation2 + $0x8d8] sm:$0xf0]  ;;  %v5229_v5 = vld [vmem:[#allocation2 + $0xa80] sm:$0xf]  ;;  %v5682_v7 = vld [vmem:[#allocation2 + $0x4] sm:$0xf]  ;;  %v3918_v8 = vor.u32 %v5689_v59, %v3915_v60  ;;  %v4782_v16 = vor.u32 %v5909_v63, %v4781_v61 }
  0x40   :  { %2689 = vmatpush.bf16.msrb.mxu2 %v5370_v13  ;;  %v6021_v6 = vld [vmem:[#allocation2 + $0xa98] sm:$0xf0]  ;;  %v3887_v9 = vld [vmem:[#allocation2 + $0x1c] sm:$0xf0]  ;;  %v5787_v10 = vld [vmem:[#allocation2 + $0x34c] sm:$0xf]  ;;  %v5006_v20 = vor.u32 %v5965_v2, %v5005_v1 }
  0x41   :  { %2703 = vmatpush.bf16.msrb.mxu3 %v4030_v17  ;;  %v4307_v12 = vld [vmem:[#allocation2 + $0x364] sm:$0xf0]  ;;  %v5843_v13 = vld [vmem:[#allocation2 + $0x50c] sm:$0xf]  ;;  %v5230_v21 = vor.u32 %v6021_v6, %v5229_v5  ;;  %v3873_v22 = vld [vmem:[%s6569_s0 + $0x10] sm:$0xf] }
  0x42   :  { %2662 = vmatpush.bf16.msrb.mxu0 %v4894_v24  ;;  %v4531_v14 = vld [vmem:[#allocation2 + $0x524] sm:$0xf0]  ;;  %v5899_v15 = vld [vmem:[#allocation2 + $0x6cc] sm:$0xf]  ;;  %v4310_v27 = vor.u32 %v5787_v10, %v4307_v12  ;;  %v5681_v28 = vld [vmem:[%s6569_s0 + $0x30] sm:$0xf0] }
  0x43   :  { %2676 = vmatpush.bf16.msrb.mxu1 %v5118_v25  ;;  %v4755_v17 = vld [vmem:[#allocation2 + $0x6e4] sm:$0xf0]  ;;  %v5955_v18 = vld [vmem:[#allocation2 + $0x88c] sm:$0xf]  ;;  %v3881_v25 = vld [vmem:[%s6569_s0 + $0x18] sm:$0xf]  ;;  %v4534_v31 = vor.u32 %v5843_v13, %v4531_v14 }
  0x44   :  { %2690 = vmatpush.bf16.msrb.mxu2 %v5342_v26  ;;  %v4979_v19 = vld [vmem:[#allocation2 + $0x8a4] sm:$0xf0]  ;;  %v5680_v24 = vld [vmem:[%s6569_s0 + $0x28] sm:$0xf0]  ;;  %v3890_v26 = vor.u32 %v5682_v7, %v3887_v9  ;;  %v5677_v29 = vld [vmem:[%s6569_s0 + $0x14] sm:$0xf]  ;;  %v4758_v32 = vor.u32 %v5899_v15, %v4755_v17  ;;  %v6348_v41 = vor.u32 %v5681_v28, %v3881_v25 }
  0x45   :  { %2704 = vmatpush.bf16.msrb.mxu3 %v4002_v30  ;;  %v3875_v30 = vld [vmem:[%s6569_s0 + $0x2c] sm:$0xf0]  ;;  %v5780_v33 = vld [vmem:[#allocation2 + $0x314] sm:$0xf]  ;;  %v4475_v52 = vld [vmem:[#allocation2 + $0x4b4] sm:$0xf0] }
  0x46   :  { %2663 = vmatpush.bf16.msrb.mxu0 %v4866_v36  ;;  %v4279_v34 = vld [vmem:[#allocation2 + $0x32c] sm:$0xf0]  ;;  %v5836_v35 = vld [vmem:[#allocation2 + $0x4d4] sm:$0xf]  ;;  %v4982_v36 = vor.u32 %v5955_v18, %v4979_v19  ;;  %6578 = vst [vmem:[#allocation12_spill] sm:$0xff] %v6348_v41 }
  0x47   :  { %2677 = vmatpush.bf16.msrb.mxu1 %v5090_v37  ;;  %v6346_v37 = vor.u32 %v5680_v24, %v3873_v22  ;;  %v5892_v39 = vld [vmem:[#allocation2 + $0x694] sm:$0xf]  ;;  %v4727_v40 = vld [vmem:[#allocation2 + $0x6ac] sm:$0xf0]  ;;  %v4282_v45 = vor.u32 %v5780_v33, %v4279_v34  ;;  %v5885_v53 = vld [vmem:[#allocation2 + $0x65c] sm:$0xf] }
  0x48   :  { %2691 = vmatpush.bf16.msrb.mxu2 %v5314_v38  ;;  %v4503_v38 = vld [vmem:[#allocation2 + $0x4ec] sm:$0xf0]  ;;  %v5948_v43 = vld [vmem:[#allocation2 + $0x854] sm:$0xf]  ;;  %v4730_v47 = vor.u32 %v5892_v39, %v4727_v40  ;;  %v5941_v55 = vld [vmem:[#allocation2 + $0x81c] sm:$0xf] }
  0x49   :  { %2705 = vmatpush.bf16.msrb.mxu3 %v3974_v42  ;;  %v6350_v42 = vor.u32 %v5677_v29, %v3875_v30  ;;  %v4951_v44 = vld [vmem:[#allocation2 + $0x86c] sm:$0xf0]  ;;  %v4506_v46 = vor.u32 %v5836_v35, %v4503_v38  ;;  %v4923_v56 = vld [vmem:[#allocation2 + $0x834] sm:$0xf0]  ;;  %v5766_v61 = vld [vmem:[#allocation2 + $0x2a4] sm:$0xf] }
  0x4a   :  { %2664 = vmatpush.bf16.msrb.mxu0 %v4838_v48  ;;  %v5773_v48 = vld [vmem:[#allocation2 + $0x2dc] sm:$0xf]  ;;  %v4954_v51 = vor.u32 %v5948_v43, %v4951_v44  ;;  %v5822_v63 = vld [vmem:[#allocation2 + $0x464] sm:$0xf]  ;;  %v4926_v1 = vor.u32 %v5941_v55, %v4923_v56  ;;  %v4447_v2 = vld [vmem:[#allocation2 + $0x47c] sm:$0xf0] }
  0x4b   :  { %2678 = vmatpush.bf16.msrb.mxu1 %v5062_v49  ;;  %v4251_v49 = vld [vmem:[#allocation2 + $0x2f4] sm:$0xf0]  ;;  %v5934_v5 = vld [vmem:[#allocation2 + $0x7e4] sm:$0xf]  ;;  %v4895_v6 = vld [vmem:[#allocation2 + $0x7fc] sm:$0xf0] }
  0x4c   :  { %2692 = vmatpush.bf16.msrb.mxu2 %v5286_v50  ;;  %v5829_v50 = vld [vmem:[#allocation2 + $0x49c] sm:$0xf]  ;;  %v4254_v58 = vor.u32 %v5773_v48, %v4251_v49  ;;  %v5759_v10 = vld [vmem:[#allocation2 + $0x26c] sm:$0xf]  ;;  %v4195_v12 = vld [vmem:[#allocation2 + $0x284] sm:$0xf0]  ;;  %v4898_v14 = vor.u32 %v5934_v5, %v4895_v6 }
  0x4d   :  { %2706 = vmatpush.bf16.msrb.mxu3 %v3946_v54  ;;  %v4699_v54 = vld [vmem:[#allocation2 + $0x674] sm:$0xf0]  ;;  %v4478_v59 = vor.u32 %v5829_v50, %v4475_v52  ;;  %v5815_v13 = vld [vmem:[#allocation2 + $0x42c] sm:$0xf]  ;;  %v4419_v15 = vld [vmem:[#allocation2 + $0x444] sm:$0xf0] }
  0x4e   :  { %2665 = vmatpush.bf16.msrb.mxu0 %v4810_v62  ;;  %v4702_v60 = vor.u32 %v5885_v53, %v4699_v54  ;;  %v4223_v62 = vld [vmem:[#allocation2 + $0x2bc] sm:$0xf0]  ;;  %v4643_v17 = vld [vmem:[#allocation2 + $0x604] sm:$0xf0]  ;;  %v5927_v18 = vld [vmem:[#allocation2 + $0x7ac] sm:$0xf] }
  0x4f   :  { %2679 = vmatpush.bf16.msrb.mxu1 %v5034_v3  ;;  %v5878_v3 = vld [vmem:[#allocation2 + $0x624] sm:$0xf]  ;;  %v4226_v7 = vor.u32 %v5766_v61, %v4223_v62  ;;  %v4867_v19 = vld [vmem:[#allocation2 + $0x7c4] sm:$0xf0]  ;;  %v5752_v24 = vld [vmem:[#allocation2 + $0x234] sm:$0xf] }
  0x50   :  { %2693 = vmatpush.bf16.msrb.mxu2 %v5258_v4  ;;  %v4671_v4 = vld [vmem:[#allocation2 + $0x63c] sm:$0xf0]  ;;  %v4167_v25 = vld [vmem:[#allocation2 + $0x24c] sm:$0xf0]  ;;  %v5864_v29 = vld [vmem:[#allocation2 + $0x5b4] sm:$0xf] }
  0x51   :  { %2707 = vmatpush.bf16.msrb.mxu3 %v3918_v8  ;;  %v4450_v8 = vor.u32 %v5822_v63, %v4447_v2  ;;  %v4674_v9 = vor.u32 %v5878_v3, %v4671_v4  ;;  %v4391_v28 = vld [vmem:[#allocation2 + $0x40c] sm:$0xf0]  ;;  %v4170_v33 = vor.u32 %v5752_v24, %v4167_v25  ;;  %v4139_v38 = vld [vmem:[#allocation2 + $0x214] sm:$0xf0]  ;;  %v5801_v39 = vld [vmem:[#allocation2 + $0x3bc] sm:$0xf] }
  0x52   :  { %2666 = vmatpush.bf16.msrb.mxu0 %v4782_v16  ;;  %v5871_v16 = vld [vmem:[#allocation2 + $0x5ec] sm:$0xf]  ;;  %v4615_v30 = vld [vmem:[#allocation2 + $0x5cc] sm:$0xf0]  ;;  %v4363_v43 = vld [vmem:[#allocation2 + $0x3d4] sm:$0xf0] }
  0x53   :  { %2680 = vmatpush.bf16.msrb.mxu1 %v5006_v20  ;;  %v4198_v20 = vor.u32 %v5759_v10, %v4195_v12  ;;  %v4646_v22 = vor.u32 %v5871_v16, %v4643_v17  ;;  %v4618_v35 = vor.u32 %v5864_v29, %v4615_v30  ;;  %v5857_v44 = vld [vmem:[#allocation2 + $0x57c] sm:$0xf]  ;;  %v5738_v49 = vld [vmem:[#allocation2 + $0x1c4] sm:$0xf]  ;;  %v4111_v50 = vld [vmem:[#allocation2 + $0x1dc] sm:$0xf0] }
  0x54   :  { %2694 = vmatpush.bf16.msrb.mxu2 %v5230_v21  ;;  %v4422_v21 = vor.u32 %v5815_v13, %v4419_v15  ;;  %v5794_v53 = vld [vmem:[#allocation2 + $0x384] sm:$0xf]  ;;  %v4335_v54 = vld [vmem:[#allocation2 + $0x39c] sm:$0xf0]  ;;  %v6011_v61 = vld [vmem:[#allocation2 + $0xa4c] sm:$0xf] }
  0x55   :  { %2708 = vmatpush.bf16.msrb.mxu3 %v3890_v26  ;;  %2667 = vmatmul.bf16.vlgmr.msrb.gmra.mxu0 %v6346_v37  ;;  %v5808_v26 = vld [vmem:[#allocation2 + $0x3f4] sm:$0xf]  ;;  %v5850_v55 = vld [vmem:[#allocation2 + $0x544] sm:$0xf]  ;;  %v5203_v62 = vld [vmem:[#allocation2 + $0xa64] sm:$0xf0]  ;;  %v4338_v5 = vor.u32 %v5794_v53, %v4335_v54 }
  0x56   :  { %2715 = vmatpush.bf16.msra.mxu0 %v4310_v27  ;;  %2681 = vmatmul.bf16.vlgmr.msrb.gmra.mxu1 %v6350_v42  ;;  %v4870_v27 = vor.u32 %v5927_v18, %v4867_v19  ;;  %v4394_v34 = vor.u32 %v5808_v26, %v4391_v28  ;;  %v6067_v63 = vld [vmem:[#allocation2 + $0xc0c] sm:$0xf]  ;;  %v5427_v2 = vld [vmem:[#allocation2 + $0xc24] sm:$0xf0]  ;;  %v4089_v3 = vld [vmem:[#allocation2 + $0x190] sm:$0xf]  ;;  %v5206_v10 = vor.u32 %v6011_v61, %v5203_v62 }
  0x57   :  { %2729 = vmatpush.bf16.msra.mxu1 %v4534_v31  ;;  %2695 = vmatmul.bf16.vlgmr.msrb.gmra.mxu2 %v6348_v41  ;;  %v5920_v31 = vld [vmem:[#allocation2 + $0x774] sm:$0xf]  ;;  %v5735_v4 = vld [vmem:[#allocation2 + $0x1a8] sm:$0xf0]  ;;  %v5430_v12 = vor.u32 %v6067_v63, %v5427_v2  ;;  %v5175_v15 = vld [vmem:[#allocation2 + $0xa2c] sm:$0xf0] }
  0x58   :  { %2743 = vmatpush.bf16.msra.mxu2 %v4758_v32  ;;  %2709 = vmatmul.bf16.vlgmr.msrb.gmra.mxu3 %v6301_v57  ;;  %v4839_v32 = vld [vmem:[#allocation2 + $0x78c] sm:$0xf0]  ;;  %v4090_v13 = vor.u32 %v5735_v4, %v4089_v3  ;;  %v6060_v16 = vld [vmem:[#allocation2 + $0xbd4] sm:$0xf]  ;;  %v4061_v19 = vld [vmem:[#allocation2 + $0x158] sm:$0xf] }
  0x59   :  { %2757 = vmatpush.bf16.msra.mxu3 %v4982_v36  ;;  %v5745_v36 = vld [vmem:[#allocation2 + $0x1fc] sm:$0xf]  ;;  %v4842_v40 = vor.u32 %v5920_v31, %v4839_v32  ;;  %v5399_v18 = vld [vmem:[#allocation2 + $0xbec] sm:$0xf0]  ;;  %v5147_v28 = vld [vmem:[#allocation2 + $0x9f4] sm:$0xf0] }
  0x5a   :  { %2716 = vmatpush.bf16.msra.mxu0 %v4282_v45  ;;  %v4587_v45 = vld [vmem:[#allocation2 + $0x594] sm:$0xf0]  ;;  %v4142_v48 = vor.u32 %v5745_v36, %v4139_v38  ;;  %v5402_v25 = vor.u32 %v6060_v16, %v5399_v18  ;;  %v6053_v29 = vld [vmem:[#allocation2 + $0xb9c] sm:$0xf]  ;;  %v4033_v32 = vld [vmem:[#allocation2 + $0x120] sm:$0xf] }
  0x5b   :  { %2730 = vmatpush.bf16.msra.mxu1 %v4506_v46  ;;  %v5913_v46 = vld [vmem:[#allocation2 + $0x73c] sm:$0xf]  ;;  %v4590_v52 = vor.u32 %v5857_v44, %v4587_v45  ;;  %v5371_v31 = vld [vmem:[#allocation2 + $0xbb4] sm:$0xf0]  ;;  %v6046_v44 = vld [vmem:[#allocation2 + $0xb64] sm:$0xf] }
  0x5c   :  { %2744 = vmatpush.bf16.msra.mxu2 %v4730_v47  ;;  %v4811_v47 = vld [vmem:[#allocation2 + $0x754] sm:$0xf0]  ;;  %v5374_v38 = vor.u32 %v6053_v29, %v5371_v31  ;;  %v5983_v54 = vld [vmem:[#allocation2 + $0x96c] sm:$0xf]  ;;  %v4201_v62 = vld [vmem:[#allocation2 + $0x270] sm:$0xf] }
  0x5d   :  { %2758 = vmatpush.bf16.msra.mxu3 %v4954_v51  ;;  %v4366_v51 = vor.u32 %v5801_v39, %v4363_v43  ;;  %v4814_v56 = vor.u32 %v5913_v46, %v4811_v47  ;;  %v5119_v43 = vld [vmem:[#allocation2 + $0x9bc] sm:$0xf0]  ;;  %v4005_v47 = vld [vmem:[#allocation2 + $0xe8] sm:$0xf]  ;;  %v5707_v61 = vld [vmem:[#allocation2 + $0xc8] sm:$0xf0] }
  0x5e   :  { %2717 = vmatpush.bf16.msra.mxu0 %v4254_v58  ;;  %v4559_v58 = vld [vmem:[#allocation2 + $0x55c] sm:$0xf0]  ;;  %v5763_v63 = vld [vmem:[#allocation2 + $0x288] sm:$0xf0]  ;;  %v5976_v4 = vld [vmem:[#allocation2 + $0x934] sm:$0xf] }
  0x5f   :  { %2731 = vmatpush.bf16.msra.mxu1 %v4478_v59  ;;  %v5906_v59 = vld [vmem:[#allocation2 + $0x704] sm:$0xf]  ;;  %v4562_v6 = vor.u32 %v5850_v55, %v4559_v58  ;;  %v5343_v46 = vld [vmem:[#allocation2 + $0xb7c] sm:$0xf0]  ;;  %v5091_v55 = vld [vmem:[#allocation2 + $0x984] sm:$0xf0] }
  0x60   :  { %2745 = vmatpush.bf16.msra.mxu2 %v4702_v60  ;;  %v4783_v60 = vld [vmem:[#allocation2 + $0x71c] sm:$0xf0]  ;;  %v5035_v18 = vld [vmem:[#allocation2 + $0x914] sm:$0xf0] }
  0x61   :  { %2759 = vmatpush.bf16.msra.mxu3 %v4926_v1  ;;  %v4114_v1 = vor.u32 %v5738_v49, %v4111_v50  ;;  %v4229_v49 = vld [vmem:[#allocation2 + $0x2a8] sm:$0xf]  ;;  %v5770_v50 = vld [vmem:[#allocation2 + $0x2c0] sm:$0xf0]  ;;  %v5007_v29 = vld [vmem:[#allocation2 + $0x8dc] sm:$0xf0] }
  0x62   :  { %2718 = vmatpush.bf16.msra.mxu0 %v4226_v7  ;;  %v4313_v7 = vld [vmem:[#allocation2 + $0x350] sm:$0xf]  ;;  %v4230_v58 = vor.u32 %v5770_v50, %v4229_v49 }
  0x63   :  { %2732 = vmatpush.bf16.msra.mxu1 %v4450_v8  ;;  %v5791_v8 = vld [vmem:[#allocation2 + $0x368] sm:$0xf0] }
  0x64   :  { %2746 = vmatpush.bf16.msra.mxu2 %v4674_v9  ;;  %v4786_v9 = vor.u32 %v5906_v59, %v4783_v60  ;;  %v4314_v17 = vor.u32 %v5791_v8, %v4313_v7  ;;  %v5315_v59 = vld [vmem:[#allocation2 + $0xb44] sm:$0xf0]  ;;  %v3977_v60 = vld [vmem:[#allocation2 + $0xb0] sm:$0xf]  ;;  %v4202_v7 = vor.u32 %v5763_v63, %v4201_v62  ;;  %v5896_v62 = vld [vmem:[#allocation2 + $0x6b0] sm:$0xf0] }
  0x65   :  { %2760 = vmatpush.bf16.msra.mxu3 %v4898_v14  ;;  %v6004_v14 = vld [vmem:[#allocation2 + $0xa14] sm:$0xf]  ;;  %v3978_v3 = vor.u32 %v5707_v61, %v3977_v60  ;;  %v5287_v8 = vld [vmem:[#allocation2 + $0xb0c] sm:$0xf0]  ;;  %v4733_v60 = vld [vmem:[#allocation2 + $0x698] sm:$0xf] }
  0x66   :  { %2719 = vmatpush.bf16.msra.mxu0 %v4198_v20  ;;  %v5728_v20 = vld [vmem:[#allocation2 + $0x170] sm:$0xf0]  ;;  %v5178_v24 = vor.u32 %v6004_v14, %v5175_v15  ;;  %v4957_v63 = vld [vmem:[#allocation2 + $0x858] sm:$0xf] }
  0x67   :  { %2733 = vmatpush.bf16.msra.mxu1 %v4422_v21  ;;  %v4285_v21 = vld [vmem:[#allocation2 + $0x318] sm:$0xf]  ;;  %v4062_v26 = vor.u32 %v5728_v20, %v4061_v19  ;;  %v6025_v19 = vld [vmem:[#allocation2 + $0xabc] sm:$0xf] }
  0x68   :  { %2747 = vmatpush.bf16.msra.mxu2 %v4646_v22  ;;  %v5784_v22 = vld [vmem:[#allocation2 + $0x330] sm:$0xf0] }
  0x69   :  { %2761 = vmatpush.bf16.msra.mxu3 %v4870_v27  ;;  %v5997_v27 = vld [vmem:[#allocation2 + $0x9dc] sm:$0xf]  ;;  %v4286_v30 = vor.u32 %v5784_v22, %v4285_v21  ;;  %v5259_v21 = vld [vmem:[#allocation2 + $0xad4] sm:$0xf0]  ;;  %v3921_v22 = vld [vmem:[#allocation2 + $0x40] sm:$0xf] }
  0x6a   :  { %2720 = vmatpush.bf16.msra.mxu0 %v4170_v33  ;;  %v5721_v33 = vld [vmem:[#allocation2 + $0x138] sm:$0xf0]  ;;  %v5150_v36 = vor.u32 %v5997_v27, %v5147_v28  ;;  %v5962_v28 = vld [vmem:[#allocation2 + $0x8c4] sm:$0xf] }
  0x6b   :  { %2734 = vmatpush.bf16.msra.mxu1 %v4394_v34  ;;  %v4257_v34 = vld [vmem:[#allocation2 + $0x2e0] sm:$0xf]  ;;  %v4034_v39 = vor.u32 %v5721_v33, %v4033_v32  ;;  %v6018_v32 = vld [vmem:[#allocation2 + $0xa84] sm:$0xf] }
  0x6c   :  { %2748 = vmatpush.bf16.msra.mxu2 %v4618_v35  ;;  %v5777_v35 = vld [vmem:[#allocation2 + $0x2f8] sm:$0xf0]  ;;  %v5231_v33 = vld [vmem:[#allocation2 + $0xa9c] sm:$0xf0] }
  0x6d   :  { %2762 = vmatpush.bf16.msra.mxu3 %v4842_v40  ;;  %v5990_v40 = vld [vmem:[#allocation2 + $0x9a4] sm:$0xf]  ;;  %v4258_v45 = vor.u32 %v5777_v35, %v4257_v34  ;;  %v3893_v34 = vld [vmem:[#allocation2 + $0x8] sm:$0xf]  ;;  %v5234_v49 = vor.u32 %v6018_v32, %v5231_v33  ;;  %v4425_v33 = vld [vmem:[#allocation2 + $0x430] sm:$0xf] }
  0x6e   :  { %2721 = vmatpush.bf16.msra.mxu0 %v4142_v48  ;;  %v5714_v48 = vld [vmem:[#allocation2 + $0x100] sm:$0xf0] }
  0x6f   :  { %2735 = vmatpush.bf16.msra.mxu1 %v4366_v51  ;;  %v5122_v51 = vor.u32 %v5990_v40, %v5119_v43  ;;  %v4006_v53 = vor.u32 %v5714_v48, %v4005_v47  ;;  %v4537_v40 = vld [vmem:[#allocation2 + $0x510] sm:$0xf]  ;;  %v5847_v43 = vld [vmem:[#allocation2 + $0x528] sm:$0xf0] }
  0x70   :  { %2749 = vmatpush.bf16.msra.mxu2 %v4590_v52  ;;  %v5346_v52 = vor.u32 %v6046_v44, %v5343_v46  ;;  %v4761_v44 = vld [vmem:[#allocation2 + $0x6d0] sm:$0xf]  ;;  %v5903_v46 = vld [vmem:[#allocation2 + $0x6e8] sm:$0xf0] }
  0x71   :  { %2763 = vmatpush.bf16.msra.mxu3 %v4814_v56  ;;  %v6039_v56 = vld [vmem:[#allocation2 + $0xb2c] sm:$0xf]  ;;  %v4985_v47 = vld [vmem:[#allocation2 + $0x890] sm:$0xf] }
  0x72   :  { %2722 = vmatpush.bf16.msra.mxu0 %v4114_v1  ;;  %v5094_v1 = vor.u32 %v5983_v54, %v5091_v55  ;;  %v5318_v2 = vor.u32 %v6039_v56, %v5315_v59  ;;  %v5959_v48 = vld [vmem:[#allocation2 + $0x8a8] sm:$0xf0]  ;;  %v4538_v54 = vor.u32 %v5847_v43, %v4537_v40  ;;  %v4762_v55 = vor.u32 %v5903_v46, %v4761_v44  ;;  %v5840_v59 = vld [vmem:[#allocation2 + $0x4f0] sm:$0xf0]  ;;  %v5097_v43 = vld [vmem:[#allocation2 + $0x970] sm:$0xf] }
  0x73   :  { %2736 = vmatpush.bf16.msra.mxu1 %v4338_v5  ;;  %v5063_v5 = vld [vmem:[#allocation2 + $0x94c] sm:$0xf0]  ;;  %v4986_v56 = vor.u32 %v5959_v48, %v4985_v47  ;;  %v5931_v40 = vld [vmem:[#allocation2 + $0x7c8] sm:$0xf0]  ;;  %v4397_v48 = vld [vmem:[#allocation2 + $0x3f8] sm:$0xf] }
  0x74   :  { %2750 = vmatpush.bf16.msra.mxu2 %v4562_v6  ;;  %v6032_v6 = vld [vmem:[#allocation2 + $0xaf4] sm:$0xf]  ;;  %v5066_v14 = vor.u32 %v5976_v4, %v5063_v5  ;;  %v4734_v5 = vor.u32 %v5896_v62, %v4733_v60  ;;  %v5987_v44 = vld [vmem:[#allocation2 + $0x988] sm:$0xf0]  ;;  %v5805_v62 = vld [vmem:[#allocation2 + $0x3d8] sm:$0xf0] }
  0x75   :  { %2764 = vmatpush.bf16.msra.mxu3 %v4786_v9  ;;  %2723 = vmatmul.bf16.vlgmr.msra.gmra.mxu0 %v6316_v11  ;;  %v3949_v9 = vld [vmem:[#allocation2 + $0x78] sm:$0xf]  ;;  %v5290_v15 = vor.u32 %v6032_v6, %v5287_v8  ;;  %v5833_v8 = vld [vmem:[#allocation2 + $0x4b8] sm:$0xf0] }
  0x76   :  { %2771 = vmatpush.bf16.msrb.mxu0 %v5206_v10  ;;  %2737 = vmatmul.bf16.vlgmr.msra.gmra.mxu1 %v6306_v0  ;;  %v5700_v10 = vld [vmem:[#allocation2 + $0x90] sm:$0xf0] }
  0x77   :  { %2785 = vmatpush.bf16.msrb.mxu1 %v5430_v12  ;;  %2751 = vmatmul.bf16.vlgmr.msra.gmra.mxu2 %v6325_v23  ;;  %v4173_v12 = vld [vmem:[#allocation2 + $0x238] sm:$0xf]  ;;  %v3950_v16 = vor.u32 %v5700_v10, %v3949_v9  ;;  %v4705_v9 = vld [vmem:[#allocation2 + $0x660] sm:$0xf] }
  0x78   :  { %2799 = vmatpush.bf16.msrb.mxu2 %v4090_v13  ;;  %2765 = vmatmul.bf16.vlgmr.msra.gmra.mxu3 %v6346_v37  ;;  %v5756_v13 = vld [vmem:[#allocation2 + $0x250] sm:$0xf0] }
  0x79   :  { %2813 = vmatpush.bf16.msrb.mxu3 %v4314_v17  ;;  %v5969_v17 = vld [vmem:[#allocation2 + $0x8fc] sm:$0xf]  ;;  %v4174_v20 = vor.u32 %v5756_v13, %v4173_v12  ;;  %v4929_v13 = vld [vmem:[#allocation2 + $0x820] sm:$0xf] }
  0x7a   :  { %2772 = vmatpush.bf16.msrb.mxu0 %v5178_v24  ;;  %v5693_v24 = vld [vmem:[#allocation2 + $0x58] sm:$0xf0]  ;;  %v5038_v27 = vor.u32 %v5969_v17, %v5035_v18 }
  0x7b   :  { %2786 = vmatpush.bf16.msrb.mxu1 %v5402_v25  ;;  %v4145_v25 = vld [vmem:[#allocation2 + $0x200] sm:$0xf]  ;;  %v3922_v31 = vor.u32 %v5693_v24, %v3921_v22  ;;  %v5889_v12 = vld [vmem:[#allocation2 + $0x678] sm:$0xf0]  ;;  %v4677_v22 = vld [vmem:[#allocation2 + $0x628] sm:$0xf] }
  0x7c   :  { %2800 = vmatpush.bf16.msrb.mxu2 %v4062_v26  ;;  %v5749_v26 = vld [vmem:[#allocation2 + $0x218] sm:$0xf0]  ;;  %v4706_v18 = vor.u32 %v5889_v12, %v4705_v9  ;;  %v5798_v9 = vld [vmem:[#allocation2 + $0x3a0] sm:$0xf0] }
  0x7d   :  { %2814 = vmatpush.bf16.msrb.mxu3 %v4286_v30  ;;  %v5262_v30 = vor.u32 %v6025_v19, %v5259_v21  ;;  %v4146_v35 = vor.u32 %v5749_v26, %v4145_v25  ;;  %v5826_v21 = vld [vmem:[#allocation2 + $0x480] sm:$0xf0]  ;;  %v4901_v26 = vld [vmem:[#allocation2 + $0x7e8] sm:$0xf] }
  0x7e   :  { %2773 = vmatpush.bf16.msrb.mxu0 %v5150_v36  ;;  %v5686_v36 = vld [vmem:[#allocation2 + $0x20] sm:$0xf0] }
  0x7f   :  { %2787 = vmatpush.bf16.msrb.mxu1 %v5374_v38  ;;  %v4117_v38 = vld [vmem:[#allocation2 + $0x1c8] sm:$0xf]  ;;  %v3894_v50 = vor.u32 %v5686_v36, %v3893_v34  ;;  %v5882_v25 = vld [vmem:[#allocation2 + $0x640] sm:$0xf0]  ;;  %v5819_v34 = vld [vmem:[#allocation2 + $0x448] sm:$0xf0] }
  0x80   :  { %2801 = vmatpush.bf16.msrb.mxu2 %v4034_v39  ;;  %v5742_v39 = vld [vmem:[#allocation2 + $0x1e0] sm:$0xf0] }
  0x81   :  { %2815 = vmatpush.bf16.msrb.mxu3 %v4258_v45  ;;  %v5010_v45 = vor.u32 %v5962_v28, %v5007_v29  ;;  %v5125_v28 = vld [vmem:[#allocation2 + $0x9a8] sm:$0xf]  ;;  %v5994_v29 = vld [vmem:[#allocation2 + $0x9c0] sm:$0xf0] }
  0x82   :  { %2774 = vmatpush.bf16.msrb.mxu0 %v5122_v51  ;;  %v5209_v51 = vld [vmem:[#allocation2 + $0xa50] sm:$0xf]  ;;  %v5126_v36 = vor.u32 %v5994_v29, %v5125_v28 }
  0x83   :  { %2788 = vmatpush.bf16.msrb.mxu1 %v5346_v52  ;;  %v6015_v52 = vld [vmem:[#allocation2 + $0xa68] sm:$0xf0] }
  0x84   :  { %2802 = vmatpush.bf16.msrb.mxu2 %v4006_v53  ;;  %v4118_v53 = vor.u32 %v5742_v39, %v4117_v38  ;;  %v5210_v61 = vor.u32 %v6015_v52, %v5209_v51  ;;  %v5875_v38 = vld [vmem:[#allocation2 + $0x608] sm:$0xf0]  ;;  %v4873_v39 = vld [vmem:[#allocation2 + $0x7b0] sm:$0xf]  ;;  %v5098_v51 = vor.u32 %v5987_v44, %v5097_v43  ;;  %v5868_v52 = vld [vmem:[#allocation2 + $0x5d0] sm:$0xf0] }
  0x85   :  { %2816 = vmatpush.bf16.msrb.mxu3 %v4230_v58  ;;  %v4509_v58 = vld [vmem:[#allocation2 + $0x4d8] sm:$0xf]  ;;  %v4874_v47 = vor.u32 %v5931_v40, %v4873_v39  ;;  %v5725_v39 = vld [vmem:[#allocation2 + $0x15c] sm:$0xf] }
  0x86   :  { %2775 = vmatpush.bf16.msrb.mxu0 %v5094_v1  ;;  %v5952_v1 = vld [vmem:[#allocation2 + $0x870] sm:$0xf0]  ;;  %v4510_v4 = vor.u32 %v5840_v59, %v4509_v58  ;;  %v4063_v43 = vld [vmem:[#allocation2 + $0x174] sm:$0xf0]  ;;  %v5781_v44 = vld [vmem:[#allocation2 + $0x31c] sm:$0xf] }
  0x87   :  { %2789 = vmatpush.bf16.msrb.mxu1 %v5318_v2  ;;  %v5181_v2 = vld [vmem:[#allocation2 + $0xa18] sm:$0xf]  ;;  %v4958_v6 = vor.u32 %v5952_v1, %v4957_v63  ;;  %v4593_v63 = vld [vmem:[#allocation2 + $0x580] sm:$0xf] }
  0x88   :  { %2803 = vmatpush.bf16.msrb.mxu2 %v3978_v3  ;;  %v6008_v3 = vld [vmem:[#allocation2 + $0xa30] sm:$0xf0] }
  0x89   :  { %2817 = vmatpush.bf16.msrb.mxu3 %v4202_v7  ;;  %v4481_v7 = vld [vmem:[#allocation2 + $0x4a0] sm:$0xf]  ;;  %v5182_v10 = vor.u32 %v6008_v3, %v5181_v2  ;;  %v5861_v2 = vld [vmem:[#allocation2 + $0x598] sm:$0xf0] }
  0x8a   :  { %2776 = vmatpush.bf16.msrb.mxu0 %v5066_v14  ;;  %v5945_v14 = vld [vmem:[#allocation2 + $0x838] sm:$0xf0]  ;;  %v4482_v17 = vor.u32 %v5833_v8, %v4481_v7  ;;  %v4817_v3 = vld [vmem:[#allocation2 + $0x740] sm:$0xf]  ;;  %v4341_v8 = vld [vmem:[#allocation2 + $0x388] sm:$0xf] }
  0x8b   :  { %2790 = vmatpush.bf16.msrb.mxu1 %v5290_v15  ;;  %v5153_v15 = vld [vmem:[#allocation2 + $0x9e0] sm:$0xf]  ;;  %v4930_v19 = vor.u32 %v5945_v14, %v4929_v13  ;;  %v4565_v13 = vld [vmem:[#allocation2 + $0x548] sm:$0xf]  ;;  %v5854_v14 = vld [vmem:[#allocation2 + $0x560] sm:$0xf0] }
  0x8c   :  { %2804 = vmatpush.bf16.msrb.mxu2 %v3950_v16  ;;  %v6001_v16 = vld [vmem:[#allocation2 + $0x9f8] sm:$0xf0]  ;;  %v4566_v28 = vor.u32 %v5854_v14, %v4565_v13 }
  0x8d   :  { %2818 = vmatpush.bf16.msrb.mxu3 %v4174_v20  ;;  %v4453_v20 = vld [vmem:[#allocation2 + $0x468] sm:$0xf]  ;;  %v5154_v24 = vor.u32 %v6001_v16, %v5153_v15 }
  0x8e   :  { %2777 = vmatpush.bf16.msrb.mxu0 %v5038_v27  ;;  %v5938_v27 = vld [vmem:[#allocation2 + $0x800] sm:$0xf0]  ;;  %v4789_v15 = vld [vmem:[#allocation2 + $0x708] sm:$0xf] }
  0x8f   :  { %2791 = vmatpush.bf16.msrb.mxu1 %v5262_v30  ;;  %v4454_v30 = vor.u32 %v5826_v21, %v4453_v20  ;;  %v4902_v32 = vor.u32 %v5938_v27, %v4901_v26  ;;  %v5433_v20 = vld [vmem:[#allocation2 + $0xc10] sm:$0xf]  ;;  %v6071_v21 = vld [vmem:[#allocation2 + $0xc28] sm:$0xf0]  ;;  %v5788_v26 = vld [vmem:[#allocation2 + $0x354] sm:$0xf] }
  0x90   :  { %2805 = vmatpush.bf16.msrb.mxu2 %v3922_v31  ;;  %v4678_v31 = vor.u32 %v5882_v25, %v4677_v22  ;;  %v5732_v22 = vld [vmem:[#allocation2 + $0x194] sm:$0xf]  ;;  %v4091_v25 = vld [vmem:[#allocation2 + $0x1ac] sm:$0xf0] }
  0x91   :  { %2819 = vmatpush.bf16.msrb.mxu3 %v4146_v35  ;;  %v4649_v35 = vld [vmem:[#allocation2 + $0x5f0] sm:$0xf] }
  0x92   :  { %2778 = vmatpush.bf16.msrb.mxu0 %v5010_v45  ;;  %v4426_v45 = vor.u32 %v5819_v34, %v4425_v33  ;;  %v4650_v46 = vor.u32 %v5875_v38, %v4649_v35  ;;  %v4315_v27 = vld [vmem:[#allocation2 + $0x36c] sm:$0xf0]  ;;  %v5434_v33 = vor.u32 %v6071_v21, %v5433_v20  ;;  %v4094_v34 = vor.u32 %v5732_v22, %v4091_v25  ;;  %v6064_v38 = vld [vmem:[#allocation2 + $0xbf0] sm:$0xf0] }
  0x93   :  { %2792 = vmatpush.bf16.msrb.mxu1 %v5234_v49  ;;  %v5812_v49 = vld [vmem:[#allocation2 + $0x410] sm:$0xf0]  ;;  %v4318_v35 = vor.u32 %v5788_v26, %v4315_v27  ;;  %v3979_v22 = vld [vmem:[#allocation2 + $0xcc] sm:$0xf0] }
  0x94   :  { %2806 = vmatpush.bf16.msrb.mxu2 %v3894_v50  ;;  %v4621_v50 = vld [vmem:[#allocation2 + $0x5b8] sm:$0xf]  ;;  %v4398_v58 = vor.u32 %v5812_v49, %v4397_v48  ;;  %v5377_v49 = vld [vmem:[#allocation2 + $0xba0] sm:$0xf]  ;;  %v5704_v20 = vld [vmem:[#allocation2 + $0xb4] sm:$0xf] }
  0x95   :  { %2820 = vmatpush.bf16.msrb.mxu3 %v4118_v53  ;;  %2779 = vmatmul.bf16.vlgmr.msrb.gmra.mxu0 %v6350_v42  ;;  %v4845_v53 = vld [vmem:[#allocation2 + $0x778] sm:$0xf]  ;;  %v4622_v59 = vor.u32 %v5868_v52, %v4621_v50  ;;  %v4066_v50 = vor.u32 %v5725_v39, %v4063_v43  ;;  %v6057_v52 = vld [vmem:[#allocation2 + $0xbb8] sm:$0xf0]  ;;  %v4203_v25 = vld [vmem:[#allocation2 + $0x28c] sm:$0xf0] }
  0x96   :  { %2827 = vmatpush.bf16.msra.mxu0 %v4538_v54  ;;  %2793 = vmatmul.bf16.vlgmr.msrb.gmra.mxu1 %v6348_v41  ;;  %v5924_v54 = vld [vmem:[#allocation2 + $0x790] sm:$0xf0]  ;;  %v4427_v27 = vld [vmem:[#allocation2 + $0x44c] sm:$0xf0]  ;;  %v5753_v39 = vld [vmem:[#allocation2 + $0x23c] sm:$0xf] }
  0x97   :  { %2841 = vmatpush.bf16.msra.mxu1 %v4762_v55  ;;  %2807 = vmatmul.bf16.vlgmr.msrb.gmra.mxu2 %v6301_v57  ;;  %v5069_v55 = vld [vmem:[#allocation2 + $0x938] sm:$0xf]  ;;  %v4846_v60 = vor.u32 %v5924_v54, %v4845_v53  ;;  %v5718_v53 = vld [vmem:[#allocation2 + $0x124] sm:$0xf]  ;;  %v5816_v26 = vld [vmem:[#allocation2 + $0x434] sm:$0xf] }
  0x98   :  { %2855 = vmatpush.bf16.msra.mxu2 %v4986_v56  ;;  %2821 = vmatmul.bf16.vlgmr.msrb.gmra.mxu3 %v6316_v11  ;;  %v5980_v56 = vld [vmem:[#allocation2 + $0x950] sm:$0xf0]  ;;  %v6364_v54 = vld [vmem:[#allocation4] sm:$0xff] }
  0x99   :  { %2869 = vmatpush.bf16.msra.mxu3 %v5210_v61  ;;  %v4369_v61 = vld [vmem:[#allocation2 + $0x3c0] sm:$0xf]  ;;  %v5070_v1 = vor.u32 %v5980_v56, %v5069_v55 }
  0x9a   :  { %2828 = vmatpush.bf16.msra.mxu0 %v4510_v4  ;;  %v5917_v4 = vld [vmem:[#allocation2 + $0x758] sm:$0xf0]  ;;  %v4370_v7 = vor.u32 %v5805_v62, %v4369_v61  ;;  %v4035_v56 = vld [vmem:[#allocation2 + $0x13c] sm:$0xf0]  ;;  %v5378_v62 = vor.u32 %v6057_v52, %v5377_v49  ;;  %v5690_v52 = vld [vmem:[#allocation2 + $0x44] sm:$0xf] }
  0x9b   :  { %2842 = vmatpush.bf16.msra.mxu1 %v4734_v5  ;;  %v5041_v5 = vld [vmem:[#allocation2 + $0x900] sm:$0xf]  ;;  %v4818_v12 = vor.u32 %v5917_v4, %v4817_v3  ;;  %v5349_v3 = vld [vmem:[#allocation2 + $0xb68] sm:$0xf]  ;;  %v6050_v4 = vld [vmem:[#allocation2 + $0xb80] sm:$0xf0] }
  0x9c   :  { %2856 = vmatpush.bf16.msra.mxu2 %v4958_v6  ;;  %v5973_v6 = vld [vmem:[#allocation2 + $0x918] sm:$0xf0]  ;;  %v4483_v61 = vld [vmem:[#allocation2 + $0x4bc] sm:$0xf0]  ;;  %v5350_v14 = vor.u32 %v6050_v4, %v5349_v3  ;;  %v5683_v4 = vld [vmem:[#allocation2 + $0xc] sm:$0xf] }
  0x9d   :  { %2870 = vmatpush.bf16.msra.mxu3 %v5182_v10  ;;  %v4594_v10 = vor.u32 %v5861_v2, %v4593_v63  ;;  %v5042_v16 = vor.u32 %v5973_v6, %v5041_v5  ;;  %v6575_v63 = vperm.slane %v6364_v54, 0  ;;  %v5711_v5 = vld [vmem:[#allocation2 + $0xec] sm:$0xf] }
  0x9e   :  { %2829 = vmatpush.bf16.msra.mxu0 %v4482_v17  ;;  %v5910_v17 = vld [vmem:[#allocation2 + $0x720] sm:$0xf0] }
  0x9f   :  { %2843 = vmatpush.bf16.msra.mxu1 %v4706_v18  ;;  %v5013_v18 = vld [vmem:[#allocation2 + $0x8c8] sm:$0xf]  ;;  %v4790_v29 = vor.u32 %v5910_v17, %v4789_v15 }
  0xa0   :  { %2857 = vmatpush.bf16.msra.mxu2 %v4930_v19  ;;  %v5966_v19 = vld [vmem:[#allocation2 + $0x8e0] sm:$0xf0] }
  0xa1   :  { %2871 = vmatpush.bf16.msra.mxu3 %v5154_v24  ;;  %v4342_v24 = vor.u32 %v5798_v9, %v4341_v8  ;;  %v5767_v8 = vld [vmem:[#allocation2 + $0x2ac] sm:$0xf]  ;;  %v4231_v9 = vld [vmem:[#allocation2 + $0x2c4] sm:$0xf0] }
  0xa2   :  { %2830 = vmatpush.bf16.msra.mxu0 %v4454_v30  ;;  %v5844_v30 = vld [vmem:[#allocation2 + $0x514] sm:$0xf]  ;;  %v4234_v17 = vor.u32 %v5767_v8, %v4231_v9  ;;  %v4119_v8 = vld [vmem:[#allocation2 + $0x1e4] sm:$0xf0]  ;;  %v5795_v9 = vld [vmem:[#allocation2 + $0x38c] sm:$0xf] }
  0xa3   :  { %2844 = vmatpush.bf16.msra.mxu1 %v4678_v31  ;;  %v4539_v31 = vld [vmem:[#allocation2 + $0x52c] sm:$0xf0] }
  0xa4   :  { %2858 = vmatpush.bf16.msra.mxu2 %v4902_v32  ;;  %v5014_v32 = vor.u32 %v5966_v19, %v5013_v18  ;;  %v4542_v40 = vor.u32 %v5844_v30, %v4539_v31  ;;  %v5321_v18 = vld [vmem:[#allocation2 + $0xb30] sm:$0xf]  ;;  %v6043_v19 = vld [vmem:[#allocation2 + $0xb48] sm:$0xf0]  ;;  %v3982_v31 = vor.u32 %v5704_v20, %v3979_v22 }
  0xa5   :  { %2872 = vmatpush.bf16.msra.mxu3 %v5126_v36  ;;  %v5405_v36 = vld [vmem:[#allocation2 + $0xbd8] sm:$0xf]  ;;  %v5211_v20 = vld [vmem:[#allocation2 + $0xa6c] sm:$0xf0] }
  0xa6   :  { %2831 = vmatpush.bf16.msra.mxu0 %v4426_v45  ;;  %v4287_v45 = vld [vmem:[#allocation2 + $0x334] sm:$0xf0]  ;;  %v5406_v48 = vor.u32 %v6064_v38, %v5405_v36  ;;  %v4430_v36 = vor.u32 %v5816_v26, %v4427_v27 }
  0xa7   :  { %2845 = vmatpush.bf16.msra.mxu1 %v4650_v46  ;;  %v5837_v46 = vld [vmem:[#allocation2 + $0x4dc] sm:$0xf]  ;;  %v3951_v38 = vld [vmem:[#allocation2 + $0x94] sm:$0xf0] }
  0xa8   :  { %2859 = vmatpush.bf16.msra.mxu2 %v4874_v47  ;;  %v4511_v47 = vld [vmem:[#allocation2 + $0x4f4] sm:$0xf0] }
  0xa9   :  { %2873 = vmatpush.bf16.msra.mxu3 %v5098_v51  ;;  %v4290_v51 = vor.u32 %v5781_v44, %v4287_v45  ;;  %v4514_v55 = vor.u32 %v5837_v46, %v4511_v47  ;;  %v5809_v44 = vld [vmem:[#allocation2 + $0x3fc] sm:$0xf]  ;;  %v4399_v45 = vld [vmem:[#allocation2 + $0x414] sm:$0xf0] }
  0xaa   :  { %2832 = vmatpush.bf16.msra.mxu0 %v4398_v58  ;;  %v5774_v58 = vld [vmem:[#allocation2 + $0x2e4] sm:$0xf] }
  0xab   :  { %2846 = vmatpush.bf16.msra.mxu1 %v4622_v59  ;;  %v4259_v59 = vld [vmem:[#allocation2 + $0x2fc] sm:$0xf0] }
  0xac   :  { %2860 = vmatpush.bf16.msra.mxu2 %v4846_v60  ;;  %v5830_v60 = vld [vmem:[#allocation2 + $0x4a4] sm:$0xf]  ;;  %v4262_v2 = vor.u32 %v5774_v58, %v4259_v59  ;;  %v4147_v58 = vld [vmem:[#allocation2 + $0x21c] sm:$0xf0] }
  0xad   :  { %2874 = vmatpush.bf16.msra.mxu3 %v5070_v1  ;;  %v4038_v1 = vor.u32 %v5718_v53, %v4035_v56  ;;  %v4486_v6 = vor.u32 %v5830_v60, %v4483_v61  ;;  %v4402_v53 = vor.u32 %v5809_v44, %v4399_v45  ;;  %v5746_v56 = vld [vmem:[#allocation2 + $0x204] sm:$0xf]  ;;  %v4371_v60 = vld [vmem:[#allocation2 + $0x3dc] sm:$0xf0] }
  0xae   :  { %2833 = vmatpush.bf16.msra.mxu0 %v4370_v7  ;;  %v4007_v7 = vld [vmem:[#allocation2 + $0x104] sm:$0xf0]  ;;  %v5802_v59 = vld [vmem:[#allocation2 + $0x3c4] sm:$0xf]  ;;  %v4150_v3 = vor.u32 %v5746_v56, %v4147_v58  ;;  %v5379_v56 = vld [vmem:[#allocation2 + $0xbbc] sm:$0xf0] }
  0xaf   :  { %2847 = vmatpush.bf16.msra.mxu1 %v4594_v10  ;;  %v5823_v10 = vld [vmem:[#allocation2 + $0x46c] sm:$0xf] }
  0xb0   :  { %2861 = vmatpush.bf16.msra.mxu2 %v4818_v12  ;;  %v4455_v12 = vld [vmem:[#allocation2 + $0x484] sm:$0xf0] }
  0xb1   :  { %2875 = vmatpush.bf16.msra.mxu3 %v5042_v16  ;;  %v4010_v16 = vor.u32 %v5711_v5, %v4007_v7  ;;  %v4458_v21 = vor.u32 %v5823_v10, %v4455_v12  ;;  %v3895_v5 = vld [vmem:[#allocation2 + $0x24] sm:$0xf0]  ;;  %v4374_v7 = vor.u32 %v5802_v59, %v4371_v60 }
  0xb2   :  { %2834 = vmatpush.bf16.msra.mxu0 %v4342_v24  ;;  %v2612_v13 = vpop.f32.mrf.mxu0  ;;  %v5760_v24 = vld [vmem:[#allocation2 + $0x274] sm:$0xf]  ;;  %v4343_v10 = vld [vmem:[#allocation2 + $0x3a4] sm:$0xf0] }
  0xb3   :  { %2848 = vmatpush.bf16.msra.mxu1 %v4566_v28  ;;  %v2613_v15 = vadd.f32 %v2612_v13, %v6575_v63  ;;  %v2626_v28 = vpop.f32.mrf.mxu1  ;;  %v5900_v13 = vld [vmem:[#allocation2 + $0x6d4] sm:$0xf]  ;;  %v4346_v26 = vor.u32 %v5795_v9, %v4343_v10  ;;  %v5351_v9 = vld [vmem:[#allocation2 + $0xb84] sm:$0xf0] }
  0xb4   :  { %2862 = vmatpush.bf16.msra.mxu2 %v4790_v29  ;;  %v5322_v29 = vor.u32 %v6043_v19, %v5321_v18  ;;  %v4987_v18 = vld [vmem:[#allocation2 + $0x8ac] sm:$0xf0]  ;;  %v6012_v19 = vld [vmem:[#allocation2 + $0xa54] sm:$0xf] }
  0xb5   :  { %2876 = vmatpush.bf16.msra.mxu3 %v5014_v32  ;;  %2835 = vmatmul.bf16.vlgmr.msra.gmra.mxu0 %v6306_v0  ;;  %v2627_v30 = vadd.f32 %v2626_v28, %v2613_v15  ;;  %v4206_v32 = vor.u32 %v5760_v24, %v4203_v25  ;;  %v5956_v15 = vld [vmem:[#allocation2 + $0x894] sm:$0xf]  ;;  %v5435_v25 = vld [vmem:[#allocation2 + $0xc2c] sm:$0xf0] }
  0xb6   :  { %2883 = vmatpush.bf16.msrb.mxu0 %v5434_v33  ;;  %2849 = vmatmul.bf16.vlgmr.msra.gmra.mxu1 %v6325_v23  ;;  %v5293_v33 = vld [vmem:[#allocation2 + $0xaf8] sm:$0xf]  ;;  %v6068_v24 = vld [vmem:[#allocation2 + $0xc14] sm:$0xf]  ;;  %v4990_v28 = vor.u32 %v5956_v15, %v4987_v18  ;;  %v4651_v18 = vld [vmem:[#allocation2 + $0x60c] sm:$0xf0] }
  0xb7   :  { %2897 = vmatpush.bf16.msrb.mxu1 %v4094_v34  ;;  %2863 = vmatmul.bf16.vlgmr.msra.gmra.mxu2 %v6346_v37  ;;  %v6036_v34 = vld [vmem:[#allocation2 + $0xb10] sm:$0xf0] }
  0xb8   :  { %2911 = vmatpush.bf16.msrb.mxu2 %v4318_v35  ;;  %2877 = vmatmul.bf16.vlgmr.msra.gmra.mxu3 %v6350_v42  ;;  %v5697_v35 = vld [vmem:[#allocation2 + $0x7c] sm:$0xf]  ;;  %v5294_v47 = vor.u32 %v6036_v34, %v5293_v33  ;;  %v5438_v34 = vor.u32 %v6068_v24, %v5435_v25  ;;  %v5984_v24 = vld [vmem:[#allocation2 + $0x974] sm:$0xf]  ;;  %v5099_v25 = vld [vmem:[#allocation2 + $0x98c] sm:$0xf0] }
  0xb9   :  { %2925 = vmatpush.bf16.msrb.mxu3 %v4542_v40  ;;  %v4175_v40 = vld [vmem:[#allocation2 + $0x254] sm:$0xf0]  ;;  %v5949_v33 = vld [vmem:[#allocation2 + $0x85c] sm:$0xf] }
  0xba   :  { %2884 = vmatpush.bf16.msrb.mxu0 %v5406_v48  ;;  %v2640_v43 = vpop.f32.mrf.mxu2  ;;  %v3954_v48 = vor.u32 %v5697_v35, %v3951_v38  ;;  %v4178_v49 = vor.u32 %v5753_v39, %v4175_v40  ;;  %v4959_v35 = vld [vmem:[#allocation2 + $0x874] sm:$0xf0]  ;;  %v6061_v39 = vld [vmem:[#allocation2 + $0xbdc] sm:$0xf] }
  0xbb   :  { %2898 = vmatpush.bf16.msrb.mxu1 %v4066_v50  ;;  %v2641_v46 = vadd.f32 %v2640_v43, %v2627_v30  ;;  %v5265_v50 = vld [vmem:[#allocation2 + $0xac0] sm:$0xf]  ;;  %v2654_v12 = vpop.f32.mrf.mxu3  ;;  %v6375_v30 = vpop.f32.mrf.mxu0  ;;  %v5183_v38 = vld [vmem:[#allocation2 + $0xa34] sm:$0xf0]  ;;  %v4962_v45 = vor.u32 %v5949_v33, %v4959_v35  ;;  %v5921_v33 = vld [vmem:[#allocation2 + $0x77c] sm:$0xf] }
  0xbc   :  { %2912 = vmatpush.bf16.msrb.mxu2 %v4290_v51  ;;  %v6029_v51 = vld [vmem:[#allocation2 + $0xad8] sm:$0xf0]  ;;  %v5407_v40 = vld [vmem:[#allocation2 + $0xbf4] sm:$0xf0]  ;;  %v6377_v43 = vpop.f32.mrf.mxu1 }
  0xbd   :  { %2926 = vmatpush.bf16.msrb.mxu3 %v4514_v55  ;;  %v3923_v55 = vld [vmem:[#allocation2 + $0x5c] sm:$0xf0]  ;;  %v5266_v61 = vor.u32 %v6029_v51, %v5265_v50  ;;  %v5410_v50 = vor.u32 %v6061_v39, %v5407_v40  ;;  %v5071_v39 = vld [vmem:[#allocation2 + $0x954] sm:$0xf0] }
  0xbe   :  { %2885 = vmatpush.bf16.msrb.mxu0 %v5378_v62  ;;  %v5237_v62 = vld [vmem:[#allocation2 + $0xa88] sm:$0xf]  ;;  %v4931_v51 = vld [vmem:[#allocation2 + $0x83c] sm:$0xf0] }
  0xbf   :  { %2899 = vmatpush.bf16.msrb.mxu1 %v4038_v1  ;;  %v6022_v1 = vld [vmem:[#allocation2 + $0xaa0] sm:$0xf0] }
  0xc0   :  { %2913 = vmatpush.bf16.msrb.mxu2 %v4262_v2  ;;  %v3926_v2 = vor.u32 %v5690_v52, %v3923_v55  ;;  %v5998_v52 = vld [vmem:[#allocation2 + $0x9e4] sm:$0xf] }
  0xc1   :  { %2927 = vmatpush.bf16.msrb.mxu3 %v4486_v6  ;;  %v5739_v6 = vld [vmem:[#allocation2 + $0x1cc] sm:$0xf]  ;;  %v6054_v55 = vld [vmem:[#allocation2 + $0xba4] sm:$0xf] }
  0xc2   :  { %2886 = vmatpush.bf16.msrb.mxu0 %v5350_v14  ;;  %v4763_v14 = vld [vmem:[#allocation2 + $0x6ec] sm:$0xf0]  ;;  %v4122_v22 = vor.u32 %v5739_v6, %v4119_v8  ;;  %v6382_v59 = vpop.f32.mrf.mxu2  ;;  %v5127_v6 = vld [vmem:[#allocation2 + $0x9c4] sm:$0xf0]  ;;  %v6047_v8 = vld [vmem:[#allocation2 + $0xb6c] sm:$0xf] }
  0xc3   :  { %2900 = vmatpush.bf16.msrb.mxu1 %v4010_v16  ;;  %v6373_v16 = vadd.f32 %v2654_v12, %v2641_v46  ;;  %v4766_v27 = vor.u32 %v5900_v13, %v4763_v14 }
  0xc4   :  { %2914 = vmatpush.bf16.msrb.mxu2 %v4234_v17  ;;  %v5238_v17 = vor.u32 %v6022_v1, %v5237_v62  ;;  %v5879_v62 = vld [vmem:[#allocation2 + $0x62c] sm:$0xf]  ;;  %v4679_v1 = vld [vmem:[#allocation2 + $0x644] sm:$0xf0] }
  0xc5   :  { %2928 = vmatpush.bf16.msrb.mxu3 %v4458_v21  ;;  %v3898_v21 = vor.u32 %v5683_v4, %v3895_v5  ;;  %v4903_v4 = vld [vmem:[#allocation2 + $0x804] sm:$0xf0]  ;;  %v5991_v5 = vld [vmem:[#allocation2 + $0x9ac] sm:$0xf]  ;;  %v4682_v12 = vor.u32 %v5879_v62, %v4679_v1 }
  0xc6   :  { %2887 = vmatpush.bf16.msrb.mxu0 %v5322_v29  ;;  %v5214_v29 = vor.u32 %v6012_v19, %v5211_v20  ;;  %v5130_v14 = vor.u32 %v5991_v5, %v5127_v6  ;;  %v5928_v19 = vld [vmem:[#allocation2 + $0x7b4] sm:$0xf]  ;;  %v5354_v20 = vor.u32 %v6047_v8, %v5351_v9  ;;  %v5851_v62 = vld [vmem:[#allocation2 + $0x54c] sm:$0xf]  ;;  %v4567_v1 = vld [vmem:[#allocation2 + $0x564] sm:$0xf0] }
  0xc7   :  { %2901 = vmatpush.bf16.msrb.mxu1 %v3982_v31  ;;  %v5893_v31 = vld [vmem:[#allocation2 + $0x69c] sm:$0xf]  ;;  %v4791_v5 = vld [vmem:[#allocation2 + $0x724] sm:$0xf0]  ;;  %v5963_v6 = vld [vmem:[#allocation2 + $0x8cc] sm:$0xf] }
  0xc8   :  { %2915 = vmatpush.bf16.msrb.mxu2 %v4206_v32  ;;  %v4735_v32 = vld [vmem:[#allocation2 + $0x6b4] sm:$0xf0]  ;;  %v5015_v8 = vld [vmem:[#allocation2 + $0x8e4] sm:$0xf0]  ;;  %v6019_v9 = vld [vmem:[#allocation2 + $0xa8c] sm:$0xf] }
  0xc9   :  { %2929 = vmatpush.bf16.msrb.mxu3 %v4430_v36  ;;  %v6005_v36 = vld [vmem:[#allocation2 + $0xa1c] sm:$0xf]  ;;  %v4738_v44 = vor.u32 %v5893_v31, %v4735_v32  ;;  %v4623_v32 = vld [vmem:[#allocation2 + $0x5d4] sm:$0xf0] }
  0xca   :  { %2888 = vmatpush.bf16.msrb.mxu0 %v5294_v47  ;;  %v5186_v46 = vor.u32 %v6005_v36, %v5183_v38  ;;  %v5886_v47 = vld [vmem:[#allocation2 + $0x664] sm:$0xf]  ;;  %v5865_v31 = vld [vmem:[#allocation2 + $0x5bc] sm:$0xf]  ;;  %v4847_v36 = vld [vmem:[#allocation2 + $0x794] sm:$0xf0] }
  0xcb   :  { %2902 = vmatpush.bf16.msrb.mxu1 %v3954_v48  ;;  %v4707_v48 = vld [vmem:[#allocation2 + $0x67c] sm:$0xf0]  ;;  %v5977_v38 = vld [vmem:[#allocation2 + $0x93c] sm:$0xf] }
  0xcc   :  { %2916 = vmatpush.bf16.msrb.mxu2 %v4178_v49  ;;  %v5942_v49 = vld [vmem:[#allocation2 + $0x824] sm:$0xf]  ;;  %v4710_v58 = vor.u32 %v5886_v47, %v4707_v48  ;;  %v4850_v47 = vor.u32 %v5921_v33, %v4847_v36  ;;  %v5074_v48 = vor.u32 %v5977_v38, %v5071_v39  ;;  %v5841_v36 = vld [vmem:[#allocation2 + $0x4f8] sm:$0xf0]  ;;  %v4741_v39 = vld [vmem:[#allocation2 + $0x6a0] sm:$0xf] }
  0xcd   :  { %2930 = vmatpush.bf16.msrb.mxu3 %v4402_v53  ;;  %v5155_v53 = vld [vmem:[#allocation2 + $0x9fc] sm:$0xf0]  ;;  %v4934_v60 = vor.u32 %v5942_v49, %v4931_v51  ;;  %v5858_v49 = vld [vmem:[#allocation2 + $0x584] sm:$0xf] }
  0xce   :  { %2889 = vmatpush.bf16.msrb.mxu0 %v5266_v61  ;;  %v5158_v61 = vor.u32 %v5998_v52, %v5155_v53  ;;  %v5914_v51 = vld [vmem:[#allocation2 + $0x744] sm:$0xf]  ;;  %v4819_v53 = vld [vmem:[#allocation2 + $0x75c] sm:$0xf0] }
  0xcf   :  { %2903 = vmatpush.bf16.msrb.mxu1 %v3926_v2  ;;  %v5935_v2 = vld [vmem:[#allocation2 + $0x7ec] sm:$0xf] }
  0xd0   :  { %2917 = vmatpush.bf16.msrb.mxu2 %v4150_v3  ;;  %v5382_v3 = vor.u32 %v6054_v55, %v5379_v56  ;;  %v4906_v13 = vor.u32 %v5935_v2, %v4903_v4  ;;  %v5970_v55 = vld [vmem:[#allocation2 + $0x904] sm:$0xf]  ;;  %v5043_v56 = vld [vmem:[#allocation2 + $0x91c] sm:$0xf0]  ;;  %v4822_v2 = vor.u32 %v5914_v51, %v4819_v53  ;;  %v5907_v4 = vld [vmem:[#allocation2 + $0x70c] sm:$0xf] }
  0xd1   :  { %2931 = vmatpush.bf16.msrb.mxu3 %v4374_v7  ;;  %v5722_v51 = vld [vmem:[#allocation2 + $0x140] sm:$0xf0] }
  0xd2   :  { %2890 = vmatpush.bf16.msrb.mxu0 %v5238_v17  ;;  %v2668_v7 = vpop.f32.mrf.mxu0  ;;  %v5872_v17 = vld [vmem:[#allocation2 + $0x5f4] sm:$0xf] }
  0xd3   :  { %2904 = vmatpush.bf16.msrb.mxu1 %v3898_v21  ;;  %v2669_v10 = vadd.f32 %v2668_v7, %v6373_v16  ;;  %v2682_v15 = vpop.f32.mrf.mxu1 }
  0xd4   :  { %2918 = vmatpush.bf16.msrb.mxu2 %v4122_v22  ;;  %v4875_v22 = vld [vmem:[#allocation2 + $0x7cc] sm:$0xf0] }
  0xd5   :  { %2932 = vmatpush.bf16.msrb.mxu3 %v4346_v26  ;;  %2891 = vmatmul.bf16.vlgmr.msrb.gmra.mxu0 %v6348_v41  ;;  %v2683_v21 = vadd.f32 %v2682_v15, %v2669_v10  ;;  %v6040_v26 = vld [vmem:[#allocation2 + $0xb34] sm:$0xf]  ;;  %v4878_v16 = vor.u32 %v5928_v19, %v4875_v22  ;;  %v5239_v10 = vld [vmem:[#allocation2 + $0xaa4] sm:$0xf0]  ;;  %v4570_v15 = vor.u32 %v5851_v62, %v4567_v1 }
  0xd6   :  { %2939 = vmatpush.bf16.msra.mxu0 %v4766_v27  ;;  %2905 = vmatmul.bf16.vlgmr.msrb.gmra.mxu1 %v6301_v57  ;;  %v5323_v27 = vld [vmem:[#allocation2 + $0xb4c] sm:$0xf0]  ;;  %v5848_v19 = vld [vmem:[#allocation2 + $0x530] sm:$0xf0]  ;;  %v5018_v22 = vor.u32 %v5963_v6, %v5015_v8  ;;  %v5715_v6 = vld [vmem:[#allocation2 + $0x108] sm:$0xf0] }
  0xd7   :  { %2953 = vmatpush.bf16.msra.mxu1 %v4990_v28  ;;  %2919 = vmatmul.bf16.vlgmr.msrb.gmra.mxu2 %v6316_v11  ;;  %v4654_v28 = vor.u32 %v5872_v17, %v4651_v18  ;;  %v5792_v17 = vld [vmem:[#allocation2 + $0x370] sm:$0xf0]  ;;  %v4545_v18 = vld [vmem:[#allocation2 + $0x518] sm:$0xf] }
  0xd8   :  { %2967 = vmatpush.bf16.msra.mxu2 %v5214_v29  ;;  %2933 = vmatmul.bf16.vlgmr.msrb.gmra.mxu3 %v6306_v0  ;;  %v5102_v29 = vor.u32 %v5984_v24, %v5099_v25  ;;  %v4769_v24 = vld [vmem:[#allocation2 + $0x6d8] sm:$0xf]  ;;  %v5904_v25 = vld [vmem:[#allocation2 + $0x6f0] sm:$0xf0] }
  0xd9   :  { %2981 = vmatpush.bf16.msra.mxu3 %v5438_v34  ;;  %v5326_v34 = vor.u32 %v6040_v26, %v5323_v27  ;;  %v5242_v26 = vor.u32 %v6019_v9, %v5239_v10  ;;  %v4770_v33 = vor.u32 %v5904_v25, %v4769_v24  ;;  %v5771_v10 = vld [vmem:[#allocation2 + $0x2c8] sm:$0xf0]  ;;  %v3985_v24 = vld [vmem:[#allocation2 + $0xb8] sm:$0xf]  ;;  %v5708_v25 = vld [vmem:[#allocation2 + $0xd0] sm:$0xf0] }
  0xda   :  { %2940 = vmatpush.bf16.msra.mxu0 %v4738_v44  ;;  %v2696_v35 = vpop.f32.mrf.mxu2  ;;  %v6033_v44 = vld [vmem:[#allocation2 + $0xafc] sm:$0xf]  ;;  %v6390_v38 = vpop.f32.mrf.mxu0 }
  0xdb   :  { %2954 = vmatpush.bf16.msra.mxu1 %v4962_v45  ;;  %v6386_v40 = vadd.f32 %v2696_v35, %v2683_v21  ;;  %v5295_v45 = vld [vmem:[#allocation2 + $0xb14] sm:$0xf0]  ;;  %v4794_v21 = vor.u32 %v5907_v4, %v4791_v5  ;;  %v4517_v35 = vld [vmem:[#allocation2 + $0x4e0] sm:$0xf]  ;;  %v4013_v5 = vld [vmem:[#allocation2 + $0xf0] sm:$0xf] }
  0xdc   :  { %2968 = vmatpush.bf16.msra.mxu2 %v5186_v46  ;;  %v4626_v46 = vor.u32 %v5865_v31, %v4623_v32  ;;  %v5298_v52 = vor.u32 %v6033_v44, %v5295_v45  ;;  %v5729_v31 = vld [vmem:[#allocation2 + $0x178] sm:$0xf0]  ;;  %v4293_v32 = vld [vmem:[#allocation2 + $0x320] sm:$0xf] }
  0xdd   :  { %2982 = vmatpush.bf16.msra.mxu3 %v5410_v50  ;;  %v4595_v50 = vld [vmem:[#allocation2 + $0x59c] sm:$0xf0]  ;;  %v5897_v44 = vld [vmem:[#allocation2 + $0x6b8] sm:$0xf0] }
  0xde   :  { %2941 = vmatpush.bf16.msra.mxu0 %v4710_v58  ;;  %v6026_v58 = vld [vmem:[#allocation2 + $0xac4] sm:$0xf]  ;;  %v4742_v53 = vor.u32 %v5897_v44, %v4741_v39  ;;  %v3957_v44 = vld [vmem:[#allocation2 + $0x80] sm:$0xf] }
  0xdf   :  { %2955 = vmatpush.bf16.msra.mxu1 %v4934_v60  ;;  %v5267_v60 = vld [vmem:[#allocation2 + $0xadc] sm:$0xf0] }
  0xe0   :  { %2969 = vmatpush.bf16.msra.mxu2 %v5158_v61  ;;  %v4598_v61 = vor.u32 %v5858_v49, %v4595_v50  ;;  %v5270_v7 = vor.u32 %v6026_v58, %v5267_v60  ;;  %v4518_v49 = vor.u32 %v5841_v36, %v4517_v35  ;;  %v4041_v50 = vld [vmem:[#allocation2 + $0x128] sm:$0xf]  ;;  %v5834_v58 = vld [vmem:[#allocation2 + $0x4c0] sm:$0xf0]  ;;  %v3986_v35 = vor.u32 %v5708_v25, %v3985_v24  ;;  %v5799_v24 = vld [vmem:[#allocation2 + $0x3a8] sm:$0xf0] }
  0xe1   :  { %2983 = vmatpush.bf16.msra.mxu3 %v5382_v3  ;;  %v5046_v3 = vor.u32 %v5970_v55, %v5043_v56  ;;  %v5778_v55 = vld [vmem:[#allocation2 + $0x300] sm:$0xf0]  ;;  %v4489_v56 = vld [vmem:[#allocation2 + $0x4a8] sm:$0xf]  ;;  %v4042_v1 = vor.u32 %v5722_v51, %v4041_v50  ;;  %v5757_v50 = vld [vmem:[#allocation2 + $0x258] sm:$0xf0] }
  0xe2   :  { %2942 = vmatpush.bf16.msra.mxu0 %v4682_v12  ;;  %v4097_v12 = vld [vmem:[#allocation2 + $0x198] sm:$0xf]  ;;  %v4713_v60 = vld [vmem:[#allocation2 + $0x668] sm:$0xf]  ;;  %v4490_v4 = vor.u32 %v5834_v58, %v4489_v56  ;;  %v6401_v8 = vpop.f32.mrf.mxu2  ;;  %v4405_v51 = vld [vmem:[#allocation2 + $0x400] sm:$0xf] }
  0xe3   :  { %2956 = vmatpush.bf16.msra.mxu1 %v4906_v13  ;;  %v5736_v13 = vld [vmem:[#allocation2 + $0x1b0] sm:$0xf0]  ;;  %v5869_v56 = vld [vmem:[#allocation2 + $0x5d8] sm:$0xf0]  ;;  %v4573_v25 = vld [vmem:[#allocation2 + $0x550] sm:$0xf] }
  0xe4   :  { %2970 = vmatpush.bf16.msra.mxu2 %v5130_v14  ;;  %v4321_v14 = vld [vmem:[#allocation2 + $0x358] sm:$0xf]  ;;  %v4098_v27 = vor.u32 %v5736_v13, %v4097_v12  ;;  %v4461_v12 = vld [vmem:[#allocation2 + $0x470] sm:$0xf]  ;;  %v5827_v13 = vld [vmem:[#allocation2 + $0x488] sm:$0xf0] }
  0xe5   :  { %2984 = vmatpush.bf16.msra.mxu3 %v5354_v20  ;;  %v6388_v20 = vpop.f32.mrf.mxu3 }
  0xe6   :  { %2943 = vmatpush.bf16.msra.mxu0 %v4654_v28  ;;  %v4322_v28 = vor.u32 %v5792_v17, %v4321_v14  ;;  %v4685_v14 = vld [vmem:[#allocation2 + $0x630] sm:$0xf] }
  0xe7   :  { %2957 = vmatpush.bf16.msra.mxu1 %v4878_v16  ;;  %v4546_v16 = vor.u32 %v5848_v19, %v4545_v18  ;;  %v4014_v18 = vor.u32 %v5715_v6, %v4013_v5  ;;  %v5750_v5 = vld [vmem:[#allocation2 + $0x220] sm:$0xf0]  ;;  %v4377_v6 = vld [vmem:[#allocation2 + $0x3c8] sm:$0xf] }
  0xe8   :  { %2971 = vmatpush.bf16.msra.mxu2 %v5102_v29  ;;  %v4069_v29 = vld [vmem:[#allocation2 + $0x160] sm:$0xf] }
  0xe9   :  { %2985 = vmatpush.bf16.msra.mxu3 %v5326_v34  ;;  %v5785_v34 = vld [vmem:[#allocation2 + $0x338] sm:$0xf0]  ;;  %v4070_v45 = vor.u32 %v5729_v31, %v4069_v29  ;;  %v4433_v29 = vld [vmem:[#allocation2 + $0x438] sm:$0xf]  ;;  %v5820_v31 = vld [vmem:[#allocation2 + $0x450] sm:$0xf0] }
  0xea   :  { %2944 = vmatpush.bf16.msra.mxu0 %v4626_v46  ;;  %v6576_v46 = vperm.slane %v6364_v54, 1  ;;  %v4434_v39 = vor.u32 %v5820_v31, %v4433_v29  ;;  %v6016_v31 = vld [vmem:[#allocation2 + $0xa70] sm:$0xf0] }
  0xeb   :  { %2958 = vmatpush.bf16.msra.mxu1 %v4850_v47  ;;  %v6393_v47 = vpop.f32.mrf.mxu1 }
  0xec   :  { %2972 = vmatpush.bf16.msra.mxu2 %v5074_v48  ;;  %v4294_v48 = vor.u32 %v5785_v34, %v4293_v32  ;;  %v5876_v34 = vld [vmem:[#allocation2 + $0x610] sm:$0xf0] }
  0xed   :  { %2986 = vmatpush.bf16.msra.mxu3 %v5298_v52  ;;  %v4265_v52 = vld [vmem:[#allocation2 + $0x2e8] sm:$0xf]  ;;  %v2710_v62 = vpop.f32.mrf.mxu3 }
  0xee   :  { %2945 = vmatpush.bf16.msra.mxu0 %v4598_v61  ;;  %v5890_v61 = vld [vmem:[#allocation2 + $0x680] sm:$0xf0] }
  0xef   :  { %2959 = vmatpush.bf16.msra.mxu1 %v4822_v2  ;;  %v2711_v2 = vadd.f32 %v2710_v62, %v6576_v46  ;;  %v4714_v9 = vor.u32 %v5890_v61, %v4713_v60 }
  0xf0   :  { %2973 = vmatpush.bf16.msra.mxu2 %v5046_v3  ;;  %v4266_v3 = vor.u32 %v5778_v55, %v4265_v52  ;;  %v5813_v52 = vld [vmem:[#allocation2 + $0x418] sm:$0xf0]  ;;  %v4629_v55 = vld [vmem:[#allocation2 + $0x5c0] sm:$0xf] }
  0xf1   :  { %2987 = vmatpush.bf16.msra.mxu3 %v5270_v7  ;;  %v4237_v7 = vld [vmem:[#allocation2 + $0x2b0] sm:$0xf]  ;;  %v4406_v62 = vor.u32 %v5813_v52, %v4405_v51  ;;  %v5953_v51 = vld [vmem:[#allocation2 + $0x878] sm:$0xf0]  ;;  %v5189_v52 = vld [vmem:[#allocation2 + $0xa20] sm:$0xf] }
  0xf2   :  { %2946 = vmatpush.bf16.msra.mxu0 %v4570_v15  ;;  %v5883_v15 = vld [vmem:[#allocation2 + $0x648] sm:$0xf0]  ;;  %v2724_v17 = vpop.f32.mrf.mxu0 }
  0xf3   :  { %2960 = vmatpush.bf16.msra.mxu1 %v4794_v21  ;;  %v2725_v19 = vadd.f32 %v2724_v17, %v2711_v2  ;;  %v4238_v21 = vor.u32 %v5771_v10, %v4237_v7  ;;  %v5694_v2 = vld [vmem:[#allocation2 + $0x60] sm:$0xf0] }
  0xf4   :  { %2974 = vmatpush.bf16.msra.mxu2 %v5018_v22  ;;  %v4462_v22 = vor.u32 %v5827_v13, %v4461_v12  ;;  %v5806_v7 = vld [vmem:[#allocation2 + $0x3e0] sm:$0xf0]  ;;  %v3901_v13 = vld [vmem:[#allocation2 + $0x10] sm:$0xf] }
  0xf5   :  { %2988 = vmatpush.bf16.msra.mxu3 %v5242_v26  ;;  %2947 = vmatmul.bf16.vlgmr.msra.gmra.mxu0 %v6325_v23  ;;  %v4209_v26 = vld [vmem:[#allocation2 + $0x278] sm:$0xf]  ;;  %v5862_v10 = vld [vmem:[#allocation2 + $0x5a0] sm:$0xf0]  ;;  %v4378_v17 = vor.u32 %v5806_v7, %v4377_v6  ;;  %v5161_v6 = vld [vmem:[#allocation2 + $0x9e8] sm:$0xf] }
  0xf6   :  { %2995 = vmatpush.bf16.msrb.mxu0 %v4098_v27  ;;  %2961 = vmatmul.bf16.vlgmr.msra.gmra.mxu1 %v6346_v37  ;;  %v2738_v27 = vpop.f32.mrf.mxu1 }
  0xf7   :  { %3009 = vmatpush.bf16.msrb.mxu1 %v4322_v28  ;;  %2975 = vmatmul.bf16.vlgmr.msra.gmra.mxu2 %v6350_v42  ;;  %v4686_v28 = vor.u32 %v5883_v15, %v4685_v14  ;;  %v2739_v32 = vadd.f32 %v2738_v27, %v2725_v19  ;;  %v5687_v14 = vld [vmem:[#allocation2 + $0x28] sm:$0xf0]  ;;  %v4993_v27 = vld [vmem:[#allocation2 + $0x898] sm:$0xf] }
  0xf8   :  { %3023 = vmatpush.bf16.msrb.mxu2 %v4546_v16  ;;  %2989 = vmatmul.bf16.vlgmr.msra.gmra.mxu3 %v6348_v41  ;;  %v5764_v16 = vld [vmem:[#allocation2 + $0x290] sm:$0xf0]  ;;  %v5743_v19 = vld [vmem:[#allocation2 + $0x1e8] sm:$0xf0]  ;;  %v3902_v29 = vor.u32 %v5687_v14, %v3901_v13  ;;  %v4043_v14 = vld [vmem:[#allocation2 + $0x144] sm:$0xf0] }
  0xf9   :  { %3037 = vmatpush.bf16.msrb.mxu3 %v4770_v33  ;;  %v4657_v33 = vld [vmem:[#allocation2 + $0x5f8] sm:$0xf]  ;;  %v4210_v36 = vor.u32 %v5764_v16, %v4209_v26  ;;  %v5855_v26 = vld [vmem:[#allocation2 + $0x568] sm:$0xf0] }
  0xfa   :  { %2996 = vmatpush.bf16.msrb.mxu0 %v4070_v45  ;;  %v5701_v45 = vld [vmem:[#allocation2 + $0x98] sm:$0xf0]  ;;  %v5217_v16 = vld [vmem:[#allocation2 + $0xa58] sm:$0xf]  ;;  %v5719_v13 = vld [vmem:[#allocation2 + $0x12c] sm:$0xf] }
  0xfb   :  { %3010 = vmatpush.bf16.msrb.mxu1 %v4294_v48  ;;  %v4181_v48 = vld [vmem:[#allocation2 + $0x240] sm:$0xf]  ;;  %v3958_v60 = vor.u32 %v5701_v45, %v3957_v44  ;;  %v4574_v44 = vor.u32 %v5855_v26, %v4573_v25  ;;  %v5995_v25 = vld [vmem:[#allocation2 + $0x9c8] sm:$0xf0]  ;;  %v5357_v26 = vld [vmem:[#allocation2 + $0xb70] sm:$0xf] }
  0xfc   :  { %3024 = vmatpush.bf16.msrb.mxu2 %v4518_v49  ;;  %v4658_v49 = vor.u32 %v5876_v34, %v4657_v33  ;;  %v4182_v61 = vor.u32 %v5757_v50, %v4181_v48  ;;  %v6072_v33 = vld [vmem:[#allocation2 + $0xc30] sm:$0xf0]  ;;  %v5218_v48 = vor.u32 %v6016_v31, %v5217_v16  ;;  %v4965_v50 = vld [vmem:[#allocation2 + $0x860] sm:$0xf]  ;;  %v4015_v16 = vld [vmem:[#allocation2 + $0x10c] sm:$0xf0] }
  0xfd   :  { %3038 = vmatpush.bf16.msrb.mxu3 %v4742_v53  ;;  %v2752_v53 = vpop.f32.mrf.mxu2 }
  0xfe   :  { %2997 = vmatpush.bf16.msrb.mxu0 %v4042_v1  ;;  %v6403_v58 = vadd.f32 %v2752_v53, %v2739_v32  ;;  %v3929_v1 = vld [vmem:[#allocation2 + $0x48] sm:$0xf]  ;;  %v5441_v32 = vld [vmem:[#allocation2 + $0xc18] sm:$0xf] }
  0xff   :  { %3011 = vmatpush.bf16.msrb.mxu1 %v4266_v3  ;;  %v4153_v3 = vld [vmem:[#allocation2 + $0x208] sm:$0xf]  ;;  %v3930_v12 = vor.u32 %v5694_v2, %v3929_v1  ;;  %v4966_v1 = vor.u32 %v5953_v51, %v4965_v50 }
 0x100   :  { %3025 = vmatpush.bf16.msrb.mxu2 %v4490_v4  ;;  %v4630_v4 = vor.u32 %v5869_v56, %v4629_v55  ;;  %v4154_v15 = vor.u32 %v5750_v5, %v4153_v3  ;;  %v6009_v55 = vld [vmem:[#allocation2 + $0xa38] sm:$0xf0]  ;;  %v5413_v56 = vld [vmem:[#allocation2 + $0xbe0] sm:$0xf]  ;;  %v5946_v5 = vld [vmem:[#allocation2 + $0x840] sm:$0xf0] }
 0x101   :  { %3039 = vmatpush.bf16.msrb.mxu3 %v4714_v9  ;;  %v4601_v9 = vld [vmem:[#allocation2 + $0x588] sm:$0xf]  ;;  %v5190_v2 = vor.u32 %v6009_v55, %v5189_v52  ;;  %v5925_v55 = vld [vmem:[#allocation2 + $0x798] sm:$0xf0] }
 0x102   :  { %2998 = vmatpush.bf16.msrb.mxu0 %v4014_v18  ;;  %v4125_v18 = vld [vmem:[#allocation2 + $0x1d0] sm:$0xf] }
 0x103   :  { %3012 = vmatpush.bf16.msrb.mxu1 %v4238_v21  ;;  %v4349_v21 = vld [vmem:[#allocation2 + $0x390] sm:$0xf]  ;;  %v4126_v34 = vor.u32 %v5743_v19, %v4125_v18 }
 0x104   :  { %3026 = vmatpush.bf16.msrb.mxu2 %v4462_v22  ;;  %v4602_v22 = vor.u32 %v5862_v10, %v4601_v9  ;;  %v6002_v9 = vld [vmem:[#allocation2 + $0xa00] sm:$0xf0]  ;;  %v5385_v10 = vld [vmem:[#allocation2 + $0xba8] sm:$0xf]  ;;  %v4909_v19 = vld [vmem:[#allocation2 + $0x7f0] sm:$0xf] }
 0x105   :  { %3040 = vmatpush.bf16.msrb.mxu3 %v4686_v28  ;;  %v5960_v28 = vld [vmem:[#allocation2 + $0x8b0] sm:$0xf0] }
 0x106   :  { %2999 = vmatpush.bf16.msrb.mxu0 %v3986_v35  ;;  %v4350_v35 = vor.u32 %v5799_v24, %v4349_v21  ;;  %v4994_v45 = vor.u32 %v5960_v28, %v4993_v27  ;;  %v5939_v21 = vld [vmem:[#allocation2 + $0x808] sm:$0xf0]  ;;  %v4046_v24 = vor.u32 %v5719_v13, %v4043_v14  ;;  %v5712_v28 = vld [vmem:[#allocation2 + $0xf4] sm:$0xf]  ;;  %v5974_v13 = vld [vmem:[#allocation2 + $0x920] sm:$0xf0] }
 0x107   :  { %3013 = vmatpush.bf16.msrb.mxu1 %v4210_v36  ;;  %v5733_v36 = vld [vmem:[#allocation2 + $0x19c] sm:$0xf]  ;;  %v6051_v27 = vld [vmem:[#allocation2 + $0xb88] sm:$0xf0]  ;;  %v5273_v14 = vld [vmem:[#allocation2 + $0xac8] sm:$0xf] }
 0x108   :  { %3027 = vmatpush.bf16.msrb.mxu2 %v4434_v39  ;;  %v4099_v39 = vld [vmem:[#allocation2 + $0x1b4] sm:$0xf0] }
 0x109   :  { %3041 = vmatpush.bf16.msrb.mxu3 %v4658_v49  ;;  %v5442_v49 = vor.u32 %v6072_v33, %v5441_v32  ;;  %v4102_v53 = vor.u32 %v5733_v36, %v4099_v39  ;;  %v5358_v32 = vor.u32 %v6051_v27, %v5357_v26  ;;  %v4881_v33 = vld [vmem:[#allocation2 + $0x7b8] sm:$0xf]  ;;  %v4018_v36 = vor.u32 %v5712_v28, %v4015_v16  ;;  %v5988_v39 = vld [vmem:[#allocation2 + $0x990] sm:$0xf0]  ;;  %v5021_v26 = vld [vmem:[#allocation2 + $0x8d0] sm:$0xf] }
 0x10a   :  { %3000 = vmatpush.bf16.msrb.mxu0 %v3958_v60  ;;  %v6065_v60 = vld [vmem:[#allocation2 + $0xbf8] sm:$0xf0]  ;;  %v5967_v27 = vld [vmem:[#allocation2 + $0x8e8] sm:$0xf0]  ;;  %v5245_v28 = vld [vmem:[#allocation2 + $0xa90] sm:$0xf] }
 0x10b   :  { %3014 = vmatpush.bf16.msrb.mxu1 %v4182_v61  ;;  %v5726_v61 = vld [vmem:[#allocation2 + $0x164] sm:$0xf]  ;;  %v5414_v3 = vor.u32 %v6065_v60, %v5413_v56  ;;  %v5077_v56 = vld [vmem:[#allocation2 + $0x940] sm:$0xf] }
 0x10c   :  { %3028 = vmatpush.bf16.msrb.mxu2 %v4406_v62  ;;  %v4071_v62 = vld [vmem:[#allocation2 + $0x17c] sm:$0xf0] }
 0x10d   :  { %3042 = vmatpush.bf16.msrb.mxu3 %v4630_v4  ;;  %v4937_v4 = vld [vmem:[#allocation2 + $0x828] sm:$0xf]  ;;  %v4074_v7 = vor.u32 %v5726_v61, %v4071_v62  ;;  %v5981_v61 = vld [vmem:[#allocation2 + $0x958] sm:$0xf0]  ;;  %v5301_v62 = vld [vmem:[#allocation2 + $0xb00] sm:$0xf] }
 0x10e   :  { %3001 = vmatpush.bf16.msrb.mxu0 %v3930_v12  ;;  %v6058_v12 = vld [vmem:[#allocation2 + $0xbc0] sm:$0xf0] }
 0x10f   :  { %3015 = vmatpush.bf16.msrb.mxu1 %v4154_v15  ;;  %v4938_v15 = vor.u32 %v5946_v5, %v4937_v4  ;;  %v5386_v18 = vor.u32 %v6058_v12, %v5385_v10  ;;  %v5078_v5 = vor.u32 %v5981_v61, %v5077_v56  ;;  %v5049_v10 = vld [vmem:[#allocation2 + $0x908] sm:$0xf]  ;;  %v4295_v61 = vld [vmem:[#allocation2 + $0x33c] sm:$0xf0] }
 0x110   :  { %3029 = vmatpush.bf16.msrb.mxu2 %v4378_v17  ;;  %v5162_v17 = vor.u32 %v6002_v9, %v5161_v6  ;;  %v5918_v9 = vld [vmem:[#allocation2 + $0x760] sm:$0xf0] }
 0x111   :  { %3043 = vmatpush.bf16.msrb.mxu3 %v4602_v22  ;;  %v5133_v22 = vld [vmem:[#allocation2 + $0x9b0] sm:$0xf] }
 0x112   :  { %3002 = vmatpush.bf16.msrb.mxu0 %v3902_v29  ;;  %v4910_v29 = vor.u32 %v5939_v21, %v4909_v19  ;;  %v5134_v31 = vor.u32 %v5995_v25, %v5133_v22  ;;  %v4797_v21 = vld [vmem:[#allocation2 + $0x710] sm:$0xf]  ;;  %v5911_v22 = vld [vmem:[#allocation2 + $0x728] sm:$0xf0] }
 0x113   :  { %3016 = vmatpush.bf16.msrb.mxu1 %v4126_v34  ;;  %v5932_v34 = vld [vmem:[#allocation2 + $0x7d0] sm:$0xf0] }
 0x114   :  { %3030 = vmatpush.bf16.msrb.mxu2 %v4350_v35  ;;  %v5105_v35 = vld [vmem:[#allocation2 + $0x978] sm:$0xf]  ;;  %v4882_v50 = vor.u32 %v5932_v34, %v4881_v33  ;;  %v5789_v33 = vld [vmem:[#allocation2 + $0x35c] sm:$0xf] }
 0x115   :  { %3044 = vmatpush.bf16.msrb.mxu3 %v4574_v44  ;;  %3003 = vmatmul.bf16.vlgmr.msrb.gmra.mxu0 %v6301_v57  ;;  %v5329_v44 = vld [vmem:[#allocation2 + $0xb38] sm:$0xf]  ;;  %v5106_v51 = vor.u32 %v5988_v39, %v5105_v35  ;;  %v5845_v35 = vld [vmem:[#allocation2 + $0x51c] sm:$0xf] }
 0x116   :  { %3051 = vmatpush.bf16.msra.mxu0 %v4994_v45  ;;  %3017 = vmatmul.bf16.vlgmr.msrb.gmra.mxu1 %v6316_v11  ;;  %v6044_v45 = vld [vmem:[#allocation2 + $0xb50] sm:$0xf0]  ;;  %v4323_v34 = vld [vmem:[#allocation2 + $0x374] sm:$0xf0] }
 0x117   :  { %3065 = vmatpush.bf16.msra.mxu1 %v5218_v48  ;;  %3031 = vmatmul.bf16.vlgmr.msrb.gmra.mxu2 %v6306_v0  ;;  %v5705_v48 = vld [vmem:[#allocation2 + $0xbc] sm:$0xf]  ;;  %v5330_v52 = vor.u32 %v6044_v45, %v5329_v44  ;;  %v4547_v39 = vld [vmem:[#allocation2 + $0x534] sm:$0xf0] }
 0x118   :  { %3079 = vmatpush.bf16.msra.mxu2 %v5442_v49  ;;  %3045 = vmatmul.bf16.vlgmr.msrb.gmra.mxu3 %v6325_v23  ;;  %v3987_v49 = vld [vmem:[#allocation2 + $0xd4] sm:$0xf0]  ;;  %v5901_v44 = vld [vmem:[#allocation2 + $0x6dc] sm:$0xf] }
 0x119   :  { %3093 = vmatpush.bf16.msra.mxu3 %v4102_v53  ;;  %v4853_v53 = vld [vmem:[#allocation2 + $0x780] sm:$0xf]  ;;  %v3990_v60 = vor.u32 %v5705_v48, %v3987_v49  ;;  %v4771_v45 = vld [vmem:[#allocation2 + $0x6f4] sm:$0xf0]  ;;  %v5022_v48 = vor.u32 %v5967_v27, %v5021_v26  ;;  %v5768_v27 = vld [vmem:[#allocation2 + $0x2b4] sm:$0xf] }
 0x11a   :  { %3052 = vmatpush.bf16.msra.mxu0 %v4966_v1  ;;  %v6037_v1 = vld [vmem:[#allocation2 + $0xb18] sm:$0xf0]  ;;  %v4854_v4 = vor.u32 %v5925_v55, %v4853_v53  ;;  %v4326_v53 = vor.u32 %v5789_v33, %v4323_v34  ;;  %v4550_v55 = vor.u32 %v5845_v35, %v4547_v39  ;;  %v4774_v56 = vor.u32 %v5901_v44, %v4771_v45  ;;  %v4687_v33 = vld [vmem:[#allocation2 + $0x64c] sm:$0xf0]  ;;  %v5936_v34 = vld [vmem:[#allocation2 + $0x7f4] sm:$0xf] }
 0x11b   :  { %3066 = vmatpush.bf16.msra.mxu1 %v5190_v2  ;;  %v5698_v2 = vld [vmem:[#allocation2 + $0x84] sm:$0xf]  ;;  %v5302_v6 = vor.u32 %v6037_v1, %v5301_v62  ;;  %v4911_v35 = vld [vmem:[#allocation2 + $0x80c] sm:$0xf0]  ;;  %v5761_v45 = vld [vmem:[#allocation2 + $0x27c] sm:$0xf] }
 0x11c   :  { %3080 = vmatpush.bf16.msra.mxu2 %v5414_v3  ;;  %v3959_v3 = vld [vmem:[#allocation2 + $0x9c] sm:$0xf0]  ;;  %v5838_v62 = vld [vmem:[#allocation2 + $0x4e4] sm:$0xf] }
 0x11d   :  { %3094 = vmatpush.bf16.msra.mxu3 %v4074_v7  ;;  %v4825_v7 = vld [vmem:[#allocation2 + $0x748] sm:$0xf]  ;;  %v3962_v12 = vor.u32 %v5698_v2, %v3959_v3  ;;  %v4519_v2 = vld [vmem:[#allocation2 + $0x4fc] sm:$0xf0]  ;;  %v5894_v3 = vld [vmem:[#allocation2 + $0x6a4] sm:$0xf] }
 0x11e   :  { %3053 = vmatpush.bf16.msra.mxu0 %v4938_v15  ;;  %v6030_v15 = vld [vmem:[#allocation2 + $0xae0] sm:$0xf0]  ;;  %v4826_v19 = vor.u32 %v5918_v9, %v4825_v7  ;;  %v4522_v9 = vor.u32 %v5838_v62, %v4519_v2  ;;  %v4183_v2 = vld [vmem:[#allocation2 + $0x25c] sm:$0xf0] }
 0x11f   :  { %3067 = vmatpush.bf16.msra.mxu1 %v5162_v17  ;;  %v5691_v17 = vld [vmem:[#allocation2 + $0x4c] sm:$0xf]  ;;  %v5274_v25 = vor.u32 %v6030_v15, %v5273_v14 }
 0x120   :  { %3081 = vmatpush.bf16.msra.mxu2 %v5386_v18  ;;  %v3931_v18 = vld [vmem:[#allocation2 + $0x64] sm:$0xf0]  ;;  %v5831_v14 = vld [vmem:[#allocation2 + $0x4ac] sm:$0xf] }
 0x121   :  { %3095 = vmatpush.bf16.msra.mxu3 %v4046_v24  ;;  %v5050_v24 = vor.u32 %v5974_v13, %v5049_v10  ;;  %v3934_v16 = vor.u32 %v5691_v17, %v3931_v18  ;;  %v4267_v13 = vld [vmem:[#allocation2 + $0x304] sm:$0xf0]  ;;  %v5887_v18 = vld [vmem:[#allocation2 + $0x66c] sm:$0xf] }
 0x122   :  { %3054 = vmatpush.bf16.msra.mxu0 %v4910_v29  ;;  %v6023_v29 = vld [vmem:[#allocation2 + $0xaa8] sm:$0xf0]  ;;  %v4491_v17 = vld [vmem:[#allocation2 + $0x4c4] sm:$0xf0] }
 0x123   :  { %3068 = vmatpush.bf16.msra.mxu1 %v5134_v31  ;;  %v5684_v31 = vld [vmem:[#allocation2 + $0x14] sm:$0xf]  ;;  %v5246_v49 = vor.u32 %v6023_v29, %v5245_v28  ;;  %v4239_v28 = vld [vmem:[#allocation2 + $0x2cc] sm:$0xf0] }
 0x124   :  { %3082 = vmatpush.bf16.msra.mxu2 %v5358_v32  ;;  %v3903_v32 = vld [vmem:[#allocation2 + $0x2c] sm:$0xf0] }
 0x125   :  { %3096 = vmatpush.bf16.msra.mxu3 %v4018_v36  ;;  %v4798_v36 = vor.u32 %v5911_v22, %v4797_v21  ;;  %v5943_v21 = vld [vmem:[#allocation2 + $0x82c] sm:$0xf]  ;;  %v4939_v22 = vld [vmem:[#allocation2 + $0x844] sm:$0xf0] }
 0x126   :  { %3055 = vmatpush.bf16.msra.mxu0 %v4882_v50  ;;  %v5957_v50 = vld [vmem:[#allocation2 + $0x89c] sm:$0xf]  ;;  %v4942_v29 = vor.u32 %v5943_v21, %v4939_v22  ;;  %v4379_v21 = vld [vmem:[#allocation2 + $0x3e4] sm:$0xf0]  ;;  %v5859_v22 = vld [vmem:[#allocation2 + $0x58c] sm:$0xf] }
 0x127   :  { %3069 = vmatpush.bf16.msra.mxu1 %v5106_v51  ;;  %v4995_v51 = vld [vmem:[#allocation2 + $0x8b4] sm:$0xf0] }
 0x128   :  { %3083 = vmatpush.bf16.msra.mxu2 %v5330_v52  ;;  %v3906_v52 = vor.u32 %v5684_v31, %v3903_v32  ;;  %v4998_v1 = vor.u32 %v5957_v50, %v4995_v51  ;;  %v4463_v31 = vld [vmem:[#allocation2 + $0x48c] sm:$0xf0]  ;;  %v5880_v32 = vld [vmem:[#allocation2 + $0x634] sm:$0xf]  ;;  %v4914_v50 = vor.u32 %v5936_v34, %v4911_v35  ;;  %v4435_v51 = vld [vmem:[#allocation2 + $0x454] sm:$0xf0] }
 0x129   :  { %3097 = vmatpush.bf16.msra.mxu3 %v3990_v60  ;;  %v5782_v60 = vld [vmem:[#allocation2 + $0x324] sm:$0xf]  ;;  %v4690_v44 = vor.u32 %v5880_v32, %v4687_v33  ;;  %v5796_v33 = vld [vmem:[#allocation2 + $0x394] sm:$0xf]  ;;  %v4351_v34 = vld [vmem:[#allocation2 + $0x3ac] sm:$0xf0] }
 0x12a   :  { %3056 = vmatpush.bf16.msra.mxu0 %v4854_v4  ;;  %v4743_v4 = vld [vmem:[#allocation2 + $0x6bc] sm:$0xf0]  ;;  %v4298_v7 = vor.u32 %v5782_v60, %v4295_v61  ;;  %v5852_v35 = vld [vmem:[#allocation2 + $0x554] sm:$0xf] }
 0x12b   :  { %3070 = vmatpush.bf16.msra.mxu1 %v5078_v5  ;;  %v5950_v5 = vld [vmem:[#allocation2 + $0x864] sm:$0xf]  ;;  %v4746_v10 = vor.u32 %v5894_v3, %v4743_v4 }
 0x12c   :  { %3084 = vmatpush.bf16.msra.mxu2 %v5302_v6  ;;  %v4967_v6 = vld [vmem:[#allocation2 + $0x87c] sm:$0xf0]  ;;  %v5810_v3 = vld [vmem:[#allocation2 + $0x404] sm:$0xf] }
 0x12d   :  { %3098 = vmatpush.bf16.msra.mxu3 %v3962_v12  ;;  %v5775_v12 = vld [vmem:[#allocation2 + $0x2ec] sm:$0xf]  ;;  %v4970_v15 = vor.u32 %v5950_v5, %v4967_v6  ;;  %v4407_v5 = vld [vmem:[#allocation2 + $0x41c] sm:$0xf0]  ;;  %v5866_v6 = vld [vmem:[#allocation2 + $0x5c4] sm:$0xf] }
 0x12e   :  { %3057 = vmatpush.bf16.msra.mxu0 %v4826_v19  ;;  %v4715_v19 = vld [vmem:[#allocation2 + $0x684] sm:$0xf0] }
 0x12f   :  { %3071 = vmatpush.bf16.msra.mxu1 %v5050_v24  ;;  %v4270_v24 = vor.u32 %v5775_v12, %v4267_v13  ;;  %v4718_v26 = vor.u32 %v5887_v18, %v4715_v19  ;;  %v4410_v13 = vor.u32 %v5810_v3, %v4407_v5  ;;  %v5803_v18 = vld [vmem:[#allocation2 + $0x3cc] sm:$0xf] }
 0x130   :  { %3085 = vmatpush.bf16.msra.mxu2 %v5274_v25  ;;  %v4494_v25 = vor.u32 %v5831_v14, %v4491_v17  ;;  %v4155_v17 = vld [vmem:[#allocation2 + $0x224] sm:$0xf0] }
 0x131   :  { %3099 = vmatpush.bf16.msra.mxu3 %v3934_v16  ;;  %v5824_v16 = vld [vmem:[#allocation2 + $0x474] sm:$0xf] }
 0x132   :  { %3058 = vmatpush.bf16.msra.mxu0 %v4798_v36  ;;  %v4242_v36 = vor.u32 %v5768_v27, %v4239_v28  ;;  %v4466_v39 = vor.u32 %v5824_v16, %v4463_v31  ;;  %v4827_v27 = vld [vmem:[#allocation2 + $0x764] sm:$0xf0]  ;;  %v5740_v16 = vld [vmem:[#allocation2 + $0x1d4] sm:$0xf]  ;;  %v4382_v31 = vor.u32 %v5803_v18, %v4379_v21  ;;  %v6421_v21 = vpop.f32.mrf.mxu2 }
 0x133   :  { %3072 = vmatpush.bf16.msra.mxu1 %v5022_v48  ;;  %v4211_v48 = vld [vmem:[#allocation2 + $0x294] sm:$0xf0]  ;;  %v4301_v18 = vld [vmem:[#allocation2 + $0x328] sm:$0xf] }
 0x134   :  { %3086 = vmatpush.bf16.msra.mxu2 %v5246_v49  ;;  %v5817_v49 = vld [vmem:[#allocation2 + $0x43c] sm:$0xf]  ;;  %v4214_v60 = vor.u32 %v5761_v45, %v4211_v48  ;;  %v4799_v45 = vld [vmem:[#allocation2 + $0x72c] sm:$0xf0]  ;;  %v6415_v48 = vpop.f32.mrf.mxu0 }
 0x135   :  { %3100 = vmatpush.bf16.msra.mxu3 %v3906_v52  ;;  %3059 = vmatmul.bf16.vlgmr.msra.gmra.mxu0 %v6346_v37  ;;  %v5873_v52 = vld [vmem:[#allocation2 + $0x5fc] sm:$0xf]  ;;  %v4438_v61 = vor.u32 %v5817_v49, %v4435_v51 }
 0x136   :  { %3107 = vmatpush.bf16.msrb.mxu0 %v4326_v53  ;;  %3073 = vmatmul.bf16.vlgmr.msra.gmra.mxu1 %v6350_v42  ;;  %v4659_v53 = vld [vmem:[#allocation2 + $0x614] sm:$0xf0]  ;;  %v6013_v49 = vld [vmem:[#allocation2 + $0xa5c] sm:$0xf] }
 0x137   :  { %3121 = vmatpush.bf16.msrb.mxu1 %v4550_v55  ;;  %3087 = vmatmul.bf16.vlgmr.msra.gmra.mxu2 %v6348_v41  ;;  %v5929_v55 = vld [vmem:[#allocation2 + $0x7bc] sm:$0xf]  ;;  %v4662_v62 = vor.u32 %v5873_v52, %v4659_v53  ;;  %v5443_v53 = vld [vmem:[#allocation2 + $0xc34] sm:$0xf0] }
 0x138   :  { %3135 = vmatpush.bf16.msrb.mxu2 %v4774_v56  ;;  %3101 = vmatmul.bf16.vlgmr.msra.gmra.mxu3 %v6301_v57  ;;  %v4883_v56 = vld [vmem:[#allocation2 + $0x7d4] sm:$0xf0]  ;;  %v6069_v51 = vld [vmem:[#allocation2 + $0xc1c] sm:$0xf] }
 0x139   :  { %3149 = vmatpush.bf16.msrb.mxu3 %v4998_v1  ;;  %v5754_v1 = vld [vmem:[#allocation2 + $0x244] sm:$0xf]  ;;  %v4886_v4 = vor.u32 %v5929_v55, %v4883_v56  ;;  %v4105_v55 = vld [vmem:[#allocation2 + $0x1a0] sm:$0xf]  ;;  %v5737_v56 = vld [vmem:[#allocation2 + $0x1b8] sm:$0xf0]  ;;  %v5446_v5 = vor.u32 %v6069_v51, %v5443_v53 }
 0x13a   :  { %3108 = vmatpush.bf16.msrb.mxu0 %v4298_v7  ;;  %v4631_v7 = vld [vmem:[#allocation2 + $0x5dc] sm:$0xf0]  ;;  %v4186_v12 = vor.u32 %v5754_v1, %v4183_v2  ;;  %v5793_v2 = vld [vmem:[#allocation2 + $0x378] sm:$0xf0]  ;;  %v5135_v51 = vld [vmem:[#allocation2 + $0x9cc] sm:$0xf0] }
 0x13b   :  { %3122 = vmatpush.bf16.msrb.mxu1 %v4522_v9  ;;  %v5922_v9 = vld [vmem:[#allocation2 + $0x784] sm:$0xf]  ;;  %v4634_v14 = vor.u32 %v5866_v6, %v4631_v7  ;;  %v4329_v1 = vld [vmem:[#allocation2 + $0x360] sm:$0xf]  ;;  %v4106_v6 = vor.u32 %v5737_v56, %v4105_v55  ;;  %v5359_v55 = vld [vmem:[#allocation2 + $0xb8c] sm:$0xf0] }
 0x13c   :  { %3136 = vmatpush.bf16.msrb.mxu2 %v4746_v10  ;;  %v4855_v10 = vld [vmem:[#allocation2 + $0x79c] sm:$0xf0]  ;;  %v6006_v7 = vld [vmem:[#allocation2 + $0xa24] sm:$0xf]  ;;  %v4021_v56 = vld [vmem:[#allocation2 + $0xf8] sm:$0xf] }
 0x13d   :  { %3150 = vmatpush.bf16.msrb.mxu3 %v4970_v15  ;;  %v5747_v15 = vld [vmem:[#allocation2 + $0x20c] sm:$0xf]  ;;  %v4858_v19 = vor.u32 %v5922_v9, %v4855_v10  ;;  %v5191_v9 = vld [vmem:[#allocation2 + $0xa3c] sm:$0xf0]  ;;  %v6062_v10 = vld [vmem:[#allocation2 + $0xbe4] sm:$0xf] }
 0x13e   :  { %3109 = vmatpush.bf16.msrb.mxu0 %v4270_v24  ;;  %v4603_v24 = vld [vmem:[#allocation2 + $0x5a4] sm:$0xf0]  ;;  %v4158_v28 = vor.u32 %v5747_v15, %v4155_v17  ;;  %v5730_v15 = vld [vmem:[#allocation2 + $0x180] sm:$0xf0] }
 0x13f   :  { %3123 = vmatpush.bf16.msrb.mxu1 %v4494_v25  ;;  %v6413_v25 = vpop.f32.mrf.mxu3  ;;  %v4606_v32 = vor.u32 %v5859_v22, %v4603_v24  ;;  %v5194_v22 = vor.u32 %v6006_v7, %v5191_v9  ;;  %v5985_v7 = vld [vmem:[#allocation2 + $0x97c] sm:$0xf]  ;;  %v5107_v9 = vld [vmem:[#allocation2 + $0x994] sm:$0xf0] }
 0x140   :  { %3137 = vmatpush.bf16.msrb.mxu2 %v4718_v26  ;;  %v5915_v26 = vld [vmem:[#allocation2 + $0x74c] sm:$0xf] }
 0x141   :  { %3151 = vmatpush.bf16.msrb.mxu3 %v4942_v29  ;;  %v4127_v29 = vld [vmem:[#allocation2 + $0x1ec] sm:$0xf0] }
 0x142   :  { %3110 = vmatpush.bf16.msrb.mxu0 %v4242_v36  ;;  %v4830_v36 = vor.u32 %v5915_v26, %v4827_v27  ;;  %v4130_v52 = vor.u32 %v5740_v16, %v4127_v29  ;;  %v5999_v27 = vld [vmem:[#allocation2 + $0x9ec] sm:$0xf] }
 0x143   :  { %3124 = vmatpush.bf16.msrb.mxu1 %v4466_v39  ;;  %v4575_v39 = vld [vmem:[#allocation2 + $0x56c] sm:$0xf0]  ;;  %v6055_v16 = vld [vmem:[#allocation2 + $0xbac] sm:$0xf] }
 0x144   :  { %3138 = vmatpush.bf16.msrb.mxu2 %v4690_v44  ;;  %v5908_v44 = vld [vmem:[#allocation2 + $0x714] sm:$0xf] }
 0x145   :  { %3152 = vmatpush.bf16.msrb.mxu3 %v4914_v50  ;;  %v5219_v50 = vld [vmem:[#allocation2 + $0xa74] sm:$0xf0]  ;;  %v4802_v3 = vor.u32 %v5908_v44, %v4799_v45 }
 0x146   :  { %3111 = vmatpush.bf16.msrb.mxu0 %v4214_v60  ;;  %v6417_v60 = vpop.f32.mrf.mxu1 }
 0x147   :  { %3125 = vmatpush.bf16.msrb.mxu1 %v4438_v61  ;;  %v4354_v61 = vor.u32 %v5796_v33, %v4351_v34  ;;  %v6419_v17 = vpop.f32.mrf.mxu3  ;;  %v5723_v33 = vld [vmem:[#allocation2 + $0x148] sm:$0xf0]  ;;  %v6424_v34 = vpop.f32.mrf.mxu0 }
 0x148   :  { %3139 = vmatpush.bf16.msrb.mxu2 %v4662_v62  ;;  %v4578_v62 = vor.u32 %v5852_v35, %v4575_v39  ;;  %v4273_v35 = vld [vmem:[#allocation2 + $0x2f0] sm:$0xf] }
 0x149   :  { %3153 = vmatpush.bf16.msrb.mxu3 %v4886_v4  ;;  %v5222_v4 = vor.u32 %v6013_v49, %v5219_v50  ;;  %v5992_v50 = vld [vmem:[#allocation2 + $0x9b4] sm:$0xf] }
 0x14a   :  { %3112 = vmatpush.bf16.msrb.mxu0 %v4186_v12  ;;  %v4330_v12 = vor.u32 %v5793_v2, %v4329_v1  ;;  %v5772_v1 = vld [vmem:[#allocation2 + $0x2d0] sm:$0xf0]  ;;  %v6431_v2 = vpop.f32.mrf.mxu2 }
 0x14b   :  { %3126 = vmatpush.bf16.msrb.mxu1 %v4410_v13  ;;  %v5415_v13 = vld [vmem:[#allocation2 + $0xbfc] sm:$0xf0] }
 0x14c   :  { %3140 = vmatpush.bf16.msrb.mxu2 %v4634_v14  ;;  %v4077_v14 = vld [vmem:[#allocation2 + $0x168] sm:$0xf]  ;;  %v5418_v24 = vor.u32 %v6062_v10, %v5415_v13  ;;  %v6041_v10 = vld [vmem:[#allocation2 + $0xb3c] sm:$0xf]  ;;  %v5331_v13 = vld [vmem:[#allocation2 + $0xb54] sm:$0xf0] }
 0x14d   :  { %3154 = vmatpush.bf16.msrb.mxu3 %v4858_v19  ;;  %v5786_v19 = vld [vmem:[#allocation2 + $0x340] sm:$0xf0]  ;;  %v4078_v26 = vor.u32 %v5730_v15, %v4077_v14  ;;  %v3993_v14 = vld [vmem:[#allocation2 + $0xc0] sm:$0xf]  ;;  %v5709_v15 = vld [vmem:[#allocation2 + $0xd8] sm:$0xf0] }
 0x14e   :  { %3113 = vmatpush.bf16.msrb.mxu0 %v4158_v28  ;;  %v5163_v28 = vld [vmem:[#allocation2 + $0xa04] sm:$0xf0]  ;;  %v4302_v29 = vor.u32 %v5786_v19, %v4301_v18  ;;  %v6429_v44 = vpop.f32.mrf.mxu1  ;;  %v4217_v18 = vld [vmem:[#allocation2 + $0x280] sm:$0xf]  ;;  %v5765_v19 = vld [vmem:[#allocation2 + $0x298] sm:$0xf0] }
 0x14f   :  { %3127 = vmatpush.bf16.msrb.mxu1 %v4382_v31  ;;  %v5387_v31 = vld [vmem:[#allocation2 + $0xbc4] sm:$0xf0]  ;;  %v5166_v39 = vor.u32 %v5999_v27, %v5163_v28  ;;  %v3994_v27 = vor.u32 %v5709_v15, %v3993_v14  ;;  %v5978_v28 = vld [vmem:[#allocation2 + $0x944] sm:$0xf] }
 0x150   :  { %3141 = vmatpush.bf16.msrb.mxu2 %v4606_v32  ;;  %v4049_v32 = vld [vmem:[#allocation2 + $0x130] sm:$0xf]  ;;  %v5390_v45 = vor.u32 %v6055_v16, %v5387_v31  ;;  %v5079_v16 = vld [vmem:[#allocation2 + $0x95c] sm:$0xf0]  ;;  %v4218_v31 = vor.u32 %v5765_v19, %v4217_v18  ;;  %v6020_v18 = vld [vmem:[#allocation2 + $0xa94] sm:$0xf] }
 0x151   :  { %3155 = vmatpush.bf16.msrb.mxu3 %v4830_v36  ;;  %v5779_v36 = vld [vmem:[#allocation2 + $0x308] sm:$0xf0]  ;;  %v4050_v49 = vor.u32 %v5723_v33, %v4049_v32  ;;  %v5303_v32 = vld [vmem:[#allocation2 + $0xb1c] sm:$0xf0]  ;;  %v3965_v33 = vld [vmem:[#allocation2 + $0x88] sm:$0xf] }
 0x152   :  { %3114 = vmatpush.bf16.msrb.mxu0 %v4130_v52  ;;  %v6048_v52 = vld [vmem:[#allocation2 + $0xb74] sm:$0xf]  ;;  %v4274_v53 = vor.u32 %v5779_v36, %v4273_v35  ;;  %v5702_v35 = vld [vmem:[#allocation2 + $0xa0] sm:$0xf0]  ;;  %v5247_v19 = vld [vmem:[#allocation2 + $0xaac] sm:$0xf0] }
 0x153   :  { %3128 = vmatpush.bf16.msrb.mxu1 %v4354_v61  ;;  %v5716_v61 = vld [vmem:[#allocation2 + $0x110] sm:$0xf0] }
 0x154   :  { %3142 = vmatpush.bf16.msrb.mxu2 %v4578_v62  ;;  %v4245_v62 = vld [vmem:[#allocation2 + $0x2b8] sm:$0xf] }
 0x155   :  { %3156 = vmatpush.bf16.msrb.mxu3 %v4802_v3  ;;  %3115 = vmatmul.bf16.vlgmr.msrb.gmra.mxu0 %v6316_v11  ;;  %v5138_v3 = vor.u32 %v5992_v50, %v5135_v51 }
 0x156   :  { %3163 = vmatpush.bf16.msra.mxu0 %v5222_v4  ;;  %3129 = vmatmul.bf16.vlgmr.msrb.gmra.mxu1 %v6306_v0  ;;  %v6433_v4 = vpop.f32.mrf.mxu3  ;;  %v6437_v36 = vpop.f32.mrf.mxu1 }
 0x157   :  { %3177 = vmatpush.bf16.msra.mxu1 %v5446_v5  ;;  %3143 = vmatmul.bf16.vlgmr.msrb.gmra.mxu2 %v6325_v23  ;;  %v5362_v5 = vor.u32 %v6048_v52, %v5359_v55  ;;  %v3966_v52 = vor.u32 %v5702_v35, %v3965_v33  ;;  %v5051_v55 = vld [vmem:[#allocation2 + $0x924] sm:$0xf0]  ;;  %v4777_v33 = vld [vmem:[#allocation2 + $0x6e0] sm:$0xf] }
 0x158   :  { %3191 = vmatpush.bf16.msra.mxu2 %v4106_v6  ;;  %3157 = vmatmul.bf16.vlgmr.msrb.gmra.mxu3 %v6346_v37  ;;  %v4022_v6 = vor.u32 %v5716_v61, %v4021_v56  ;;  %v6027_v56 = vld [vmem:[#allocation2 + $0xacc] sm:$0xf]  ;;  %v6441_v61 = vpop.f32.mrf.mxu2 }
 0x159   :  { %3205 = vmatpush.bf16.msra.mxu3 %v4330_v12  ;;  %v4246_v12 = vor.u32 %v5772_v1, %v4245_v62  ;;  %v5275_v1 = vld [vmem:[#allocation2 + $0xae4] sm:$0xf0] }
 0x15a   :  { %3164 = vmatpush.bf16.msra.mxu0 %v5194_v22  ;;  %v5110_v22 = vor.u32 %v5985_v7, %v5107_v9  ;;  %v5751_v7 = vld [vmem:[#allocation2 + $0x228] sm:$0xf0]  ;;  %v5278_v14 = vor.u32 %v6027_v56, %v5275_v1 }
 0x15b   :  { %3178 = vmatpush.bf16.msra.mxu1 %v5418_v24  ;;  %v6435_v24 = vpop.f32.mrf.mxu0 }
 0x15c   :  { %3192 = vmatpush.bf16.msra.mxu2 %v4078_v26  ;;  %v5334_v26 = vor.u32 %v6041_v10, %v5331_v13  ;;  %v5964_v10 = vld [vmem:[#allocation2 + $0x8d4] sm:$0xf] }
 0x15d   :  { %3206 = vmatpush.bf16.msra.mxu3 %v4302_v29  ;;  %v6034_v29 = vld [vmem:[#allocation2 + $0xb04] sm:$0xf] }
 0x15e   :  { %3165 = vmatpush.bf16.msra.mxu0 %v5166_v39  ;;  %v4189_v39 = vld [vmem:[#allocation2 + $0x248] sm:$0xf]  ;;  %v6439_v50 = vpop.f32.mrf.mxu3  ;;  %v5306_v51 = vor.u32 %v6034_v29, %v5303_v32  ;;  %v6445_v29 = vpop.f32.mrf.mxu1  ;;  %v5849_v32 = vld [vmem:[#allocation2 + $0x538] sm:$0xf0] }
 0x15f   :  { %3179 = vmatpush.bf16.msra.mxu1 %v5390_v45  ;;  %v5758_v45 = vld [vmem:[#allocation2 + $0x260] sm:$0xf0] }
 0x160   :  { %3193 = vmatpush.bf16.msra.mxu2 %v4050_v49  ;;  %v5082_v49 = vor.u32 %v5978_v28, %v5079_v16  ;;  %v4190_v62 = vor.u32 %v5758_v45, %v4189_v39  ;;  %v4133_v28 = vld [vmem:[#allocation2 + $0x1d8] sm:$0xf]  ;;  %v5744_v16 = vld [vmem:[#allocation2 + $0x1f0] sm:$0xf0]  ;;  %v5905_v39 = vld [vmem:[#allocation2 + $0x6f8] sm:$0xf0] }
 0x161   :  { %3207 = vmatpush.bf16.msra.mxu3 %v4274_v53  ;;  %v5971_v53 = vld [vmem:[#allocation2 + $0x90c] sm:$0xf]  ;;  %v5001_v45 = vld [vmem:[#allocation2 + $0x8a0] sm:$0xf]  ;;  %v4134_v56 = vor.u32 %v5744_v16, %v4133_v28 }
 0x162   :  { %3166 = vmatpush.bf16.msra.mxu0 %v5138_v3  ;;  %v3937_v3 = vld [vmem:[#allocation2 + $0x50] sm:$0xf]  ;;  %v5054_v9 = vor.u32 %v5971_v53, %v5051_v55  ;;  %v5225_v53 = vld [vmem:[#allocation2 + $0xa60] sm:$0xf]  ;;  %v6017_v55 = vld [vmem:[#allocation2 + $0xa78] sm:$0xf0] }
 0x163   :  { %3180 = vmatpush.bf16.msra.mxu1 %v5362_v5  ;;  %v5695_v5 = vld [vmem:[#allocation2 + $0x68] sm:$0xf0]  ;;  %v6443_v13 = vpop.f32.mrf.mxu0 }
 0x164   :  { %3194 = vmatpush.bf16.msra.mxu2 %v4022_v6  ;;  %v4161_v6 = vld [vmem:[#allocation2 + $0x210] sm:$0xf]  ;;  %v3938_v15 = vor.u32 %v5695_v5, %v3937_v3  ;;  %v4778_v3 = vor.u32 %v5905_v39, %v4777_v33  ;;  %v5891_v39 = vld [vmem:[#allocation2 + $0x688] sm:$0xf0] }
 0x165   :  { %3208 = vmatpush.bf16.msra.mxu3 %v4246_v12  ;;  %v5023_v12 = vld [vmem:[#allocation2 + $0x8ec] sm:$0xf0] }
 0x166   :  { %3167 = vmatpush.bf16.msra.mxu0 %v5110_v22  ;;  %v3909_v22 = vld [vmem:[#allocation2 + $0x18] sm:$0xf]  ;;  %v5026_v35 = vor.u32 %v5964_v10, %v5023_v12  ;;  %v6447_v1 = vpop.f32.mrf.mxu3  ;;  %v6449_v10 = vpop.f32.mrf.mxu2  ;;  %v5226_v12 = vor.u32 %v6017_v55, %v5225_v53  ;;  %v4721_v33 = vld [vmem:[#allocation2 + $0x670] sm:$0xf]  ;;  %v6003_v53 = vld [vmem:[#allocation2 + $0xa08] sm:$0xf0] }
 0x167   :  { %3181 = vmatpush.bf16.msra.mxu1 %v5334_v26  ;;  %v4162_v26 = vor.u32 %v5751_v7, %v4161_v6  ;;  %v4525_v6 = vld [vmem:[#allocation2 + $0x4e8] sm:$0xf]  ;;  %v5842_v7 = vld [vmem:[#allocation2 + $0x500] sm:$0xf0] }
 0x168   :  { %3195 = vmatpush.bf16.msra.mxu2 %v3994_v27  ;;  %v5688_v27 = vld [vmem:[#allocation2 + $0x30] sm:$0xf0] }
 0x169   :  { %3209 = vmatpush.bf16.msra.mxu3 %v4218_v31  ;;  %v4553_v31 = vld [vmem:[#allocation2 + $0x520] sm:$0xf] }
 0x16a   :  { %3168 = vmatpush.bf16.msra.mxu0 %v5082_v49  ;;  %v5961_v49 = vld [vmem:[#allocation2 + $0x8b8] sm:$0xf0] }
 0x16b   :  { %3182 = vmatpush.bf16.msra.mxu1 %v5306_v51  ;;  %v5250_v51 = vor.u32 %v6020_v18, %v5247_v19  ;;  %v5002_v5 = vor.u32 %v5961_v49, %v5001_v45  ;;  %v5954_v18 = vld [vmem:[#allocation2 + $0x880] sm:$0xf0]  ;;  %v5197_v19 = vld [vmem:[#allocation2 + $0xa28] sm:$0xf]  ;;  %v4945_v45 = vld [vmem:[#allocation2 + $0x830] sm:$0xf] }
 0x16c   :  { %3196 = vmatpush.bf16.msra.mxu2 %v3966_v52  ;;  %v3910_v52 = vor.u32 %v5688_v27, %v3909_v22  ;;  %v6010_v22 = vld [vmem:[#allocation2 + $0xa40] sm:$0xf0]  ;;  %v6451_v27 = vpop.f32.mrf.mxu0  ;;  %v5947_v49 = vld [vmem:[#allocation2 + $0x848] sm:$0xf0] }
 0x16d   :  { %3210 = vmatpush.bf16.msra.mxu3 %v4190_v62  ;;  %v4554_v62 = vor.u32 %v5849_v32, %v4553_v31  ;;  %v4497_v31 = vld [vmem:[#allocation2 + $0x4b0] sm:$0xf]  ;;  %v5835_v32 = vld [vmem:[#allocation2 + $0x4c8] sm:$0xf0] }
 0x16e   :  { %3169 = vmatpush.bf16.msra.mxu0 %v5054_v9  ;;  %v4749_v9 = vld [vmem:[#allocation2 + $0x6a8] sm:$0xf]  ;;  %v4498_v55 = vor.u32 %v5835_v32, %v4497_v31  ;;  %v4665_v31 = vld [vmem:[#allocation2 + $0x600] sm:$0xf] }
 0x16f   :  { %3183 = vmatpush.bf16.msra.mxu1 %v5278_v14  ;;  %v5898_v14 = vld [vmem:[#allocation2 + $0x6c0] sm:$0xf0] }
 0x170   :  { %3197 = vmatpush.bf16.msra.mxu2 %v3938_v15  ;;  %v4973_v15 = vld [vmem:[#allocation2 + $0x868] sm:$0xf]  ;;  %v4750_v28 = vor.u32 %v5898_v14, %v4749_v9  ;;  %v5884_v9 = vld [vmem:[#allocation2 + $0x650] sm:$0xf0] }
 0x171   :  { %3211 = vmatpush.bf16.msra.mxu3 %v4162_v26  ;;  %v4526_v26 = vor.u32 %v5842_v7, %v4525_v6  ;;  %v4974_v16 = vor.u32 %v5954_v18, %v4973_v15  ;;  %v4693_v6 = vld [vmem:[#allocation2 + $0x638] sm:$0xf]  ;;  %v5940_v14 = vld [vmem:[#allocation2 + $0x810] sm:$0xf0]  ;;  %v6459_v15 = vpop.f32.mrf.mxu3 }
 0x172   :  { %3170 = vmatpush.bf16.msra.mxu0 %v5026_v35  ;;  %v5198_v35 = vor.u32 %v6010_v22, %v5197_v19  ;;  %v5141_v18 = vld [vmem:[#allocation2 + $0x9b8] sm:$0xf]  ;;  %v6461_v19 = vpop.f32.mrf.mxu2  ;;  %v4694_v22 = vor.u32 %v5884_v9, %v4693_v6  ;;  %v4637_v6 = vld [vmem:[#allocation2 + $0x5c8] sm:$0xf]  ;;  %v5870_v9 = vld [vmem:[#allocation2 + $0x5e0] sm:$0xf0] }
 0x173   :  { %3184 = vmatpush.bf16.msra.mxu1 %v5250_v51  ;;  %v6454_v51 = vpop.f32.mrf.mxu1 }
 0x174   :  { %3198 = vmatpush.bf16.msra.mxu2 %v3910_v52  ;;  %v5169_v52 = vld [vmem:[#allocation2 + $0x9f0] sm:$0xf] }
 0x175   :  { %3212 = vmatpush.bf16.msra.mxu3 %v4134_v56  ;;  %3171 = vmatmul.bf16.vlgmr.msra.gmra.mxu0 %v6350_v42  ;;  %v4722_v56 = vor.u32 %v5891_v39, %v4721_v33  ;;  %v5170_v7 = vor.u32 %v6003_v53, %v5169_v52  ;;  %v5877_v33 = vld [vmem:[#allocation2 + $0x618] sm:$0xf0]  ;;  %v5113_v52 = vld [vmem:[#allocation2 + $0x980] sm:$0xf] }
 0x176   :  { %3219 = vmatpush.bf16.msrb.mxu0 %v4554_v62  ;;  %3185 = vmatmul.bf16.vlgmr.msra.gmra.mxu1 %v6348_v41  ;;  %v4946_v62 = vor.u32 %v5947_v49, %v4945_v45  ;;  %v5933_v39 = vld [vmem:[#allocation2 + $0x7d8] sm:$0xf0]  ;;  %v6463_v45 = vpop.f32.mrf.mxu0  ;;  %v5968_v41 = vld [vmem:[#allocation2 + $0x8f0] sm:$0xf0] }
 0x177   :  { %3233 = vmatpush.bf16.msrb.mxu1 %v4778_v3  ;;  %3199 = vmatmul.bf16.vlgmr.msra.gmra.mxu2 %v6301_v57  ;;  %v4469_v3 = vld [vmem:[#allocation2 + $0x478] sm:$0xf]  ;;  %v5996_v57 = vld [vmem:[#allocation2 + $0x9d0] sm:$0xf0]  ;;  %v5989_v53 = vld [vmem:[#allocation2 + $0x998] sm:$0xf0] }
 0x178   :  { %3247 = vmatpush.bf16.msrb.mxu2 %v5002_v5  ;;  %3213 = vmatmul.bf16.vlgmr.msra.gmra.mxu3 %v6316_v11  ;;  %v5828_v5 = vld [vmem:[#allocation2 + $0x490] sm:$0xf0]  ;;  %v5142_v32 = vor.u32 %v5996_v57, %v5141_v18  ;;  %v5085_v18 = vld [vmem:[#allocation2 + $0x948] sm:$0xf]  ;;  %v5982_v57 = vld [vmem:[#allocation2 + $0x960] sm:$0xf0] }
 0x179   :  { %3261 = vmatpush.bf16.msrb.mxu3 %v5226_v12  ;;  %v4917_v12 = vld [vmem:[#allocation2 + $0x7f8] sm:$0xf]  ;;  %v4470_v11 = vor.u32 %v5828_v5, %v4469_v3  ;;  %v4413_v3 = vld [vmem:[#allocation2 + $0x408] sm:$0xf]  ;;  %v5814_v5 = vld [vmem:[#allocation2 + $0x420] sm:$0xf0] }
 0x17a   :  { %3220 = vmatpush.bf16.msrb.mxu0 %v4526_v26  ;;  %v4918_v26 = vor.u32 %v5940_v14, %v4917_v12  ;;  %v4861_v12 = vld [vmem:[#allocation2 + $0x788] sm:$0xf]  ;;  %v5926_v14 = vld [vmem:[#allocation2 + $0x7a0] sm:$0xf0]  ;;  %v6467_v63 = vpop.f32.mrf.mxu2  ;;  %v4414_v46 = vor.u32 %v5814_v5, %v4413_v3 }
 0x17b   :  { %3234 = vmatpush.bf16.msrb.mxu1 %v4750_v28  ;;  %v4441_v28 = vld [vmem:[#allocation2 + $0x440] sm:$0xf]  ;;  %v6465_v49 = vpop.f32.mrf.mxu1  ;;  %6580 = vst [vmem:[#allocation14_spill] sm:$0xff] %v6467_v63  ;;  %v4357_v63 = vld [vmem:[#allocation2 + $0x398] sm:$0xf] }
 0x17c   :  { %3248 = vmatpush.bf16.msrb.mxu2 %v4974_v16  ;;  %v5821_v16 = vld [vmem:[#allocation2 + $0x458] sm:$0xf0]  ;;  %6579 = vst [vmem:[#allocation13_spill] sm:$0xff] %v6465_v49 }
 0x17d   :  { %3262 = vmatpush.bf16.msrb.mxu3 %v5198_v35  ;;  %v4889_v35 = vld [vmem:[#allocation2 + $0x7c0] sm:$0xf] }
 0x17e   :  { %3221 = vmatpush.bf16.msrb.mxu0 %v4498_v55  ;;  %v4442_v55 = vor.u32 %v5821_v16, %v4441_v28  ;;  %v4385_v28 = vld [vmem:[#allocation2 + $0x3d0] sm:$0xf]  ;;  %v5807_v16 = vld [vmem:[#allocation2 + $0x3e8] sm:$0xf0]  ;;  %v6471_v3 = vpop.f32.mrf.mxu0 }
 0x17f   :  { %3235 = vmatpush.bf16.msrb.mxu1 %v4722_v56  ;;  %v4666_v56 = vor.u32 %v5877_v33, %v4665_v31  ;;  %v4609_v31 = vld [vmem:[#allocation2 + $0x590] sm:$0xf]  ;;  %v5863_v33 = vld [vmem:[#allocation2 + $0x5a8] sm:$0xf0] }
 0x180   :  { %3249 = vmatpush.bf16.msrb.mxu2 %v4946_v62  ;;  %v4890_v62 = vor.u32 %v5933_v39, %v4889_v35  ;;  %v4833_v35 = vld [vmem:[#allocation2 + $0x750] sm:$0xf]  ;;  %v5919_v39 = vld [vmem:[#allocation2 + $0x768] sm:$0xf0] }
 0x181   :  { %3263 = vmatpush.bf16.msrb.mxu3 %v5170_v7  ;;  %v5114_v7 = vor.u32 %v5989_v53, %v5113_v52  ;;  %v5057_v52 = vld [vmem:[#allocation2 + $0x910] sm:$0xf]  ;;  %v5975_v53 = vld [vmem:[#allocation2 + $0x928] sm:$0xf0]  ;;  %v4834_v5 = vor.u32 %v5919_v39, %v4833_v35  ;;  %v6081_v35 = vld [vmem:[#allocation6 + $0x38] sm:$0xff] }
 0x182   :  { %3222 = vmatpush.bf16.msrb.mxu0 %v4470_v11  ;;  %v6469_v11 = vpop.f32.mrf.mxu3  ;;  %v6089_v39 = vld [vmem:[#allocation6 + $0x78] sm:$0xff] }
 0x183   :  { %3236 = vmatpush.bf16.msrb.mxu1 %v4694_v22  ;;  %v4638_v22 = vor.u32 %v5870_v9, %v4637_v6  ;;  %v5800_v6 = vld [vmem:[#allocation2 + $0x3b0] sm:$0xf0]  ;;  %v4581_v9 = vld [vmem:[#allocation2 + $0x558] sm:$0xf] }
 0x184   :  { %3250 = vmatpush.bf16.msrb.mxu2 %v4918_v26  ;;  %v4862_v26 = vor.u32 %v5926_v14, %v4861_v12  ;;  %v5058_v12 = vor.u32 %v5975_v53, %v5057_v52  ;;  %v4805_v14 = vld [vmem:[#allocation2 + $0x718] sm:$0xf]  ;;  %v5421_v52 = vld [vmem:[#allocation2 + $0xbe8] sm:$0xf]  ;;  %v6066_v53 = vld [vmem:[#allocation2 + $0xc00] sm:$0xf0] }
 0x185   :  { %3264 = vmatpush.bf16.msrb.mxu3 %v5142_v32  ;;  %v5086_v32 = vor.u32 %v5982_v57, %v5085_v18  ;;  %v5912_v18 = vld [vmem:[#allocation2 + $0x730] sm:$0xf0]  ;;  %v5029_v57 = vld [vmem:[#allocation2 + $0x8d8] sm:$0xf] }
 0x186   :  { %3223 = vmatpush.bf16.msrb.mxu0 %v4442_v55  ;;  %v4386_v55 = vor.u32 %v5807_v16, %v4385_v28  ;;  %v6073_v28 = vld [vmem:[#allocation2 + $0xc38] sm:$0xf0]  ;;  %v4358_v16 = vor.u32 %v5800_v6, %v4357_v63  ;;  %v6479_v63 = vpop.f32.mrf.mxu0 }
 0x187   :  { %3237 = vmatpush.bf16.msrb.mxu1 %v4666_v56  ;;  %v6473_v56 = vpop.f32.mrf.mxu1 }
 0x188   :  { %3251 = vmatpush.bf16.msrb.mxu2 %v4890_v62  ;;  %6581 = vst [vmem:[#allocation15_spill] sm:$0xff] %v6473_v56  ;;  %v4610_v62 = vor.u32 %v5863_v33, %v4609_v31  ;;  %v6477_v31 = vpop.f32.mrf.mxu2  ;;  %v5030_v33 = vor.u32 %v5968_v41, %v5029_v57  ;;  %v6097_v56 = vld [vmem:[#allocation6 + $0xb8] sm:$0xff] }
 0x189   :  { %3265 = vmatpush.bf16.msrb.mxu3 %v5114_v7  ;;  %v5856_v7 = vld [vmem:[#allocation2 + $0x570] sm:$0xf0] }
 0x18a   :  { %3224 = vmatpush.bf16.msrb.mxu0 %v4414_v46  ;;  %v5449_v46 = vld [vmem:[#allocation2 + $0xc20] sm:$0xf]  ;;  %v6475_v49 = vpop.f32.mrf.mxu3 }
 0x18b   :  { %3238 = vmatpush.bf16.msrb.mxu1 %v4638_v22  ;;  %v4582_v22 = vor.u32 %v5856_v7, %v4581_v9  ;;  %v6088_v9 = vld [vmem:[#allocation6 + $0x70] sm:$0xff]  ;;  %v5393_v7 = vld [vmem:[#allocation2 + $0xbb0] sm:$0xf] }
 0x18c   :  { %3252 = vmatpush.bf16.msrb.mxu2 %v4862_v26  ;;  %v4806_v26 = vor.u32 %v5912_v18, %v4805_v14  ;;  %v6096_v14 = vld [vmem:[#allocation6 + $0xb0] sm:$0xff]  ;;  %v6582_v18 = vperm.slane %v6364_v54, 1 }
 0x18d   :  { %3266 = vmatpush.bf16.msrb.mxu3 %v5086_v32  ;;  %v5450_v32 = vor.u32 %v6073_v28, %v5449_v46  ;;  %v6079_v28 = vld [vmem:[#allocation6 + $0x28] sm:$0xff] }
 0x18e   :  { %3225 = vmatpush.bf16.msrb.mxu0 %v4386_v55  ;;  %v5422_v55 = vor.u32 %v6066_v53, %v5421_v52  ;;  %v2713_v57 = vadd.f32 %v6413_v25, %v6582_v18  ;;  %v6505_v52 = vpop.f32.mrf.mxu0  ;;  %v5337_v53 = vld [vmem:[#allocation2 + $0xb40] sm:$0xf]  ;;  %v6038_v18 = vld [vmem:[#allocation2 + $0xb20] sm:$0xf0] }
 0x18f   :  { %3239 = vmatpush.bf16.msrb.mxu1 %v4610_v62  ;;  %v6080_v62 = vld [vmem:[#allocation6 + $0x30] sm:$0xff]  ;;  %v6484_v41 = vpop.f32.mrf.mxu1 }
 0x190   :  { %3253 = vmatpush.bf16.msrb.mxu2 %v4834_v5  ;;  %v6481_v5 = vld [vmem:[#allocation4] sm:$0xff] }
 0x191   :  { %3267 = vmatpush.bf16.msrb.mxu3 %v5058_v12  ;;  %v539_v6 = vperm.slane %v6481_v5, 2  ;;  %v6059_v12 = vld [vmem:[#allocation2 + $0xbc8] sm:$0xf0] }
 0x192   :  { %3226 = vmatpush.bf16.msrb.mxu0 %v4358_v16  ;;  %v5394_v46 = vor.u32 %v6059_v12, %v5393_v7  ;;  %v6085_v12 = vld [vmem:[#allocation6 + $0x58] sm:$0xff] }
 0x193   :  { %3240 = vmatpush.bf16.msrb.mxu1 %v4582_v22  ;;  %v2809_v16 = vadd.f32 %v6431_v2, %v539_v6  ;;  %v6495_v22 = vpop.f32.mrf.mxu3 }
 0x194   :  { %3254 = vmatpush.bf16.msrb.mxu2 %v4806_v26  ;;  %v6583_v26 = vperm.slane %v6364_v54, 0  ;;  %v6086_v54 = vld [vmem:[#allocation6 + $0x60] sm:$0xff] }
 0x195   :  { %3268 = vmatpush.bf16.msrb.mxu3 %v5030_v33  ;;  %3227 = vmatmul.bf16.vlgmr.msrb.gmra.mxu0 %v6306_v0  ;;  %v6087_v0 = vld [vmem:[#allocation6 + $0x68] sm:$0xff]  ;;  %v6500_v33 = vpop.f32.mrf.mxu2 }
 0x196   :  { %3275 = vmatpush.bf16.msra.mxu0 %v5450_v32  ;;  %3241 = vmatmul.bf16.vlgmr.msrb.gmra.mxu1 %v6325_v23  ;;  %v2615_v25 = vadd.f32 %v6375_v30, %v6583_v26  ;;  %v6095_v32 = vld [vmem:[#allocation6 + $0xa8] sm:$0xff]  ;;  %v2727_v23 = vadd.f32 %v6415_v48, %v2713_v57  ;;  %v6045_v30 = vld [vmem:[#allocation2 + $0xb58] sm:$0xf0]  ;;  %v6093_v57 = vld [vmem:[#allocation6 + $0x98] sm:$0xff] }
 0x197   :  { %3748 = vmatpush.bf16.msra.mxu1 %v6081_v35  ;;  %3255 = vmatmul.bf16.vlgmr.msrb.gmra.mxu2 %v6346_v37  ;;  %v5365_v37 = vld [vmem:[#allocation2 + $0xb78] sm:$0xf]  ;;  %v2823_v35 = vadd.f32 %v6439_v50, %v2809_v16  ;;  %v6077_v50 = vld [vmem:[#allocation6 + $0x18] sm:$0xff] }
 0x198   :  { %3762 = vmatpush.bf16.msra.mxu2 %v6089_v39  ;;  %3269 = vmatmul.bf16.vlgmr.msrb.gmra.mxu3 %v6350_v42  ;;  %v6052_v42 = vld [vmem:[#allocation2 + $0xb90] sm:$0xf0]  ;;  %v2741_v48 = vadd.f32 %v6417_v60, %v2727_v23  ;;  %v2767_v23 = vadd.f32 %v6419_v17, %v6403_v58 }
 0x199   :  { %3776 = vmatpush.bf16.msra.mxu3 %v6097_v56  ;;  %v2811_v56 = vadd.f32 %v6441_v61, %v539_v6  ;;  %v5366_v2 = vor.u32 %v6052_v42, %v5365_v37  ;;  %v6078_v61 = vld [vmem:[#allocation6 + $0x20] sm:$0xff]  ;;  %v6508_v6 = vpop.f32.mrf.mxu1  ;;  %v3004_v37 = vpop.f32.mrf.mxu0 }
 0x19a   :  { %3276 = vmatpush.bf16.msra.mxu0 %v5422_v55  ;;  %v2629_v55 = vadd.f32 %v6377_v43, %v2615_v25  ;;  %v2755_v60 = vadd.f32 %v6421_v21, %v2741_v48  ;;  %v6031_v42 = vld [vmem:[#allocation2 + $0xae8] sm:$0xf0]  ;;  %v6092_v25 = vld [vmem:[#allocation6 + $0x90] sm:$0xff]  ;;  %v2781_v17 = vadd.f32 %v6424_v34, %v2767_v23  ;;  %v6105_v34 = vld [vmem:[#allocation6 + $0xf8] sm:$0xff] }
 0x19b   :  { %3749 = vmatpush.bf16.msra.mxu1 %v6080_v62  ;;  %v2825_v39 = vadd.f32 %v6447_v1, %v2811_v56  ;;  %v6094_v62 = vld [vmem:[#allocation6 + $0xa0] sm:$0xff]  ;;  %v2837_v1 = vadd.f32 %v6443_v13, %v2823_v35  ;;  %v6076_v13 = vld [vmem:[#allocation6 + $0x10] sm:$0xff] }
 0x19c   :  { %3763 = vmatpush.bf16.msra.mxu2 %v6088_v9  ;;  %v5338_v9 = vor.u32 %v6045_v30, %v5337_v53  ;;  %v2643_v43 = vadd.f32 %v6382_v59, %v2629_v55  ;;  %v5281_v59 = vld [vmem:[#allocation2 + $0xad0] sm:$0xf]  ;;  %v6082_v48 = vld [vmem:[#allocation6 + $0x40] sm:$0xff] }
 0x19d   :  { %3777 = vmatpush.bf16.msra.mxu3 %v6096_v14  ;;  %v2839_v7 = vadd.f32 %v6451_v27, %v2825_v39  ;;  %v5309_v14 = vld [vmem:[#allocation2 + $0xb08] sm:$0xf]  ;;  %v2851_v27 = vadd.f32 %v6445_v29, %v2837_v1  ;;  %v2769_v29 = vadd.f32 %v6433_v4, %v2755_v60  ;;  %v5253_v39 = vld [vmem:[#allocation2 + $0xa98] sm:$0xf]  ;;  %v540_v1 = vperm.slane %v6481_v5, 3 }
 0x19e   :  { %3277 = vmatpush.bf16.msra.mxu0 %v5394_v46  ;;  %v6514_v46 = vpop.f32.mrf.mxu3  ;;  %v5310_v16 = vor.u32 %v6038_v18, %v5309_v14  ;;  %v2657_v26 = vadd.f32 %v6388_v20, %v2643_v43  ;;  %v6083_v20 = vld [vmem:[#allocation6 + $0x48] sm:$0xff] }
 0x19f   :  { %3750 = vmatpush.bf16.msra.mxu1 %v6079_v28  ;;  %v6517_v28 = vpop.f32.mrf.mxu2  ;;  %v2853_v56 = vadd.f32 %v6454_v51, %v2839_v7  ;;  %v5282_v51 = vor.u32 %v6031_v42, %v5281_v59  ;;  %v2783_v53 = vadd.f32 %v6435_v24, %v2769_v29  ;;  %v6587_v42 = vld [vmem:[#allocation14_spill] sm:$0xff] }
 0x1a0   :  { %3764 = vmatpush.bf16.msra.mxu2 %v6087_v0  ;;  %v6084_v0 = vld [vmem:[#allocation6 + $0x50] sm:$0xff]  ;;  %v6121_v29 = vld [vmem:[#allocation6 + $0x178] sm:$0xff] }
 0x1a1   :  { %3778 = vmatpush.bf16.msra.mxu3 %v6095_v32  ;;  %v6522_v21 = vpop.f32.mrf.mxu1  ;;  %v2671_v32 = vadd.f32 %v6390_v38, %v2657_v26  ;;  %v2867_v35 = vadd.f32 %v6461_v19, %v2853_v56  ;;  %v6091_v38 = vld [vmem:[#allocation6 + $0x88] sm:$0xff]  ;;  %v3006_v7 = vpop.f32.mrf.mxu0 }
 0x1a2   :  { %3278 = vmatpush.bf16.msra.mxu0 %v5366_v2  ;;  %v6075_v2 = vld [vmem:[#allocation6 + $0x8] sm:$0xff] }
 0x1a3   :  { %3751 = vmatpush.bf16.msra.mxu1 %v6078_v61  ;;  %v2865_v61 = vadd.f32 %v6449_v10, %v2851_v27  ;;  %v2685_v58 = vadd.f32 %v6393_v47, %v2671_v32  ;;  %v2881_v19 = vadd.f32 %v6469_v11, %v2867_v35  ;;  %v6090_v47 = vld [vmem:[#allocation6 + $0x80] sm:$0xff]  ;;  %v2795_v11 = vadd.f32 %v6429_v44, %v2781_v17  ;;  %v6112_v27 = vld [vmem:[#allocation6 + $0x130] sm:$0xff]  ;;  %v6111_v32 = vld [vmem:[#allocation6 + $0x128] sm:$0xff] }
 0x1a4   :  { %3765 = vmatpush.bf16.msra.mxu2 %v6086_v54  ;;  %v6024_v54 = vld [vmem:[#allocation2 + $0xab0] sm:$0xf0]  ;;  %v6586_v44 = vld [vmem:[#allocation12_spill] sm:$0xff] }
 0x1a5   :  { %3779 = vmatpush.bf16.msra.mxu3 %v6094_v62  ;;  %v5254_v4 = vor.u32 %v6024_v54, %v5253_v39  ;;  %v2879_v10 = vadd.f32 %v6459_v15, %v2865_v61  ;;  %v6074_v62 = vld [vmem:[#allocation6] sm:$0xff]  ;;  %v2699_v24 = vadd.f32 %v6401_v8, %v2685_v58  ;;  %v6113_v15 = vld [vmem:[#allocation6 + $0x138] sm:$0xff]  ;;  %v6120_v61 = vld [vmem:[#allocation6 + $0x170] sm:$0xff] }
 0x1a6   :  { %3279 = vmatpush.bf16.msra.mxu0 %v5338_v9  ;;  %v6535_v55 = vpop.f32.mrf.mxu3  ;;  %v2797_v9 = vadd.f32 %v6437_v36, %v2783_v53  ;;  %v6110_v39 = vld [vmem:[#allocation6 + $0x120] sm:$0xff] }
 0x1a7   :  { %3752 = vmatpush.bf16.msra.mxu1 %v6077_v50  ;;  %v3032_v30 = vpop.f32.mrf.mxu2  ;;  %v2895_v50 = vadd.f32 %v6471_v3, %v2881_v19  ;;  %v2893_v14 = vadd.f32 %v6463_v45, %v2879_v10  ;;  %v3289_v36 = vpack.c.bf16 %v2699_v24, %v6386_v40  ;;  %v6104_v3 = vld [vmem:[#allocation6 + $0xf0] sm:$0xff]  ;;  %v6103_v40 = vld [vmem:[#allocation6 + $0xe8] sm:$0xff] }
 0x1a8   :  { %3766 = vmatpush.bf16.msra.mxu2 %v6085_v12  ;;  %v541_v12 = vperm.slane %v6481_v5, 4  ;;  %v3290_v18 = vpack.c.bf16 %v2797_v9, %v2795_v11 }
 0x1a9   :  { %3780 = vmatpush.bf16.msra.mxu3 %v6093_v57  ;;  %v3020_v8 = vpop.f32.mrf.mxu1  ;;  %v3291_v43 = vpack.c.bf16 %v2895_v50, %v2893_v14  ;;  %v6584_v57 = vld [vmem:[#allocation13_spill] sm:$0xff] }
 0x1aa   :  { %3280 = vmatpush.bf16.msra.mxu0 %v5310_v16  ;;  %v2907_v60 = vadd.f32 %v6584_v57, %v540_v1  ;;  %v6585_v16 = vld [vmem:[#allocation15_spill] sm:$0xff]  ;;  %v3005_v56 = vadd.f32 %v3004_v37, %v541_v12  ;;  %v6099_v50 = vld [vmem:[#allocation6 + $0xc8] sm:$0xff]  ;;  %v6116_v57 = vld [vmem:[#allocation6 + $0x150] sm:$0xff] }
 0x1ab   :  { %3753 = vmatpush.bf16.msra.mxu1 %v6076_v13  ;;  %v2909_v13 = vadd.f32 %v6585_v16, %v540_v1  ;;  %v6102_v37 = vld [vmem:[#allocation6 + $0xe0] sm:$0xff]  ;;  %v6115_v16 = vld [vmem:[#allocation6 + $0x148] sm:$0xff] }
 0x1ac   :  { %3767 = vmatpush.bf16.msra.mxu2 %v6084_v0  ;;  %v3007_v0 = vadd.f32 %v3006_v7, %v541_v12  ;;  %v2921_v26 = vadd.f32 %v6587_v42, %v2907_v60  ;;  %v3019_v23 = vadd.f32 %v6522_v21, %v3005_v56  ;;  %v6107_v7 = vld [vmem:[#allocation6 + $0x108] sm:$0xff] }
 0x1ad   :  { %3781 = vmatpush.bf16.msra.mxu3 %v6092_v25  ;;  %v2923_v25 = vadd.f32 %v6477_v31, %v2909_v13 }
 0x1ae   :  { %3281 = vmatpush.bf16.msra.mxu0 %v5282_v51  ;;  %v3046_v45 = vpop.f32.mrf.mxu3  ;;  %v2935_v35 = vadd.f32 %v6475_v49, %v2921_v26  ;;  %v3033_v53 = vadd.f32 %v3032_v30, %v3019_v23  ;;  %v6119_v49 = vld [vmem:[#allocation6 + $0x168] sm:$0xff]  ;;  %v6118_v30 = vld [vmem:[#allocation6 + $0x160] sm:$0xff] }
 0x1af   :  { %3754 = vmatpush.bf16.msra.mxu1 %v6075_v2  ;;  %v3034_v59 = vpop.f32.mrf.mxu2  ;;  %v3021_v2 = vadd.f32 %v3020_v8, %v3007_v0 }
 0x1b0   :  { %3768 = vmatpush.bf16.msra.mxu2 %v6083_v20  ;;  %v2937_v20 = vadd.f32 %v6495_v22, %v2923_v25  ;;  %v2949_v21 = vadd.f32 %v6479_v63, %v2935_v35  ;;  %v3047_v10 = vadd.f32 %v3046_v45, %v3033_v53  ;;  %v6108_v63 = vld [vmem:[#allocation6 + $0x110] sm:$0xff]  ;;  %v6129_v53 = vld [vmem:[#allocation6 + $0x1b8] sm:$0xff] }
 0x1b1   :  { %3782 = vmatpush.bf16.msra.mxu3 %v6091_v38  ;;  %v3035_v31 = vadd.f32 %v3034_v59, %v3021_v2  ;;  %v6101_v38 = vld [vmem:[#allocation6 + $0xd8] sm:$0xff] }
 0x1b2   :  { %3282 = vmatpush.bf16.msra.mxu0 %v5254_v4  ;;  %v3060_v51 = vpop.f32.mrf.mxu0  ;;  %v2951_v58 = vadd.f32 %v6505_v52, %v2937_v20  ;;  %v6109_v4 = vld [vmem:[#allocation6 + $0x118] sm:$0xff]  ;;  %v2963_v24 = vadd.f32 %v6484_v41, %v2949_v21 }
 0x1b3   :  { %3755 = vmatpush.bf16.msra.mxu1 %v6074_v62  ;;  %v3074_v54 = vpop.f32.mrf.mxu1 }
 0x1b4   :  { %3769 = vmatpush.bf16.msra.mxu2 %v6082_v48  ;;  %v6100_v48 = vld [vmem:[#allocation6 + $0xd0] sm:$0xff]  ;;  %v2965_v9 = vadd.f32 %v6508_v6, %v2951_v58  ;;  %v2977_v1 = vadd.f32 %v6500_v33, %v2963_v24  ;;  %v6098_v6 = vld [vmem:[#allocation6 + $0xc0] sm:$0xff]  ;;  %v6123_v24 = vld [vmem:[#allocation6 + $0x188] sm:$0xff] }
 0x1b5   :  { %3783 = vmatpush.bf16.msra.mxu3 %v6090_v47  ;;  %3283 = vmatmul.bf16.vlgmr.msra.gmra.mxu0 %v6586_v44  ;;  %v3061_v47 = vadd.f32 %v3060_v51, %v3047_v10  ;;  %v6114_v44 = vld [vmem:[#allocation6 + $0x140] sm:$0xff]  ;;  %v6128_v58 = vld [vmem:[#allocation6 + $0x1b0] sm:$0xff] }
 0x1b6   :  { %3790 = vmatpush.bf16.msrb.mxu0 %v6105_v34  ;;  %3756 = vmatmul.bf16.vlgmr.msra.gmra.mxu1 %v3289_v36  ;;  %v3048_v17 = vpop.f32.mrf.mxu3  ;;  %v2991_v8 = vadd.f32 %v6514_v46, %v2977_v1 }
 0x1b7   :  { %3804 = vmatpush.bf16.msrb.mxu1 %v6113_v15  ;;  %3770 = vmatmul.bf16.vlgmr.msra.gmra.mxu2 %v3290_v18  ;;  %v3049_v22 = vadd.f32 %v3048_v17, %v3035_v31  ;;  %v2979_v15 = vadd.f32 %v6517_v28, %v2965_v9  ;;  %v3075_v11 = vadd.f32 %v3074_v54, %v3061_v47  ;;  %v6106_v18 = vld [vmem:[#allocation6 + $0x100] sm:$0xff]  ;;  %v6117_v28 = vld [vmem:[#allocation6 + $0x158] sm:$0xff] }
 0x1b8   :  { %3784 = vmatmul.bf16.vlgmr.msra.gmra.mxu3 %v3291_v43  ;;  %3818 = vmatpush.bf16.msrb.mxu2 %v6121_v29  ;;  %v6122_v9 = vld [vmem:[#allocation6 + $0x180] sm:$0xff] }
 0x1b9   :  { %v2993_v36 = vadd.f32 %v6535_v55, %v2979_v15  ;;  %v542_v55 = vperm.slane %v6481_v5, 5  ;;  %3832 = vmatpush.bf16.msrb.mxu3 %v6129_v53 }
 0x1ba   :  { %3791 = vmatpush.bf16.msrb.mxu0 %v6104_v3  ;;  %v3088_v19 = vpop.f32.mrf.mxu2  ;;  %v3062_v62 = vpop.f32.mrf.mxu0 }
 0x1bb   :  { %3805 = vmatpush.bf16.msrb.mxu1 %v6112_v27  ;;  %v3063_v52 = vadd.f32 %v3062_v62, %v3049_v22  ;;  %v3076_v34 = vpop.f32.mrf.mxu1  ;;  %v3089_v3 = vadd.f32 %v3088_v19, %v3075_v11  ;;  %v3292_v33 = vpack.c.bf16 %v2993_v36, %v2991_v8  ;;  %v6127_v19 = vld [vmem:[#allocation6 + $0x1a8] sm:$0xff]  ;;  %v6125_v62 = vld [vmem:[#allocation6 + $0x198] sm:$0xff] }
 0x1bc   :  { %3819 = vmatpush.bf16.msrb.mxu2 %v6120_v61 }
 0x1bd   :  { %v3077_v12 = vadd.f32 %v3076_v34, %v3063_v52  ;;  %3833 = vmatpush.bf16.msrb.mxu3 %v6128_v58  ;;  %v543_v52 = vperm.slane %v6481_v5, 6 }
 0x1be   :  { %3792 = vmatpush.bf16.msrb.mxu0 %v6103_v40  ;;  %v3102_v60 = vpop.f32.mrf.mxu3 }
 0x1bf   :  { %3806 = vmatpush.bf16.msrb.mxu1 %v6111_v32  ;;  %v3103_v56 = vadd.f32 %v3102_v60, %v542_v55 }
 0x1c0   :  { %3820 = vmatpush.bf16.msrb.mxu2 %v6119_v49  ;;  %v6126_v49 = vld [vmem:[#allocation6 + $0x1a0] sm:$0xff] }
 0x1c1   :  { %3834 = vmatpush.bf16.msrb.mxu3 %v6127_v19 }
 0x1c2   :  { %3793 = vmatpush.bf16.msrb.mxu0 %v6102_v37  ;;  %v3090_v14 = vpop.f32.mrf.mxu2 }
 0x1c3   :  { %3807 = vmatpush.bf16.msrb.mxu1 %v6110_v39  ;;  %v3091_v41 = vadd.f32 %v3090_v14, %v3077_v12 }
 0x1c4   :  { %3821 = vmatpush.bf16.msrb.mxu2 %v6118_v30 }
 0x1c5   :  { %v3293_v43 = vpack.c.bf16 %v3091_v41, %v3089_v3  ;;  %3835 = vmatpush.bf16.msrb.mxu3 %v6126_v49 }
 0x1c6   :  { %3794 = vmatpush.bf16.msrb.mxu0 %v6101_v38  ;;  %v3104_v27 = vpop.f32.mrf.mxu3 }
 0x1c7   :  { %3808 = vmatpush.bf16.msrb.mxu1 %v6109_v4  ;;  %v3105_v59 = vadd.f32 %v3104_v27, %v542_v55 }
 0x1c8   :  { %3822 = vmatpush.bf16.msrb.mxu2 %v6117_v28 }
 0x1c9   :  { %3836 = vmatpush.bf16.msrb.mxu3 %v6125_v62 }
 0x1ca   :  { %3795 = vmatpush.bf16.msrb.mxu0 %v6100_v48  ;;  %v6124_v48 = vld [vmem:[#allocation6 + $0x190] sm:$0xff] }
 0x1cb   :  { %3809 = vmatpush.bf16.msrb.mxu1 %v6108_v63 }
 0x1cc   :  { %3823 = vmatpush.bf16.msrb.mxu2 %v6116_v57 }
 0x1cd   :  { %3837 = vmatpush.bf16.msrb.mxu3 %v6124_v48 }
 0x1ce   :  { %3796 = vmatpush.bf16.msrb.mxu0 %v6099_v50 }
 0x1cf   :  { %3810 = vmatpush.bf16.msrb.mxu1 %v6107_v7 }
 0x1d0   :  { %3824 = vmatpush.bf16.msrb.mxu2 %v6115_v16 }
 0x1d1   :  { %3838 = vmatpush.bf16.msrb.mxu3 %v6123_v24 }
 0x1d2   :  { %3797 = vmatpush.bf16.msrb.mxu0 %v6098_v6  ;;  %v3116_v13 = vpop.f32.mrf.mxu0 }
 0x1d3   :  { %3811 = vmatpush.bf16.msrb.mxu1 %v6106_v18  ;;  %v3130_v46 = vpop.f32.mrf.mxu1  ;;  %v3117_v40 = vadd.f32 %v3116_v13, %v3103_v56 }
 0x1d4   :  { %3825 = vmatpush.bf16.msrb.mxu2 %v6114_v44 }
 0x1d5   :  { %3798 = vmatmul.bf16.vlgmr.msrb.gmra.mxu0 %v3292_v33  ;;  %v3131_v25 = vadd.f32 %v3130_v46, %v3117_v40  ;;  %3839 = vmatpush.bf16.msrb.mxu3 %v6122_v9 }
 0x1d6   :  { %3812 = vmatmul.bf16.vlgmr.msrb.gmra.mxu1 %v3293_v43 }
 0x1da   :  { %v3118_v45 = vpop.f32.mrf.mxu0  ;;  %v3144_v0 = vpop.f32.mrf.mxu2 }
 0x1db   :  { %v3132_v42 = vpop.f32.mrf.mxu1  ;;  %v3158_v26 = vpop.f32.mrf.mxu3  ;;  %v3119_v32 = vadd.f32 %v3118_v45, %v3105_v59  ;;  %v3145_v29 = vadd.f32 %v3144_v0, %v3131_v25  ;;  %v6138_v45 = vld [vmem:[#allocation7] ss:$0 sm:$0xff] }
 0x1dd   :  { %v3133_v23 = vadd.f32 %v3132_v42, %v3119_v32  ;;  %v3159_v61 = vadd.f32 %v3158_v26, %v3145_v29 }
 0x1e2   :  { %v3146_v2 = vpop.f32.mrf.mxu2 }
 0x1e3   :  { %v3147_v35 = vadd.f32 %v3146_v2, %v3133_v23  ;;  %v3160_v20 = vpop.f32.mrf.mxu3 }
 0x1e5   :  { %v3161_v54 = vadd.f32 %v3160_v20, %v3147_v35 }
 0x1f2   :  { %v3172_v51 = vpop.f32.mrf.mxu0 }
 0x1f3   :  { %v3186_v37 = vpop.f32.mrf.mxu1  ;;  %v3173_v39 = vadd.f32 %v3172_v51, %v3159_v61 }
 0x1f5   :  { %v3187_v17 = vadd.f32 %v3186_v37, %v3173_v39 }
 0x1fa   :  { %v3174_v31 = vpop.f32.mrf.mxu0  ;;  %v3200_v22 = vpop.f32.mrf.mxu2 }
 0x1fb   :  { %v3175_v38 = vadd.f32 %v3174_v31, %v3161_v54  ;;  %v3188_v21 = vpop.f32.mrf.mxu1  ;;  %v3214_v30 = vpop.f32.mrf.mxu3  ;;  %v3201_v1 = vadd.f32 %v3200_v22, %v543_v52 }
 0x1fd   :  { %v3189_v4 = vadd.f32 %v3188_v21, %v3175_v38  ;;  %v3215_v11 = vadd.f32 %v3214_v30, %v3201_v1 }
 0x1ff   :  { %v3294_v10 = vpack.c.bf16 %v3189_v4, %v3187_v17 }
 0x201   :  { %3826 = vmatmul.bf16.vlgmr.msrb.gmra.mxu2 %v3294_v10 }
 0x202   :  { %v3202_v63 = vpop.f32.mrf.mxu2 }
 0x203   :  { %v3216_v34 = vpop.f32.mrf.mxu3  ;;  %v3203_v15 = vadd.f32 %v3202_v63, %v543_v52 }
 0x205   :  { %v3217_v12 = vadd.f32 %v3216_v34, %v3203_v15 }
 0x212   :  { %v3228_v47 = vpop.f32.mrf.mxu0 }
 0x213   :  { %v3242_v50 = vpop.f32.mrf.mxu1  ;;  %v3229_v6 = vadd.f32 %v3228_v47, %v3215_v11 }
 0x215   :  { %v3243_v18 = vadd.f32 %v3242_v50, %v3229_v6 }
 0x21a   :  { %v3256_v7 = vpop.f32.mrf.mxu2  ;;  %v3230_v14 = vpop.f32.mrf.mxu0 }
 0x21b   :  { %v3270_v41 = vpop.f32.mrf.mxu3  ;;  %v3231_v8 = vadd.f32 %v3230_v14, %v3217_v12  ;;  %v3244_v36 = vpop.f32.mrf.mxu1  ;;  %v3257_v28 = vadd.f32 %v3256_v7, %v3243_v18 }
 0x21d   :  { %v3245_v3 = vadd.f32 %v3244_v36, %v3231_v8  ;;  %v3271_v5 = vadd.f32 %v3270_v41, %v3257_v28 }
 0x222   :  { %v3258_v43 = vpop.f32.mrf.mxu2 }
 0x223   :  { %v3259_v57 = vadd.f32 %v3258_v43, %v3245_v3  ;;  %v3272_v60 = vpop.f32.mrf.mxu3 }
 0x225   :  { %v3273_v16 = vadd.f32 %v3272_v60, %v3259_v57 }
 0x232   :  { %v3284_v33 = vpop.f32.mrf.mxu0 }
 0x233   :  { %v3285_v46 = vadd.f32 %v3284_v33, %v3271_v5  ;;  %v3757_v27 = vpop.f32.mrf.mxu1 }
 0x234   :  { %v3758_v40 = vadd.f32 %v6138_v45, %v3757_v27 }
 0x23a   :  { %v3286_v13 = vpop.f32.mrf.mxu0  ;;  %v3771_v56 = vpop.f32.mrf.mxu2 }
 0x23b   :  { %v3287_v44 = vadd.f32 %v3286_v13, %v3273_v16  ;;  %v3785_v0 = vpop.f32.mrf.mxu3  ;;  %v3759_v59 = vpop.f32.mrf.mxu1  ;;  %v3772_v26 = vadd.f32 %v3771_v56, %v3758_v40 }
 0x23c   :  { %v3760_v29 = vadd.f32 %v6138_v45, %v3759_v59 }
 0x23d   :  { %v3295_v55 = vpack.c.bf16 %v3287_v44, %v3285_v46  ;;  %v3786_v32 = vadd.f32 %v3785_v0, %v3772_v26 }
 0x23f   :  { %3840 = vmatmul.bf16.vlgmr.msrb.gmra.mxu3 %v3295_v55 }
 0x242   :  { %v3773_v42 = vpop.f32.mrf.mxu2 }
 0x243   :  { %v3787_v23 = vpop.f32.mrf.mxu3  ;;  %v3774_v61 = vadd.f32 %v3773_v42, %v3760_v29 }
 0x245   :  { %v3788_v39 = vadd.f32 %v3787_v23, %v3774_v61 }
 0x252   :  { %v3799_v25 = vpop.f32.mrf.mxu0 }
 0x253   :  { %v3800_v51 = vadd.f32 %v3799_v25, %v3786_v32  ;;  %v3813_v2 = vpop.f32.mrf.mxu1 }
 0x255   :  { %v3814_v35 = vadd.f32 %v3813_v2, %v3800_v51 }
 0x25a   :  { %v3801_v20 = vpop.f32.mrf.mxu0 }
 0x25b   :  { %v3802_v31 = vadd.f32 %v3801_v20, %v3788_v39  ;;  %v3815_v21 = vpop.f32.mrf.mxu1 }
 0x25d   :  { %v3816_v17 = vadd.f32 %v3815_v21, %v3802_v31 }
 0x284   :  { %v3827_v37 = vpop.f32.mrf.mxu2 }
 0x285   :  { %v3828_v54 = vadd.f32 %v3827_v37, %v3814_v35 }
 0x28c   :  { %v3829_v58 = vpop.f32.mrf.mxu2 }
 0x28d   :  { %v3830_v4 = vadd.f32 %v3829_v58, %v3816_v17 }
 0x2c2   :  { %v3841_v53 = vpop.f32.mrf.mxu3 }
 0x2c3   :  { %v3842_v38 = vadd.f32 %v3841_v53, %v3828_v54 }
 0x2c5   :  { %3846 = vst [vmem:[%s6574_s5] sm:$0xff] %v3842_v38 }
 0x2ca   :  { %v3843_v10 = vpop.f32.mrf.mxu3 }
 0x2cb   :  { %v3844_v19 = vadd.f32 %v3843_v10, %v3830_v4 }
 0x2cd   :  { %3847 = vst [vmem:[%s6574_s5 + $0x8] sm:$0xff] %v3844_v19 }
 0x2ce   :  { %3852 = vsyncpa [#allocation3], 1 }
 0x2cf   :  { %3853 = vsyncpa [#allocation5], 1 }
 0x2d0   :  { %3854 = vsyncpa [#allocation8], 1 }

</bundles_post_ra>
